<compile_context>
chip_gen: v7x
topology: tpu7x:2x2x1
jax: 0.10.0
libtpu: 0.0.40
codegen_flags: <defaults>
</compile_context>

<pallas_src>
import functools

import jax
import jax.numpy as jnp
from jax.experimental import pallas as pl
from jax.experimental.pallas import tpu as pltpu

EMB = 64
LN_EPS = 1e-5


# ----------------------------------------------------------------------------
# Shared in-kernel helpers
# ----------------------------------------------------------------------------
def _layernorm(x, gamma, beta):
    mu = jnp.mean(x, axis=-1, keepdims=True)
    var = jnp.mean((x - mu) ** 2, axis=-1, keepdims=True)
    return (x - mu) * jax.lax.rsqrt(var + LN_EPS) * gamma + beta


def _conv_core(left, right, src_col, dst_col, dst_row,
               wl, bl, wr, ln_g, ln_b, wf, bf,
               pc_g, pc_b, wo1a, wo1b, bo1, wo2, bo2):
    """Fused BipartiteGraphConvolution: returns updated right-node features."""
    n_edges = src_col.shape[0]
    n_left = left.shape[0]
    n_right = right.shape[0]

    # Per-node linears hoisted out of the edge loop (linearity of gather):
    #   feature_module_right (no bias) on x_j = left[src]
    #   feature_module_left  (+ folded edge constant) on x_i = right[dst]
    lt = jnp.dot(left, wr, preferred_element_type=jnp.float32)          # (Nl, 64)
    rt = jnp.dot(right, wl, preferred_element_type=jnp.float32) + bl    # (Nr, 64)

    # In-kernel one-hot gathers (built from index tensors, never in HBM).
    iota_l = jax.lax.broadcasted_iota(jnp.int32, (n_edges, n_left), 1)
    iota_r = jax.lax.broadcasted_iota(jnp.int32, (n_edges, n_right), 1)
    g_src = jnp.where(src_col == iota_l, 1.0, 0.0)                      # (E, Nl)
    g_dst = jnp.where(dst_col == iota_r, 1.0, 0.0)                      # (E, Nr)
    z = (jnp.dot(g_dst, rt, preferred_element_type=jnp.float32)
         + jnp.dot(g_src, lt, preferred_element_type=jnp.float32))      # (E, 64)

    # feature_module_final: LayerNorm -> ReLU -> Linear
    zn = jnp.maximum(_layernorm(z, ln_g, ln_b), 0.0)
    msg = jnp.dot(zn, wf, preferred_element_type=jnp.float32) + bf      # (E, 64)

    # scatter-add ('add' aggregation) onto right nodes via one-hot matmul.
    iota_n = jax.lax.broadcasted_iota(jnp.int32, (n_right, n_edges), 0)
    scat = jnp.where(dst_row == iota_n, 1.0, 0.0)                       # (Nr, E)
    agg = jnp.dot(scat, msg, preferred_element_type=jnp.float32)        # (Nr, 64)

    # output_module on cat([LayerNorm(agg), right], -1) with the 128-wide
    # first weight split (wo1a for agg-part, wo1b for right-part).
    an = _layernorm(agg, pc_g, pc_b)
    h = jnp.maximum(
        jnp.dot(an, wo1a, preferred_element_type=jnp.float32)
        + jnp.dot(right, wo1b, preferred_element_type=jnp.float32)
        + bo1, 0.0)
    return jnp.dot(h, wo2, preferred_element_type=jnp.float32) + bo2    # (Nr, 64)


# ----------------------------------------------------------------------------
# Pallas kernels (single-block: all operands fit comfortably in VMEM)
# ----------------------------------------------------------------------------
def embed_se_kernel(x_ref, g_ref, b_ref, w1_ref, b1_ref, w2_ref, b2_ref,
                    sw1_ref, sw2_ref, o_ref):
    # LayerNorm -> Linear -> ReLU -> Linear -> ReLU -> SELayerGraph (fused)
    xn = _layernorm(x_ref[...], g_ref[...], b_ref[...])
    h = jnp.maximum(
        jnp.dot(xn, w1_ref[...], preferred_element_type=jnp.float32) + b1_ref[...], 0.0)
    h = jnp.maximum(
        jnp.dot(h, w2_ref[...], preferred_element_type=jnp.float32) + b2_ref[...], 0.0)
    mean = jnp.mean(h, axis=0, keepdims=True)                           # (1, 64)
    s = jnp.maximum(
        jnp.dot(mean, sw1_ref[...], preferred_element_type=jnp.float32), 0.0)
    w = jax.nn.sigmoid(
        jnp.dot(s, sw2_ref[...], preferred_element_type=jnp.float32))   # (1, 64)
    o_ref[...] = h * w


def conv_kernel(left_ref, right_ref, src_col_ref, dst_col_ref, dst_row_ref,
                wl_ref, bl_ref, wr_ref, ln_g_ref, ln_b_ref, wf_ref, bf_ref,
                pc_g_ref, pc_b_ref, wo1a_ref, wo1b_ref, bo1_ref, wo2_ref, bo2_ref,
                out_ref):
    out_ref[...] = _conv_core(
        left_ref[...], right_ref[...], src_col_ref[...], dst_col_ref[...],
        dst_row_ref[...],
        wl_ref[...], bl_ref[...], wr_ref[...], ln_g_ref[...], ln_b_ref[...],
        wf_ref[...], bf_ref[...], pc_g_ref[...], pc_b_ref[...],
        wo1a_ref[...], wo1b_ref[...], bo1_ref[...], wo2_ref[...], bo2_ref[...])


def conv_head_kernel(left_ref, right_ref, src_col_ref, dst_col_ref, dst_row_ref,
                     wl_ref, bl_ref, wr_ref, ln_g_ref, ln_b_ref, wf_ref, bf_ref,
                     pc_g_ref, pc_b_ref, wo1a_ref, wo1b_ref, bo1_ref, wo2_ref,
                     bo2_ref, hw1_ref, hb1_ref, hw2_ref,
                     out_ref, prob_ref, *, temperature):
    out = _conv_core(
        left_ref[...], right_ref[...], src_col_ref[...], dst_col_ref[...],
        dst_row_ref[...],
        wl_ref[...], bl_ref[...], wr_ref[...], ln_g_ref[...], ln_b_ref[...],
        wf_ref[...], bf_ref[...], pc_g_ref[...], pc_b_ref[...],
        wo1a_ref[...], wo1b_ref[...], bo1_ref[...], wo2_ref[...], bo2_ref[...])
    out_ref[...] = out
    # Head: Linear -> ReLU -> Linear(64,1, no bias) -> /temperature -> sigmoid.
    hh = jnp.maximum(
        jnp.dot(out, hw1_ref[...], preferred_element_type=jnp.float32) + hb1_ref[...],
        0.0)
    logit = jnp.sum(hh * hw2_ref[...], axis=-1, keepdims=True) / temperature
    prob_ref[...] = jax.nn.sigmoid(logit)


# ----------------------------------------------------------------------------
# pallas_call helper (whole arrays as single VMEM blocks; shapes are tiny)
# ----------------------------------------------------------------------------
def _pcall(kernel, out_shape, *args, **static):
    body = functools.partial(kernel, **static) if static else kernel
    vmem = pl.BlockSpec(memory_space=pltpu.MemorySpace.VMEM)
    multi = isinstance(out_shape, (tuple, list))
    out_specs = tuple(vmem for _ in out_shape) if multi else vmem
    return pl.pallas_call(
        body,
        out_shape=tuple(out_shape) if multi else out_shape,
        in_specs=[vmem] * len(args),
        out_specs=out_specs,
    )(*args)


def _f32(shape, dtype=jnp.float32):
    return jax.ShapeDtypeStruct(shape, dtype)


# ----------------------------------------------------------------------------
# Parameter initialization (deterministic, synthetic)
# ----------------------------------------------------------------------------
def _init_linear(key, fin, fout, bias=True, scale=0.1):
    kw, kb = jax.random.split(key)
    w = scale * jax.random.normal(kw, (fin, fout), jnp.float32)
    if bias:
        b = scale * jax.random.normal(kb, (1, fout), jnp.float32)
        return w, b
    return (w,)


def _init_ln(f):
    # PyTorch LayerNorm init: gamma=1, beta=0
    return jnp.ones((1, f), jnp.float32), jnp.zeros((1, f), jnp.float32)


def _init_bgc(key):
    ks = jax.random.split(key, 8)
    wl, bl = _init_linear(ks[0], EMB, EMB, bias=True)
    (we,) = _init_linear(ks[1], 1, EMB, bias=False)
    (wr,) = _init_linear(ks[2], EMB, EMB, bias=False)
    ln_g, ln_b = _init_ln(EMB)
    wf, bf = _init_linear(ks[3], EMB, EMB, bias=True)
    pc_g, pc_b = _init_ln(EMB)
    wo1, bo1 = _init_linear(ks[4], 2 * EMB, EMB, bias=True)
    wo2, bo2 = _init_linear(ks[5], EMB, EMB, bias=True)
    return dict(wl=wl, bl=bl, we=we, wr=wr, ln_g=ln_g, ln_b=ln_b, wf=wf, bf=bf,
                pc_g=pc_g, pc_b=pc_b,
                wo1a=wo1[:EMB], wo1b=wo1[EMB:], bo1=bo1, wo2=wo2, bo2=bo2)


def init_params(key):
    cons_nfeats, edge_nfeats, var_nfeats = 4, 1, 6
    ks = jax.random.split(key, 16)
    p = {}
    # cons_embedding: LN(4), Linear(4,64), ReLU, Linear(64,64), ReLU
    g, b = _init_ln(cons_nfeats)
    w1, b1 = _init_linear(ks[0], cons_nfeats, EMB)
    w2, b2 = _init_linear(ks[1], EMB, EMB)
    p['cons_emb'] = (g, b, w1, b1, w2, b2)
    # var_embedding: LN(6), Linear(6,64), ReLU, Linear(64,64), ReLU
    g, b = _init_ln(var_nfeats)
    w1, b1 = _init_linear(ks[2], var_nfeats, EMB)
    w2, b2 = _init_linear(ks[3], EMB, EMB)
    p['var_emb'] = (g, b, w1, b1, w2, b2)
    # edge_embedding: LN(1)
    p['edge_ln'] = _init_ln(edge_nfeats)
    # SE layers (reduction=16 -> hidden=4), no bias
    p['se_con'] = (_init_linear(ks[4], EMB, EMB // 16, bias=False)[0],
                   _init_linear(ks[5], EMB // 16, EMB, bias=False)[0])
    p['se_var'] = (_init_linear(ks[6], EMB, EMB // 16, bias=False)[0],
                   _init_linear(ks[7], EMB // 16, EMB, bias=False)[0])
    # bipartite convolutions
    p['conv_v_to_c'] = _init_bgc(ks[8])
    p['conv_c_to_v'] = _init_bgc(ks[9])
    p['conv_v_to_c2'] = _init_bgc(ks[10])
    p['conv_c_to_v2'] = _init_bgc(ks[11])
    p['conv_c_to_v3'] = _init_bgc(ks[12])
    # heads: Linear(64,64), ReLU, Linear(64,1,no bias)  (final weight kept as a
    # (1,64) row, PyTorch layout, so the head logit is a lane reduce).
    w1, b1 = _init_linear(ks[13], EMB, EMB)
    w2 = 0.1 * jax.random.normal(ks[14], (1, EMB), jnp.float32)
    p['con_mlp'] = (w1, b1, w2)
    w1, b1 = _init_linear(ks[15], EMB, EMB)
    w2 = 0.1 * jax.random.normal(jax.random.fold_in(key, 99), (1, EMB), jnp.float32)
    p['var_mlp'] = (w1, b1, w2)
    return p


# ----------------------------------------------------------------------------
# Forward
# ----------------------------------------------------------------------------
def gnn_policy_constraint_forward(params, constraint_features, edge_indices,
                                  edge_features, variable_features,
                                  temperature=0.6):
    del edge_features  # LayerNorm over a size-1 feature dim == beta exactly;
    # the edge values never influence the network (matches PyTorch LN(1)).
    nc = constraint_features.shape[0]
    nv = variable_features.shape[0]

    edge_beta = params['edge_ln'][1]                     # (1, 1)

    ci = edge_indices[0].astype(jnp.int32)               # constraint index per edge
    vi = edge_indices[1].astype(jnp.int32)               # variable index per edge
    ci_col, vi_col = ci[:, None], vi[:, None]            # (E, 1)
    ci_row, vi_row = ci[None, :], vi[None, :]            # (1, E)

    # Fused embedding MLP + SE block (one launch per node type).
    c = _pcall(embed_se_kernel, _f32((nc, EMB)),
               constraint_features, *params['cons_emb'], *params['se_con'])
    v = _pcall(embed_se_kernel, _f32((nv, EMB)),
               variable_features, *params['var_emb'], *params['se_var'])

    def run_conv(p, left, right, src_col, dst_col, dst_row, head=None):
        # Fold the constant edge contribution (beta @ W_edge) into the bias of
        # feature_module_left so it is added once per message, as in PyTorch.
        bl_eff = p['bl'] + edge_beta * p['we']
        base = (left, right, src_col, dst_col, dst_row,
                p['wl'], bl_eff, p['wr'], p['ln_g'], p['ln_b'], p['wf'], p['bf'],
                p['pc_g'], p['pc_b'], p['wo1a'], p['wo1b'], p['bo1'],
                p['wo2'], p['bo2'])
        n_right = right.shape[0]
        if head is None:
            return _pcall(conv_kernel, _f32((n_right, EMB)), *base)
        hw1, hb1, hw2 = head
        return _pcall(conv_head_kernel,
                      (_f32((n_right, EMB)), _f32((n_right, 1))),
                      *base, hw1, hb1, hw2, temperature=temperature)

    # conv order per the PyTorch forward (dropout is eval-mode identity).
    v = run_conv(params['conv_c_to_v'], c, v, ci_col, vi_col, vi_row)
    c = run_conv(params['conv_v_to_c'], v, c, vi_col, ci_col, ci_row)
    v = run_conv(params['conv_c_to_v2'], c, v, ci_col, vi_col, vi_row)
    c, con_prob = run_conv(params['conv_v_to_c2'], v, c, vi_col, ci_col, ci_row,
                           head=params['con_mlp'])
    v, var_prob = run_conv(params['conv_c_to_v3'], c, v, ci_col, vi_col, vi_row,
                           head=params['var_mlp'])

    return con_prob[:, 0], var_prob[:, 0]


# ----------------------------------------------------------------------------
# Demo
# ----------------------------------------------------------------------------
if __name__ == "__main__":
    key = jax.random.PRNGKey(0)
    k_data, k_params = jax.random.split(key)
    kc, kv, ke, ks, kd = jax.random.split(k_data, 5)

    n_cons, n_vars, n_edges = 12, 20, 48
    constraint_features = jax.random.normal(kc, (n_cons, 4), jnp.float32)
    variable_features = jax.random.normal(kv, (n_vars, 6), jnp.float32)
    edge_features = jax.random.normal(ke, (n_edges, 1), jnp.float32)
    edge_indices = jnp.stack([
        jax.random.randint(ks, (n_edges,), 0, n_cons, dtype=jnp.int32),
        jax.random.randint(kd, (n_edges,), 0, n_vars, dtype=jnp.int32),
    ], axis=0)

    params = init_params(k_params)

    fwd = jax.jit(functools.partial(gnn_policy_constraint_forward, params))
    con_out, var_out = fwd(constraint_features, edge_indices,
                           edge_features, variable_features)
    jax.block_until_ready((con_out, var_out))

    assert con_out.shape == (n_cons,) and var_out.shape == (n_vars,)
    assert bool(jnp.all(jnp.isfinite(con_out))) and bool(jnp.all(jnp.isfinite(var_out)))
    assert bool(jnp.all(con_out > 0) and jnp.all(con_out < 1))
    assert bool(jnp.all(var_out > 0) and jnp.all(var_out < 1))
    print("KERNEL_OK")
</pallas_src>

<mosaic_0001>
module attributes {stable_mosaic.version = 11 : i64} {
  func.func @embed_se_kernel(%arg0: memref<12x4xf32, #tpu.memory_space<vmem>>, %arg1: memref<1x4xf32, #tpu.memory_space<vmem>>, %arg2: memref<1x4xf32, #tpu.memory_space<vmem>>, %arg3: memref<4x64xf32, #tpu.memory_space<vmem>>, %arg4: memref<1x64xf32, #tpu.memory_space<vmem>>, %arg5: memref<64x64xf32, #tpu.memory_space<vmem>>, %arg6: memref<1x64xf32, #tpu.memory_space<vmem>>, %arg7: memref<64x4xf32, #tpu.memory_space<vmem>>, %arg8: memref<4x64xf32, #tpu.memory_space<vmem>>, %arg9: memref<12x64xf32, #tpu.memory_space<vmem>>) attributes {dimension_semantics = [], scalar_prefetch = 0 : i64, scratch_operands = 0 : i64, tpu.core_type = #tpu.core_type<tc>} {
    %c0 = arith.constant 0 : index
    %c0_0 = arith.constant 0 : index
    %0 = vector.load %arg0[%c0, %c0_0] : memref<12x4xf32, #tpu.memory_space<vmem>>, vector<12x4xf32>
    %c0_1 = arith.constant 0 : index
    %c0_2 = arith.constant 0 : index
    %1 = vector.load %arg1[%c0_1, %c0_2] : memref<1x4xf32, #tpu.memory_space<vmem>>, vector<1x4xf32>
    %c0_3 = arith.constant 0 : index
    %c0_4 = arith.constant 0 : index
    %2 = vector.load %arg2[%c0_3, %c0_4] : memref<1x4xf32, #tpu.memory_space<vmem>>, vector<1x4xf32>
    %cst = arith.constant dense<0.000000e+00> : vector<12xf32>
    %3 = vector.multi_reduction <add>, %0, %cst [1] : vector<12x4xf32> to vector<12xf32>
    %4 = vector.shape_cast %3 : vector<12xf32> to vector<12x1xf32>
    %cst_5 = arith.constant 4.000000e+00 : f32
    %5 = vector.broadcast %cst_5 : f32 to vector<12x1xf32>
    %6 = arith.divf %4, %5 : vector<12x1xf32>
    %7 = vector.broadcast %6 : vector<12x1xf32> to vector<12x4xf32>
    %8 = arith.subf %0, %7 : vector<12x4xf32>
    %9 = arith.mulf %8, %8 : vector<12x4xf32>
    %cst_6 = arith.constant dense<0.000000e+00> : vector<12xf32>
    %10 = vector.multi_reduction <add>, %9, %cst_6 [1] : vector<12x4xf32> to vector<12xf32>
    %11 = vector.shape_cast %10 : vector<12xf32> to vector<12x1xf32>
    %cst_7 = arith.constant 4.000000e+00 : f32
    %12 = vector.broadcast %cst_7 : f32 to vector<12x1xf32>
    %13 = arith.divf %11, %12 : vector<12x1xf32>
    %14 = vector.broadcast %6 : vector<12x1xf32> to vector<12x4xf32>
    %15 = arith.subf %0, %14 : vector<12x4xf32>
    %cst_8 = arith.constant 9.99999974E-6 : f32
    %16 = vector.broadcast %cst_8 : f32 to vector<12x1xf32>
    %17 = arith.addf %13, %16 : vector<12x1xf32>
    %18 = math.rsqrt %17 : vector<12x1xf32>
    %19 = vector.broadcast %18 : vector<12x1xf32> to vector<12x4xf32>
    %20 = arith.mulf %15, %19 : vector<12x4xf32>
    %21 = vector.broadcast %1 : vector<1x4xf32> to vector<12x4xf32>
    %22 = arith.mulf %20, %21 : vector<12x4xf32>
    %23 = vector.broadcast %2 : vector<1x4xf32> to vector<12x4xf32>
    %24 = arith.addf %22, %23 : vector<12x4xf32>
    %c0_9 = arith.constant 0 : index
    %c0_10 = arith.constant 0 : index
    %25 = vector.load %arg3[%c0_9, %c0_10] : memref<4x64xf32, #tpu.memory_space<vmem>>, vector<4x64xf32>
    %cst_11 = arith.constant dense<0.000000e+00> : vector<12x64xf32>
    %26 = tpu.matmul %24, %25, %cst_11 {dimension_numbers = #tpu.dot_dimension_numbers<[1], [0], [0], [1], [0, 0, 1, 1], [], []>} : vector<12x4xf32>, vector<4x64xf32>, vector<12x64xf32> -> vector<12x64xf32>
    %c0_12 = arith.constant 0 : index
    %c0_13 = arith.constant 0 : index
    %27 = vector.load %arg4[%c0_12, %c0_13] : memref<1x64xf32, #tpu.memory_space<vmem>>, vector<1x64xf32>
    %28 = vector.broadcast %27 : vector<1x64xf32> to vector<12x64xf32>
    %29 = arith.addf %26, %28 : vector<12x64xf32>
    %cst_14 = arith.constant 0.000000e+00 : f32
    %30 = vector.broadcast %cst_14 : f32 to vector<12x64xf32>
    %31 = arith.maximumf %29, %30 : vector<12x64xf32>
    %c0_15 = arith.constant 0 : index
    %c0_16 = arith.constant 0 : index
    %32 = vector.load %arg5[%c0_15, %c0_16] : memref<64x64xf32, #tpu.memory_space<vmem>>, vector<64x64xf32>
    %cst_17 = arith.constant dense<0.000000e+00> : vector<12x64xf32>
    %33 = tpu.matmul %31, %32, %cst_17 {dimension_numbers = #tpu.dot_dimension_numbers<[1], [0], [0], [1], [0, 0, 1, 1], [], []>} : vector<12x64xf32>, vector<64x64xf32>, vector<12x64xf32> -> vector<12x64xf32>
    %c0_18 = arith.constant 0 : index
    %c0_19 = arith.constant 0 : index
    %34 = vector.load %arg6[%c0_18, %c0_19] : memref<1x64xf32, #tpu.memory_space<vmem>>, vector<1x64xf32>
    %35 = vector.broadcast %34 : vector<1x64xf32> to vector<12x64xf32>
    %36 = arith.addf %33, %35 : vector<12x64xf32>
    %cst_20 = arith.constant 0.000000e+00 : f32
    %37 = vector.broadcast %cst_20 : f32 to vector<12x64xf32>
    %38 = arith.maximumf %36, %37 : vector<12x64xf32>
    %cst_21 = arith.constant dense<0.000000e+00> : vector<64xf32>
    %39 = vector.multi_reduction <add>, %38, %cst_21 [0] : vector<12x64xf32> to vector<64xf32>
    %40 = vector.shape_cast %39 : vector<64xf32> to vector<1x64xf32>
    %cst_22 = arith.constant 1.200000e+01 : f32
    %41 = vector.broadcast %cst_22 : f32 to vector<1x64xf32>
    %42 = arith.divf %40, %41 : vector<1x64xf32>
    %c0_23 = arith.constant 0 : index
    %c0_24 = arith.constant 0 : index
    %43 = vector.load %arg7[%c0_23, %c0_24] : memref<64x4xf32, #tpu.memory_space<vmem>>, vector<64x4xf32>
    %cst_25 = arith.constant dense<0.000000e+00> : vector<1x4xf32>
    %44 = tpu.matmul %42, %43, %cst_25 {dimension_numbers = #tpu.dot_dimension_numbers<[1], [0], [0], [1], [0, 0, 1, 1], [], []>} : vector<1x64xf32>, vector<64x4xf32>, vector<1x4xf32> -> vector<1x4xf32>
    %cst_26 = arith.constant 0.000000e+00 : f32
    %45 = vector.broadcast %cst_26 : f32 to vector<1x4xf32>
    %46 = arith.maximumf %44, %45 : vector<1x4xf32>
    %c0_27 = arith.constant 0 : index
    %c0_28 = arith.constant 0 : index
    %47 = vector.load %arg8[%c0_27, %c0_28] : memref<4x64xf32, #tpu.memory_space<vmem>>, vector<4x64xf32>
    %cst_29 = arith.constant dense<0.000000e+00> : vector<1x64xf32>
    %48 = tpu.matmul %46, %47, %cst_29 {dimension_numbers = #tpu.dot_dimension_numbers<[1], [0], [0], [1], [0, 0, 1, 1], [], []>} : vector<1x4xf32>, vector<4x64xf32>, vector<1x64xf32> -> vector<1x64xf32>
    %49 = arith.negf %48 : vector<1x64xf32>
    %50 = math.exp %49 : vector<1x64xf32>
    %cst_30 = arith.constant 1.000000e+00 : f32
    %51 = vector.broadcast %cst_30 : f32 to vector<1x64xf32>
    %52 = arith.addf %51, %50 : vector<1x64xf32>
    %53 = arith.divf %51, %52 : vector<1x64xf32>
    %54 = vector.broadcast %53 : vector<1x64xf32> to vector<12x64xf32>
    %55 = arith.mulf %38, %54 : vector<12x64xf32>
    %c0_31 = arith.constant 0 : index
    %c0_32 = arith.constant 0 : index
    %56 = vector.load %arg9[%c0_31, %c0_32] : memref<12x64xf32, #tpu.memory_space<vmem>>, vector<12x64xf32>
    tpu.vector_store %arg9[%c0_31, %c0_32], %55 {strides = array<i32>} : memref<12x64xf32, #tpu.memory_space<vmem>>, vector<12x64xf32>,
    return
  }
}

module attributes {stable_mosaic.version = 11 : i64} {
  func.func @embed_se_kernel(%arg0: memref<20x6xf32, #tpu.memory_space<vmem>>, %arg1: memref<1x6xf32, #tpu.memory_space<vmem>>, %arg2: memref<1x6xf32, #tpu.memory_space<vmem>>, %arg3: memref<6x64xf32, #tpu.memory_space<vmem>>, %arg4: memref<1x64xf32, #tpu.memory_space<vmem>>, %arg5: memref<64x64xf32, #tpu.memory_space<vmem>>, %arg6: memref<1x64xf32, #tpu.memory_space<vmem>>, %arg7: memref<64x4xf32, #tpu.memory_space<vmem>>, %arg8: memref<4x64xf32, #tpu.memory_space<vmem>>, %arg9: memref<20x64xf32, #tpu.memory_space<vmem>>) attributes {dimension_semantics = [], scalar_prefetch = 0 : i64, scratch_operands = 0 : i64, tpu.core_type = #tpu.core_type<tc>} {
    %c0 = arith.constant 0 : index
    %c0_0 = arith.constant 0 : index
    %0 = vector.load %arg0[%c0, %c0_0] : memref<20x6xf32, #tpu.memory_space<vmem>>, vector<20x6xf32>
    %c0_1 = arith.constant 0 : index
    %c0_2 = arith.constant 0 : index
    %1 = vector.load %arg1[%c0_1, %c0_2] : memref<1x6xf32, #tpu.memory_space<vmem>>, vector<1x6xf32>
    %c0_3 = arith.constant 0 : index
    %c0_4 = arith.constant 0 : index
    %2 = vector.load %arg2[%c0_3, %c0_4] : memref<1x6xf32, #tpu.memory_space<vmem>>, vector<1x6xf32>
    %cst = arith.constant dense<0.000000e+00> : vector<20xf32>
    %3 = vector.multi_reduction <add>, %0, %cst [1] : vector<20x6xf32> to vector<20xf32>
    %4 = vector.shape_cast %3 : vector<20xf32> to vector<20x1xf32>
    %cst_5 = arith.constant 6.000000e+00 : f32
    %5 = vector.broadcast %cst_5 : f32 to vector<20x1xf32>
    %6 = arith.divf %4, %5 : vector<20x1xf32>
    %7 = vector.broadcast %6 : vector<20x1xf32> to vector<20x6xf32>
    %8 = arith.subf %0, %7 : vector<20x6xf32>
    %9 = arith.mulf %8, %8 : vector<20x6xf32>
    %cst_6 = arith.constant dense<0.000000e+00> : vector<20xf32>
    %10 = vector.multi_reduction <add>, %9, %cst_6 [1] : vector<20x6xf32> to vector<20xf32>
    %11 = vector.shape_cast %10 : vector<20xf32> to vector<20x1xf32>
    %cst_7 = arith.constant 6.000000e+00 : f32
    %12 = vector.broadcast %cst_7 : f32 to vector<20x1xf32>
    %13 = arith.divf %11, %12 : vector<20x1xf32>
    %14 = vector.broadcast %6 : vector<20x1xf32> to vector<20x6xf32>
    %15 = arith.subf %0, %14 : vector<20x6xf32>
    %cst_8 = arith.constant 9.99999974E-6 : f32
    %16 = vector.broadcast %cst_8 : f32 to vector<20x1xf32>
    %17 = arith.addf %13, %16 : vector<20x1xf32>
    %18 = math.rsqrt %17 : vector<20x1xf32>
    %19 = vector.broadcast %18 : vector<20x1xf32> to vector<20x6xf32>
    %20 = arith.mulf %15, %19 : vector<20x6xf32>
    %21 = vector.broadcast %1 : vector<1x6xf32> to vector<20x6xf32>
    %22 = arith.mulf %20, %21 : vector<20x6xf32>
    %23 = vector.broadcast %2 : vector<1x6xf32> to vector<20x6xf32>
    %24 = arith.addf %22, %23 : vector<20x6xf32>
    %c0_9 = arith.constant 0 : index
    %c0_10 = arith.constant 0 : index
    %25 = vector.load %arg3[%c0_9, %c0_10] : memref<6x64xf32, #tpu.memory_space<vmem>>, vector<6x64xf32>
    %cst_11 = arith.constant dense<0.000000e+00> : vector<20x64xf32>
    %26 = tpu.matmul %24, %25, %cst_11 {dimension_numbers = #tpu.dot_dimension_numbers<[1], [0], [0], [1], [0, 0, 1, 1], [], []>} : vector<20x6xf32>, vector<6x64xf32>, vector<20x64xf32> -> vector<20x64xf32>
    %c0_12 = arith.constant 0 : index
    %c0_13 = arith.constant 0 : index
    %27 = vector.load %arg4[%c0_12, %c0_13] : memref<1x64xf32, #tpu.memory_space<vmem>>, vector<1x64xf32>
    %28 = vector.broadcast %27 : vector<1x64xf32> to vector<20x64xf32>
    %29 = arith.addf %26, %28 : vector<20x64xf32>
    %cst_14 = arith.constant 0.000000e+00 : f32
    %30 = vector.broadcast %cst_14 : f32 to vector<20x64xf32>
    %31 = arith.maximumf %29, %30 : vector<20x64xf32>
    %c0_15 = arith.constant 0 : index
    %c0_16 = arith.constant 0 : index
    %32 = vector.load %arg5[%c0_15, %c0_16] : memref<64x64xf32, #tpu.memory_space<vmem>>, vector<64x64xf32>
    %cst_17 = arith.constant dense<0.000000e+00> : vector<20x64xf32>
    %33 = tpu.matmul %31, %32, %cst_17 {dimension_numbers = #tpu.dot_dimension_numbers<[1], [0], [0], [1], [0, 0, 1, 1], [], []>} : vector<20x64xf32>, vector<64x64xf32>, vector<20x64xf32> -> vector<20x64xf32>
    %c0_18 = arith.constant 0 : index
    %c0_19 = arith.constant 0 : index
    %34 = vector.load %arg6[%c0_18, %c0_19] : memref<1x64xf32, #tpu.memory_space<vmem>>, vector<1x64xf32>
    %35 = vector.broadcast %34 : vector<1x64xf32> to vector<20x64xf32>
    %36 = arith.addf %33, %35 : vector<20x64xf32>
    %cst_20 = arith.constant 0.000000e+00 : f32
    %37 = vector.broadcast %cst_20 : f32 to vector<20x64xf32>
    %38 = arith.maximumf %36, %37 : vector<20x64xf32>
    %cst_21 = arith.constant dense<0.000000e+00> : vector<64xf32>
    %39 = vector.multi_reduction <add>, %38, %cst_21 [0] : vector<20x64xf32> to vector<64xf32>
    %40 = vector.shape_cast %39 : vector<64xf32> to vector<1x64xf32>
    %cst_22 = arith.constant 2.000000e+01 : f32
    %41 = vector.broadcast %cst_22 : f32 to vector<1x64xf32>
    %42 = arith.divf %40, %41 : vector<1x64xf32>
    %c0_23 = arith.constant 0 : index
    %c0_24 = arith.constant 0 : index
    %43 = vector.load %arg7[%c0_23, %c0_24] : memref<64x4xf32, #tpu.memory_space<vmem>>, vector<64x4xf32>
    %cst_25 = arith.constant dense<0.000000e+00> : vector<1x4xf32>
    %44 = tpu.matmul %42, %43, %cst_25 {dimension_numbers = #tpu.dot_dimension_numbers<[1], [0], [0], [1], [0, 0, 1, 1], [], []>} : vector<1x64xf32>, vector<64x4xf32>, vector<1x4xf32> -> vector<1x4xf32>
    %cst_26 = arith.constant 0.000000e+00 : f32
    %45 = vector.broadcast %cst_26 : f32 to vector<1x4xf32>
    %46 = arith.maximumf %44, %45 : vector<1x4xf32>
    %c0_27 = arith.constant 0 : index
    %c0_28 = arith.constant 0 : index
    %47 = vector.load %arg8[%c0_27, %c0_28] : memref<4x64xf32, #tpu.memory_space<vmem>>, vector<4x64xf32>
    %cst_29 = arith.constant dense<0.000000e+00> : vector<1x64xf32>
    %48 = tpu.matmul %46, %47, %cst_29 {dimension_numbers = #tpu.dot_dimension_numbers<[1], [0], [0], [1], [0, 0, 1, 1], [], []>} : vector<1x4xf32>, vector<4x64xf32>, vector<1x64xf32> -> vector<1x64xf32>
    %49 = arith.negf %48 : vector<1x64xf32>
    %50 = math.exp %49 : vector<1x64xf32>
    %cst_30 = arith.constant 1.000000e+00 : f32
    %51 = vector.broadcast %cst_30 : f32 to vector<1x64xf32>
    %52 = arith.addf %51, %50 : vector<1x64xf32>
    %53 = arith.divf %51, %52 : vector<1x64xf32>
    %54 = vector.broadcast %53 : vector<1x64xf32> to vector<20x64xf32>
    %55 = arith.mulf %38, %54 : vector<20x64xf32>
    %c0_31 = arith.constant 0 : index
    %c0_32 = arith.constant 0 : index
    %56 = vector.load %arg9[%c0_31, %c0_32] : memref<20x64xf32, #tpu.memory_space<vmem>>, vector<20x64xf32>
    tpu.vector_store %arg9[%c0_31, %c0_32], %55 {strides = array<i32>} : memref<20x64xf32, #tpu.memory_space<vmem>>, vector<20x64xf32>,
    return
  }
}

module attributes {stable_mosaic.version = 11 : i64} {
  func.func @conv_kernel(%arg0: memref<20x64xf32, #tpu.memory_space<vmem>>, %arg1: memref<12x64xf32, #tpu.memory_space<vmem>>, %arg2: memref<48x1xi32, #tpu.memory_space<vmem>>, %arg3: memref<48x1xi32, #tpu.memory_space<vmem>>, %arg4: memref<1x48xi32, #tpu.memory_space<vmem>>, %arg5: memref<64x64xf32, #tpu.memory_space<vmem>>, %arg6: memref<1x64xf32, #tpu.memory_space<vmem>>, %arg7: memref<64x64xf32, #tpu.memory_space<vmem>>, %arg8: memref<1x64xf32, #tpu.memory_space<vmem>>, %arg9: memref<1x64xf32, #tpu.memory_space<vmem>>, %arg10: memref<64x64xf32, #tpu.memory_space<vmem>>, %arg11: memref<1x64xf32, #tpu.memory_space<vmem>>, %arg12: memref<1x64xf32, #tpu.memory_space<vmem>>, %arg13: memref<1x64xf32, #tpu.memory_space<vmem>>, %arg14: memref<64x64xf32, #tpu.memory_space<vmem>>, %arg15: memref<64x64xf32, #tpu.memory_space<vmem>>, %arg16: memref<1x64xf32, #tpu.memory_space<vmem>>, %arg17: memref<64x64xf32, #tpu.memory_space<vmem>>, %arg18: memref<1x64xf32, #tpu.memory_space<vmem>>, %arg19: memref<12x64xf32, #tpu.memory_space<vmem>>) attributes {dimension_semantics = [], scalar_prefetch = 0 : i64, scratch_operands = 0 : i64, tpu.core_type = #tpu.core_type<tc>} {
    %c0 = arith.constant 0 : index
    %c0_0 = arith.constant 0 : index
    %0 = vector.load %arg0[%c0, %c0_0] : memref<20x64xf32, #tpu.memory_space<vmem>>, vector<20x64xf32>
    %c0_1 = arith.constant 0 : index
    %c0_2 = arith.constant 0 : index
    %1 = vector.load %arg1[%c0_1, %c0_2] : memref<12x64xf32, #tpu.memory_space<vmem>>, vector<12x64xf32>
    %c0_3 = arith.constant 0 : index
    %c0_4 = arith.constant 0 : index
    %2 = vector.load %arg2[%c0_3, %c0_4] : memref<48x1xi32, #tpu.memory_space<vmem>>, vector<48x1xi32>
    %c0_5 = arith.constant 0 : index
    %c0_6 = arith.constant 0 : index
    %3 = vector.load %arg3[%c0_5, %c0_6] : memref<48x1xi32, #tpu.memory_space<vmem>>, vector<48x1xi32>
    %c0_7 = arith.constant 0 : index
    %c0_8 = arith.constant 0 : index
    %4 = vector.load %arg4[%c0_7, %c0_8] : memref<1x48xi32, #tpu.memory_space<vmem>>, vector<1x48xi32>
    %c0_9 = arith.constant 0 : index
    %c0_10 = arith.constant 0 : index
    %5 = vector.load %arg5[%c0_9, %c0_10] : memref<64x64xf32, #tpu.memory_space<vmem>>, vector<64x64xf32>
    %c0_11 = arith.constant 0 : index
    %c0_12 = arith.constant 0 : index
    %6 = vector.load %arg6[%c0_11, %c0_12] : memref<1x64xf32, #tpu.memory_space<vmem>>, vector<1x64xf32>
    %c0_13 = arith.constant 0 : index
    %c0_14 = arith.constant 0 : index
    %7 = vector.load %arg7[%c0_13, %c0_14] : memref<64x64xf32, #tpu.memory_space<vmem>>, vector<64x64xf32>
    %c0_15 = arith.constant 0 : index
    %c0_16 = arith.constant 0 : index
    %8 = vector.load %arg8[%c0_15, %c0_16] : memref<1x64xf32, #tpu.memory_space<vmem>>, vector<1x64xf32>
    %c0_17 = arith.constant 0 : index
    %c0_18 = arith.constant 0 : index
    %9 = vector.load %arg9[%c0_17, %c0_18] : memref<1x64xf32, #tpu.memory_space<vmem>>, vector<1x64xf32>
    %c0_19 = arith.constant 0 : index
    %c0_20 = arith.constant 0 : index
    %10 = vector.load %arg10[%c0_19, %c0_20] : memref<64x64xf32, #tpu.memory_space<vmem>>, vector<64x64xf32>
    %c0_21 = arith.constant 0 : index
    %c0_22 = arith.constant 0 : index
    %11 = vector.load %arg11[%c0_21, %c0_22] : memref<1x64xf32, #tpu.memory_space<vmem>>, vector<1x64xf32>
    %c0_23 = arith.constant 0 : index
    %c0_24 = arith.constant 0 : index
    %12 = vector.load %arg12[%c0_23, %c0_24] : memref<1x64xf32, #tpu.memory_space<vmem>>, vector<1x64xf32>
    %c0_25 = arith.constant 0 : index
    %c0_26 = arith.constant 0 : index
    %13 = vector.load %arg13[%c0_25, %c0_26] : memref<1x64xf32, #tpu.memory_space<vmem>>, vector<1x64xf32>
    %c0_27 = arith.constant 0 : index
    %c0_28 = arith.constant 0 : index
    %14 = vector.load %arg14[%c0_27, %c0_28] : memref<64x64xf32, #tpu.memory_space<vmem>>, vector<64x64xf32>
    %c0_29 = arith.constant 0 : index
    %c0_30 = arith.constant 0 : index
    %15 = vector.load %arg15[%c0_29, %c0_30] : memref<64x64xf32, #tpu.memory_space<vmem>>, vector<64x64xf32>
    %c0_31 = arith.constant 0 : index
    %c0_32 = arith.constant 0 : index
    %16 = vector.load %arg16[%c0_31, %c0_32] : memref<1x64xf32, #tpu.memory_space<vmem>>, vector<1x64xf32>
    %c0_33 = arith.constant 0 : index
    %c0_34 = arith.constant 0 : index
    %17 = vector.load %arg17[%c0_33, %c0_34] : memref<64x64xf32, #tpu.memory_space<vmem>>, vector<64x64xf32>
    %c0_35 = arith.constant 0 : index
    %c0_36 = arith.constant 0 : index
    %18 = vector.load %arg18[%c0_35, %c0_36] : memref<1x64xf32, #tpu.memory_space<vmem>>, vector<1x64xf32>
    %cst = arith.constant dense<0.000000e+00> : vector<20x64xf32>
    %19 = tpu.matmul %0, %7, %cst {dimension_numbers = #tpu.dot_dimension_numbers<[1], [0], [0], [1], [0, 0, 1, 1], [], []>} : vector<20x64xf32>, vector<64x64xf32>, vector<20x64xf32> -> vector<20x64xf32>
    %cst_37 = arith.constant dense<0.000000e+00> : vector<12x64xf32>
    %20 = tpu.matmul %1, %5, %cst_37 {dimension_numbers = #tpu.dot_dimension_numbers<[1], [0], [0], [1], [0, 0, 1, 1], [], []>} : vector<12x64xf32>, vector<64x64xf32>, vector<12x64xf32> -> vector<12x64xf32>
    %21 = vector.broadcast %6 : vector<1x64xf32> to vector<12x64xf32>
    %22 = arith.addf %20, %21 : vector<12x64xf32>
    %23 = tpu.iota {dimensions = array<i32: 1>} : vector<48x20xi32>
    %24 = tpu.iota {dimensions = array<i32: 1>} : vector<48x12xi32>
    %25 = vector.broadcast %2 : vector<48x1xi32> to vector<48x20xi32>
    %26 = arith.cmpi eq, %25, %23 : vector<48x20xi32>
    %cst_38 = arith.constant 1.000000e+00 : f32
    %cst_39 = arith.constant 0.000000e+00 : f32
    %27 = vector.broadcast %cst_38 : f32 to vector<48x20xf32>
    %28 = vector.broadcast %cst_39 : f32 to vector<48x20xf32>
    %29 = arith.select %26, %27, %28 : vector<48x20xi1>, vector<48x20xf32>
    %30 = vector.broadcast %3 : vector<48x1xi32> to vector<48x12xi32>
    %31 = arith.cmpi eq, %30, %24 : vector<48x12xi32>
    %cst_40 = arith.constant 1.000000e+00 : f32
    %cst_41 = arith.constant 0.000000e+00 : f32
    %32 = vector.broadcast %cst_40 : f32 to vector<48x12xf32>
    %33 = vector.broadcast %cst_41 : f32 to vector<48x12xf32>
    %34 = arith.select %31, %32, %33 : vector<48x12xi1>, vector<48x12xf32>
    %cst_42 = arith.constant dense<0.000000e+00> : vector<48x64xf32>
    %35 = tpu.matmul %34, %22, %cst_42 {dimension_numbers = #tpu.dot_dimension_numbers<[1], [0], [0], [1], [0, 0, 1, 1], [], []>} : vector<48x12xf32>, vector<12x64xf32>, vector<48x64xf32> -> vector<48x64xf32>
    %cst_43 = arith.constant dense<0.000000e+00> : vector<48x64xf32>
    %36 = tpu.matmul %29, %19, %cst_43 {dimension_numbers = #tpu.dot_dimension_numbers<[1], [0], [0], [1], [0, 0, 1, 1], [], []>} : vector<48x20xf32>, vector<20x64xf32>, vector<48x64xf32> -> vector<48x64xf32>
    %37 = arith.addf %35, %36 : vector<48x64xf32>
    %cst_44 = arith.constant dense<0.000000e+00> : vector<48xf32>
    %38 = vector.multi_reduction <add>, %37, %cst_44 [1] : vector<48x64xf32> to vector<48xf32>
    %39 = vector.shape_cast %38 : vector<48xf32> to vector<48x1xf32>
    %cst_45 = arith.constant 6.400000e+01 : f32
    %40 = vector.broadcast %cst_45 : f32 to vector<48x1xf32>
    %41 = arith.divf %39, %40 : vector<48x1xf32>
    %42 = vector.broadcast %41 : vector<48x1xf32> to vector<48x64xf32>
    %43 = arith.subf %37, %42 : vector<48x64xf32>
    %44 = arith.mulf %43, %43 : vector<48x64xf32>
    %cst_46 = arith.constant dense<0.000000e+00> : vector<48xf32>
    %45 = vector.multi_reduction <add>, %44, %cst_46 [1] : vector<48x64xf32> to vector<48xf32>
    %46 = vector.shape_cast %45 : vector<48xf32> to vector<48x1xf32>
    %cst_47 = arith.constant 6.400000e+01 : f32
    %47 = vector.broadcast %cst_47 : f32 to vector<48x1xf32>
    %48 = arith.divf %46, %47 : vector<48x1xf32>
    %49 = vector.broadcast %41 : vector<48x1xf32> to vector<48x64xf32>
    %50 = arith.subf %37, %49 : vector<48x64xf32>
    %cst_48 = arith.constant 9.99999974E-6 : f32
    %51 = vector.broadcast %cst_48 : f32 to vector<48x1xf32>
    %52 = arith.addf %48, %51 : vector<48x1xf32>
    %53 = math.rsqrt %52 : vector<48x1xf32>
    %54 = vector.broadcast %53 : vector<48x1xf32> to vector<48x64xf32>
    %55 = arith.mulf %50, %54 : vector<48x64xf32>
    %56 = vector.broadcast %8 : vector<1x64xf32> to vector<48x64xf32>
    %57 = arith.mulf %55, %56 : vector<48x64xf32>
    %58 = vector.broadcast %9 : vector<1x64xf32> to vector<48x64xf32>
    %59 = arith.addf %57, %58 : vector<48x64xf32>
    %cst_49 = arith.constant 0.000000e+00 : f32
    %60 = vector.broadcast %cst_49 : f32 to vector<48x64xf32>
    %61 = arith.maximumf %59, %60 : vector<48x64xf32>
    %cst_50 = arith.constant dense<0.000000e+00> : vector<48x64xf32>
    %62 = tpu.matmul %61, %10, %cst_50 {dimension_numbers = #tpu.dot_dimension_numbers<[1], [0], [0], [1], [0, 0, 1, 1], [], []>} : vector<48x64xf32>, vector<64x64xf32>, vector<48x64xf32> -> vector<48x64xf32>
    %63 = vector.broadcast %11 : vector<1x64xf32> to vector<48x64xf32>
    %64 = arith.addf %62, %63 : vector<48x64xf32>
    %65 = tpu.iota {dimensions = array<i32: 0>} : vector<12x48xi32>
    %66 = vector.broadcast %4 : vector<1x48xi32> to vector<12x48xi32>
    %67 = arith.cmpi eq, %66, %65 : vector<12x48xi32>
    %cst_51 = arith.constant 1.000000e+00 : f32
    %cst_52 = arith.constant 0.000000e+00 : f32
    %68 = vector.broadcast %cst_51 : f32 to vector<12x48xf32>
    %69 = vector.broadcast %cst_52 : f32 to vector<12x48xf32>
    %70 = arith.select %67, %68, %69 : vector<12x48xi1>, vector<12x48xf32>
    %cst_53 = arith.constant dense<0.000000e+00> : vector<12x64xf32>
    %71 = tpu.matmul %70, %64, %cst_53 {dimension_numbers = #tpu.dot_dimension_numbers<[1], [0], [0], [1], [0, 0, 1, 1], [], []>} : vector<12x48xf32>, vector<48x64xf32>, vector<12x64xf32> -> vector<12x64xf32>
    %cst_54 = arith.constant dense<0.000000e+00> : vector<12xf32>
    %72 = vector.multi_reduction <add>, %71, %cst_54 [1] : vector<12x64xf32> to vector<12xf32>
    %73 = vector.shape_cast %72 : vector<12xf32> to vector<12x1xf32>
    %cst_55 = arith.constant 6.400000e+01 : f32
    %74 = vector.broadcast %cst_55 : f32 to vector<12x1xf32>
    %75 = arith.divf %73, %74 : vector<12x1xf32>
    %76 = vector.broadcast %75 : vector<12x1xf32> to vector<12x64xf32>
    %77 = arith.subf %71, %76 : vector<12x64xf32>
    %78 = arith.mulf %77, %77 : vector<12x64xf32>
    %cst_56 = arith.constant dense<0.000000e+00> : vector<12xf32>
    %79 = vector.multi_reduction <add>, %78, %cst_56 [1] : vector<12x64xf32> to vector<12xf32>
    %80 = vector.shape_cast %79 : vector<12xf32> to vector<12x1xf32>
    %cst_57 = arith.constant 6.400000e+01 : f32
    %81 = vector.broadcast %cst_57 : f32 to vector<12x1xf32>
    %82 = arith.divf %80, %81 : vector<12x1xf32>
    %83 = vector.broadcast %75 : vector<12x1xf32> to vector<12x64xf32>
    %84 = arith.subf %71, %83 : vector<12x64xf32>
    %cst_58 = arith.constant 9.99999974E-6 : f32
    %85 = vector.broadcast %cst_58 : f32 to vector<12x1xf32>
    %86 = arith.addf %82, %85 : vector<12x1xf32>
    %87 = math.rsqrt %86 : vector<12x1xf32>
    %88 = vector.broadcast %87 : vector<12x1xf32> to vector<12x64xf32>
    %89 = arith.mulf %84, %88 : vector<12x64xf32>
    %90 = vector.broadcast %12 : vector<1x64xf32> to vector<12x64xf32>
    %91 = arith.mulf %89, %90 : vector<12x64xf32>
    %92 = vector.broadcast %13 : vector<1x64xf32> to vector<12x64xf32>
    %93 = arith.addf %91, %92 : vector<12x64xf32>
    %cst_59 = arith.constant dense<0.000000e+00> : vector<12x64xf32>
    %94 = tpu.matmul %93, %14, %cst_59 {dimension_numbers = #tpu.dot_dimension_numbers<[1], [0], [0], [1], [0, 0, 1, 1], [], []>} : vector<12x64xf32>, vector<64x64xf32>, vector<12x64xf32> -> vector<12x64xf32>
    %cst_60 = arith.constant dense<0.000000e+00> : vector<12x64xf32>
    %95 = tpu.matmul %1, %15, %cst_60 {dimension_numbers = #tpu.dot_dimension_numbers<[1], [0], [0], [1], [0, 0, 1, 1], [], []>} : vector<12x64xf32>, vector<64x64xf32>, vector<12x64xf32> -> vector<12x64xf32>
    %96 = arith.addf %94, %95 : vector<12x64xf32>
    %97 = vector.broadcast %16 : vector<1x64xf32> to vector<12x64xf32>
    %98 = arith.addf %96, %97 : vector<12x64xf32>
    %cst_61 = arith.constant 0.000000e+00 : f32
    %99 = vector.broadcast %cst_61 : f32 to vector<12x64xf32>
    %100 = arith.maximumf %98, %99 : vector<12x64xf32>
    %cst_62 = arith.constant dense<0.000000e+00> : vector<12x64xf32>
    %101 = tpu.matmul %100, %17, %cst_62 {dimension_numbers = #tpu.dot_dimension_numbers<[1], [0], [0], [1], [0, 0, 1, 1], [], []>} : vector<12x64xf32>, vector<64x64xf32>, vector<12x64xf32> -> vector<12x64xf32>
    %102 = vector.broadcast %18 : vector<1x64xf32> to vector<12x64xf32>
    %103 = arith.addf %101, %102 : vector<12x64xf32>
    %c0_63 = arith.constant 0 : index
    %c0_64 = arith.constant 0 : index
    %104 = vector.load %arg19[%c0_63, %c0_64] : memref<12x64xf32, #tpu.memory_space<vmem>>, vector<12x64xf32>
    tpu.vector_store %arg19[%c0_63, %c0_64], %103 {strides = array<i32>} : memref<12x64xf32, #tpu.memory_space<vmem>>, vector<12x64xf32>,
    return
  }
}

module attributes {stable_mosaic.version = 11 : i64} {
  func.func @conv_kernel(%arg0: memref<12x64xf32, #tpu.memory_space<vmem>>, %arg1: memref<20x64xf32, #tpu.memory_space<vmem>>, %arg2: memref<48x1xi32, #tpu.memory_space<vmem>>, %arg3: memref<48x1xi32, #tpu.memory_space<vmem>>, %arg4: memref<1x48xi32, #tpu.memory_space<vmem>>, %arg5: memref<64x64xf32, #tpu.memory_space<vmem>>, %arg6: memref<1x64xf32, #tpu.memory_space<vmem>>, %arg7: memref<64x64xf32, #tpu.memory_space<vmem>>, %arg8: memref<1x64xf32, #tpu.memory_space<vmem>>, %arg9: memref<1x64xf32, #tpu.memory_space<vmem>>, %arg10: memref<64x64xf32, #tpu.memory_space<vmem>>, %arg11: memref<1x64xf32, #tpu.memory_space<vmem>>, %arg12: memref<1x64xf32, #tpu.memory_space<vmem>>, %arg13: memref<1x64xf32, #tpu.memory_space<vmem>>, %arg14: memref<64x64xf32, #tpu.memory_space<vmem>>, %arg15: memref<64x64xf32, #tpu.memory_space<vmem>>, %arg16: memref<1x64xf32, #tpu.memory_space<vmem>>, %arg17: memref<64x64xf32, #tpu.memory_space<vmem>>, %arg18: memref<1x64xf32, #tpu.memory_space<vmem>>, %arg19: memref<20x64xf32, #tpu.memory_space<vmem>>) attributes {dimension_semantics = [], scalar_prefetch = 0 : i64, scratch_operands = 0 : i64, tpu.core_type = #tpu.core_type<tc>} {
    %c0 = arith.constant 0 : index
    %c0_0 = arith.constant 0 : index
    %0 = vector.load %arg0[%c0, %c0_0] : memref<12x64xf32, #tpu.memory_space<vmem>>, vector<12x64xf32>
    %c0_1 = arith.constant 0 : index
    %c0_2 = arith.constant 0 : index
    %1 = vector.load %arg1[%c0_1, %c0_2] : memref<20x64xf32, #tpu.memory_space<vmem>>, vector<20x64xf32>
    %c0_3 = arith.constant 0 : index
    %c0_4 = arith.constant 0 : index
    %2 = vector.load %arg2[%c0_3, %c0_4] : memref<48x1xi32, #tpu.memory_space<vmem>>, vector<48x1xi32>
    %c0_5 = arith.constant 0 : index
    %c0_6 = arith.constant 0 : index
    %3 = vector.load %arg3[%c0_5, %c0_6] : memref<48x1xi32, #tpu.memory_space<vmem>>, vector<48x1xi32>
    %c0_7 = arith.constant 0 : index
    %c0_8 = arith.constant 0 : index
    %4 = vector.load %arg4[%c0_7, %c0_8] : memref<1x48xi32, #tpu.memory_space<vmem>>, vector<1x48xi32>
    %c0_9 = arith.constant 0 : index
    %c0_10 = arith.constant 0 : index
    %5 = vector.load %arg5[%c0_9, %c0_10] : memref<64x64xf32, #tpu.memory_space<vmem>>, vector<64x64xf32>
    %c0_11 = arith.constant 0 : index
    %c0_12 = arith.constant 0 : index
    %6 = vector.load %arg6[%c0_11, %c0_12] : memref<1x64xf32, #tpu.memory_space<vmem>>, vector<1x64xf32>
    %c0_13 = arith.constant 0 : index
    %c0_14 = arith.constant 0 : index
    %7 = vector.load %arg7[%c0_13, %c0_14] : memref<64x64xf32, #tpu.memory_space<vmem>>, vector<64x64xf32>
    %c0_15 = arith.constant 0 : index
    %c0_16 = arith.constant 0 : index
    %8 = vector.load %arg8[%c0_15, %c0_16] : memref<1x64xf32, #tpu.memory_space<vmem>>, vector<1x64xf32>
    %c0_17 = arith.constant 0 : index
    %c0_18 = arith.constant 0 : index
    %9 = vector.load %arg9[%c0_17, %c0_18] : memref<1x64xf32, #tpu.memory_space<vmem>>, vector<1x64xf32>
    %c0_19 = arith.constant 0 : index
    %c0_20 = arith.constant 0 : index
    %10 = vector.load %arg10[%c0_19, %c0_20] : memref<64x64xf32, #tpu.memory_space<vmem>>, vector<64x64xf32>
    %c0_21 = arith.constant 0 : index
    %c0_22 = arith.constant 0 : index
    %11 = vector.load %arg11[%c0_21, %c0_22] : memref<1x64xf32, #tpu.memory_space<vmem>>, vector<1x64xf32>
    %c0_23 = arith.constant 0 : index
    %c0_24 = arith.constant 0 : index
    %12 = vector.load %arg12[%c0_23, %c0_24] : memref<1x64xf32, #tpu.memory_space<vmem>>, vector<1x64xf32>
    %c0_25 = arith.constant 0 : index
    %c0_26 = arith.constant 0 : index
    %13 = vector.load %arg13[%c0_25, %c0_26] : memref<1x64xf32, #tpu.memory_space<vmem>>, vector<1x64xf32>
    %c0_27 = arith.constant 0 : index
    %c0_28 = arith.constant 0 : index
    %14 = vector.load %arg14[%c0_27, %c0_28] : memref<64x64xf32, #tpu.memory_space<vmem>>, vector<64x64xf32>
    %c0_29 = arith.constant 0 : index
    %c0_30 = arith.constant 0 : index
    %15 = vector.load %arg15[%c0_29, %c0_30] : memref<64x64xf32, #tpu.memory_space<vmem>>, vector<64x64xf32>
    %c0_31 = arith.constant 0 : index
    %c0_32 = arith.constant 0 : index
    %16 = vector.load %arg16[%c0_31, %c0_32] : memref<1x64xf32, #tpu.memory_space<vmem>>, vector<1x64xf32>
    %c0_33 = arith.constant 0 : index
    %c0_34 = arith.constant 0 : index
    %17 = vector.load %arg17[%c0_33, %c0_34] : memref<64x64xf32, #tpu.memory_space<vmem>>, vector<64x64xf32>
    %c0_35 = arith.constant 0 : index
    %c0_36 = arith.constant 0 : index
    %18 = vector.load %arg18[%c0_35, %c0_36] : memref<1x64xf32, #tpu.memory_space<vmem>>, vector<1x64xf32>
    %cst = arith.constant dense<0.000000e+00> : vector<12x64xf32>
    %19 = tpu.matmul %0, %7, %cst {dimension_numbers = #tpu.dot_dimension_numbers<[1], [0], [0], [1], [0, 0, 1, 1], [], []>} : vector<12x64xf32>, vector<64x64xf32>, vector<12x64xf32> -> vector<12x64xf32>
    %cst_37 = arith.constant dense<0.000000e+00> : vector<20x64xf32>
    %20 = tpu.matmul %1, %5, %cst_37 {dimension_numbers = #tpu.dot_dimension_numbers<[1], [0], [0], [1], [0, 0, 1, 1], [], []>} : vector<20x64xf32>, vector<64x64xf32>, vector<20x64xf32> -> vector<20x64xf32>
    %21 = vector.broadcast %6 : vector<1x64xf32> to vector<20x64xf32>
    %22 = arith.addf %20, %21 : vector<20x64xf32>
    %23 = tpu.iota {dimensions = array<i32: 1>} : vector<48x12xi32>
    %24 = tpu.iota {dimensions = array<i32: 1>} : vector<48x20xi32>
    %25 = vector.broadcast %2 : vector<48x1xi32> to vector<48x12xi32>
    %26 = arith.cmpi eq, %25, %23 : vector<48x12xi32>
    %cst_38 = arith.constant 1.000000e+00 : f32
    %cst_39 = arith.constant 0.000000e+00 : f32
    %27 = vector.broadcast %cst_38 : f32 to vector<48x12xf32>
    %28 = vector.broadcast %cst_39 : f32 to vector<48x12xf32>
    %29 = arith.select %26, %27, %28 : vector<48x12xi1>, vector<48x12xf32>
    %30 = vector.broadcast %3 : vector<48x1xi32> to vector<48x20xi32>
    %31 = arith.cmpi eq, %30, %24 : vector<48x20xi32>
    %cst_40 = arith.constant 1.000000e+00 : f32
    %cst_41 = arith.constant 0.000000e+00 : f32
    %32 = vector.broadcast %cst_40 : f32 to vector<48x20xf32>
    %33 = vector.broadcast %cst_41 : f32 to vector<48x20xf32>
    %34 = arith.select %31, %32, %33 : vector<48x20xi1>, vector<48x20xf32>
    %cst_42 = arith.constant dense<0.000000e+00> : vector<48x64xf32>
    %35 = tpu.matmul %34, %22, %cst_42 {dimension_numbers = #tpu.dot_dimension_numbers<[1], [0], [0], [1], [0, 0, 1, 1], [], []>} : vector<48x20xf32>, vector<20x64xf32>, vector<48x64xf32> -> vector<48x64xf32>
    %cst_43 = arith.constant dense<0.000000e+00> : vector<48x64xf32>
    %36 = tpu.matmul %29, %19, %cst_43 {dimension_numbers = #tpu.dot_dimension_numbers<[1], [0], [0], [1], [0, 0, 1, 1], [], []>} : vector<48x12xf32>, vector<12x64xf32>, vector<48x64xf32> -> vector<48x64xf32>
    %37 = arith.addf %35, %36 : vector<48x64xf32>
    %cst_44 = arith.constant dense<0.000000e+00> : vector<48xf32>
    %38 = vector.multi_reduction <add>, %37, %cst_44 [1] : vector<48x64xf32> to vector<48xf32>
    %39 = vector.shape_cast %38 : vector<48xf32> to vector<48x1xf32>
    %cst_45 = arith.constant 6.400000e+01 : f32
    %40 = vector.broadcast %cst_45 : f32 to vector<48x1xf32>
    %41 = arith.divf %39, %40 : vector<48x1xf32>
    %42 = vector.broadcast %41 : vector<48x1xf32> to vector<48x64xf32>
    %43 = arith.subf %37, %42 : vector<48x64xf32>
    %44 = arith.mulf %43, %43 : vector<48x64xf32>
    %cst_46 = arith.constant dense<0.000000e+00> : vector<48xf32>
    %45 = vector.multi_reduction <add>, %44, %cst_46 [1] : vector<48x64xf32> to vector<48xf32>
    %46 = vector.shape_cast %45 : vector<48xf32> to vector<48x1xf32>
    %cst_47 = arith.constant 6.400000e+01 : f32
    %47 = vector.broadcast %cst_47 : f32 to vector<48x1xf32>
    %48 = arith.divf %46, %47 : vector<48x1xf32>
    %49 = vector.broadcast %41 : vector<48x1xf32> to vector<48x64xf32>
    %50 = arith.subf %37, %49 : vector<48x64xf32>
    %cst_48 = arith.constant 9.99999974E-6 : f32
    %51 = vector.broadcast %cst_48 : f32 to vector<48x1xf32>
    %52 = arith.addf %48, %51 : vector<48x1xf32>
    %53 = math.rsqrt %52 : vector<48x1xf32>
    %54 = vector.broadcast %53 : vector<48x1xf32> to vector<48x64xf32>
    %55 = arith.mulf %50, %54 : vector<48x64xf32>
    %56 = vector.broadcast %8 : vector<1x64xf32> to vector<48x64xf32>
    %57 = arith.mulf %55, %56 : vector<48x64xf32>
    %58 = vector.broadcast %9 : vector<1x64xf32> to vector<48x64xf32>
    %59 = arith.addf %57, %58 : vector<48x64xf32>
    %cst_49 = arith.constant 0.000000e+00 : f32
    %60 = vector.broadcast %cst_49 : f32 to vector<48x64xf32>
    %61 = arith.maximumf %59, %60 : vector<48x64xf32>
    %cst_50 = arith.constant dense<0.000000e+00> : vector<48x64xf32>
    %62 = tpu.matmul %61, %10, %cst_50 {dimension_numbers = #tpu.dot_dimension_numbers<[1], [0], [0], [1], [0, 0, 1, 1], [], []>} : vector<48x64xf32>, vector<64x64xf32>, vector<48x64xf32> -> vector<48x64xf32>
    %63 = vector.broadcast %11 : vector<1x64xf32> to vector<48x64xf32>
    %64 = arith.addf %62, %63 : vector<48x64xf32>
    %65 = tpu.iota {dimensions = array<i32: 0>} : vector<20x48xi32>
    %66 = vector.broadcast %4 : vector<1x48xi32> to vector<20x48xi32>
    %67 = arith.cmpi eq, %66, %65 : vector<20x48xi32>
    %cst_51 = arith.constant 1.000000e+00 : f32
    %cst_52 = arith.constant 0.000000e+00 : f32
    %68 = vector.broadcast %cst_51 : f32 to vector<20x48xf32>
    %69 = vector.broadcast %cst_52 : f32 to vector<20x48xf32>
    %70 = arith.select %67, %68, %69 : vector<20x48xi1>, vector<20x48xf32>
    %cst_53 = arith.constant dense<0.000000e+00> : vector<20x64xf32>
    %71 = tpu.matmul %70, %64, %cst_53 {dimension_numbers = #tpu.dot_dimension_numbers<[1], [0], [0], [1], [0, 0, 1, 1], [], []>} : vector<20x48xf32>, vector<48x64xf32>, vector<20x64xf32> -> vector<20x64xf32>
    %cst_54 = arith.constant dense<0.000000e+00> : vector<20xf32>
    %72 = vector.multi_reduction <add>, %71, %cst_54 [1] : vector<20x64xf32> to vector<20xf32>
    %73 = vector.shape_cast %72 : vector<20xf32> to vector<20x1xf32>
    %cst_55 = arith.constant 6.400000e+01 : f32
    %74 = vector.broadcast %cst_55 : f32 to vector<20x1xf32>
    %75 = arith.divf %73, %74 : vector<20x1xf32>
    %76 = vector.broadcast %75 : vector<20x1xf32> to vector<20x64xf32>
    %77 = arith.subf %71, %76 : vector<20x64xf32>
    %78 = arith.mulf %77, %77 : vector<20x64xf32>
    %cst_56 = arith.constant dense<0.000000e+00> : vector<20xf32>
    %79 = vector.multi_reduction <add>, %78, %cst_56 [1] : vector<20x64xf32> to vector<20xf32>
    %80 = vector.shape_cast %79 : vector<20xf32> to vector<20x1xf32>
    %cst_57 = arith.constant 6.400000e+01 : f32
    %81 = vector.broadcast %cst_57 : f32 to vector<20x1xf32>
    %82 = arith.divf %80, %81 : vector<20x1xf32>
    %83 = vector.broadcast %75 : vector<20x1xf32> to vector<20x64xf32>
    %84 = arith.subf %71, %83 : vector<20x64xf32>
    %cst_58 = arith.constant 9.99999974E-6 : f32
    %85 = vector.broadcast %cst_58 : f32 to vector<20x1xf32>
    %86 = arith.addf %82, %85 : vector<20x1xf32>
    %87 = math.rsqrt %86 : vector<20x1xf32>
    %88 = vector.broadcast %87 : vector<20x1xf32> to vector<20x64xf32>
    %89 = arith.mulf %84, %88 : vector<20x64xf32>
    %90 = vector.broadcast %12 : vector<1x64xf32> to vector<20x64xf32>
    %91 = arith.mulf %89, %90 : vector<20x64xf32>
    %92 = vector.broadcast %13 : vector<1x64xf32> to vector<20x64xf32>
    %93 = arith.addf %91, %92 : vector<20x64xf32>
    %cst_59 = arith.constant dense<0.000000e+00> : vector<20x64xf32>
    %94 = tpu.matmul %93, %14, %cst_59 {dimension_numbers = #tpu.dot_dimension_numbers<[1], [0], [0], [1], [0, 0, 1, 1], [], []>} : vector<20x64xf32>, vector<64x64xf32>, vector<20x64xf32> -> vector<20x64xf32>
    %cst_60 = arith.constant dense<0.000000e+00> : vector<20x64xf32>
    %95 = tpu.matmul %1, %15, %cst_60 {dimension_numbers = #tpu.dot_dimension_numbers<[1], [0], [0], [1], [0, 0, 1, 1], [], []>} : vector<20x64xf32>, vector<64x64xf32>, vector<20x64xf32> -> vector<20x64xf32>
    %96 = arith.addf %94, %95 : vector<20x64xf32>
    %97 = vector.broadcast %16 : vector<1x64xf32> to vector<20x64xf32>
    %98 = arith.addf %96, %97 : vector<20x64xf32>
    %cst_61 = arith.constant 0.000000e+00 : f32
    %99 = vector.broadcast %cst_61 : f32 to vector<20x64xf32>
    %100 = arith.maximumf %98, %99 : vector<20x64xf32>
    %cst_62 = arith.constant dense<0.000000e+00> : vector<20x64xf32>
    %101 = tpu.matmul %100, %17, %cst_62 {dimension_numbers = #tpu.dot_dimension_numbers<[1], [0], [0], [1], [0, 0, 1, 1], [], []>} : vector<20x64xf32>, vector<64x64xf32>, vector<20x64xf32> -> vector<20x64xf32>
    %102 = vector.broadcast %18 : vector<1x64xf32> to vector<20x64xf32>
    %103 = arith.addf %101, %102 : vector<20x64xf32>
    %c0_63 = arith.constant 0 : index
    %c0_64 = arith.constant 0 : index
    %104 = vector.load %arg19[%c0_63, %c0_64] : memref<20x64xf32, #tpu.memory_space<vmem>>, vector<20x64xf32>
    tpu.vector_store %arg19[%c0_63, %c0_64], %103 {strides = array<i32>} : memref<20x64xf32, #tpu.memory_space<vmem>>, vector<20x64xf32>,
    return
  }
}

module attributes {stable_mosaic.version = 11 : i64} {
  func.func @conv_head_kernel(%arg0: memref<20x64xf32, #tpu.memory_space<vmem>>, %arg1: memref<12x64xf32, #tpu.memory_space<vmem>>, %arg2: memref<48x1xi32, #tpu.memory_space<vmem>>, %arg3: memref<48x1xi32, #tpu.memory_space<vmem>>, %arg4: memref<1x48xi32, #tpu.memory_space<vmem>>, %arg5: memref<64x64xf32, #tpu.memory_space<vmem>>, %arg6: memref<1x64xf32, #tpu.memory_space<vmem>>, %arg7: memref<64x64xf32, #tpu.memory_space<vmem>>, %arg8: memref<1x64xf32, #tpu.memory_space<vmem>>, %arg9: memref<1x64xf32, #tpu.memory_space<vmem>>, %arg10: memref<64x64xf32, #tpu.memory_space<vmem>>, %arg11: memref<1x64xf32, #tpu.memory_space<vmem>>, %arg12: memref<1x64xf32, #tpu.memory_space<vmem>>, %arg13: memref<1x64xf32, #tpu.memory_space<vmem>>, %arg14: memref<64x64xf32, #tpu.memory_space<vmem>>, %arg15: memref<64x64xf32, #tpu.memory_space<vmem>>, %arg16: memref<1x64xf32, #tpu.memory_space<vmem>>, %arg17: memref<64x64xf32, #tpu.memory_space<vmem>>, %arg18: memref<1x64xf32, #tpu.memory_space<vmem>>, %arg19: memref<64x64xf32, #tpu.memory_space<vmem>>, %arg20: memref<1x64xf32, #tpu.memory_space<vmem>>, %arg21: memref<1x64xf32, #tpu.memory_space<vmem>>, %arg22: memref<12x64xf32, #tpu.memory_space<vmem>>, %arg23: memref<12x1xf32, #tpu.memory_space<vmem>>) attributes {dimension_semantics = [], scalar_prefetch = 0 : i64, scratch_operands = 0 : i64, tpu.core_type = #tpu.core_type<tc>} {
    %c0 = arith.constant 0 : index
    %c0_0 = arith.constant 0 : index
    %0 = vector.load %arg0[%c0, %c0_0] : memref<20x64xf32, #tpu.memory_space<vmem>>, vector<20x64xf32>
    %c0_1 = arith.constant 0 : index
    %c0_2 = arith.constant 0 : index
    %1 = vector.load %arg1[%c0_1, %c0_2] : memref<12x64xf32, #tpu.memory_space<vmem>>, vector<12x64xf32>
    %c0_3 = arith.constant 0 : index
    %c0_4 = arith.constant 0 : index
    %2 = vector.load %arg2[%c0_3, %c0_4] : memref<48x1xi32, #tpu.memory_space<vmem>>, vector<48x1xi32>
    %c0_5 = arith.constant 0 : index
    %c0_6 = arith.constant 0 : index
    %3 = vector.load %arg3[%c0_5, %c0_6] : memref<48x1xi32, #tpu.memory_space<vmem>>, vector<48x1xi32>
    %c0_7 = arith.constant 0 : index
    %c0_8 = arith.constant 0 : index
    %4 = vector.load %arg4[%c0_7, %c0_8] : memref<1x48xi32, #tpu.memory_space<vmem>>, vector<1x48xi32>
    %c0_9 = arith.constant 0 : index
    %c0_10 = arith.constant 0 : index
    %5 = vector.load %arg5[%c0_9, %c0_10] : memref<64x64xf32, #tpu.memory_space<vmem>>, vector<64x64xf32>
    %c0_11 = arith.constant 0 : index
    %c0_12 = arith.constant 0 : index
    %6 = vector.load %arg6[%c0_11, %c0_12] : memref<1x64xf32, #tpu.memory_space<vmem>>, vector<1x64xf32>
    %c0_13 = arith.constant 0 : index
    %c0_14 = arith.constant 0 : index
    %7 = vector.load %arg7[%c0_13, %c0_14] : memref<64x64xf32, #tpu.memory_space<vmem>>, vector<64x64xf32>
    %c0_15 = arith.constant 0 : index
    %c0_16 = arith.constant 0 : index
    %8 = vector.load %arg8[%c0_15, %c0_16] : memref<1x64xf32, #tpu.memory_space<vmem>>, vector<1x64xf32>
    %c0_17 = arith.constant 0 : index
    %c0_18 = arith.constant 0 : index
    %9 = vector.load %arg9[%c0_17, %c0_18] : memref<1x64xf32, #tpu.memory_space<vmem>>, vector<1x64xf32>
    %c0_19 = arith.constant 0 : index
    %c0_20 = arith.constant 0 : index
    %10 = vector.load %arg10[%c0_19, %c0_20] : memref<64x64xf32, #tpu.memory_space<vmem>>, vector<64x64xf32>
    %c0_21 = arith.constant 0 : index
    %c0_22 = arith.constant 0 : index
    %11 = vector.load %arg11[%c0_21, %c0_22] : memref<1x64xf32, #tpu.memory_space<vmem>>, vector<1x64xf32>
    %c0_23 = arith.constant 0 : index
    %c0_24 = arith.constant 0 : index
    %12 = vector.load %arg12[%c0_23, %c0_24] : memref<1x64xf32, #tpu.memory_space<vmem>>, vector<1x64xf32>
    %c0_25 = arith.constant 0 : index
    %c0_26 = arith.constant 0 : index
    %13 = vector.load %arg13[%c0_25, %c0_26] : memref<1x64xf32, #tpu.memory_space<vmem>>, vector<1x64xf32>
    %c0_27 = arith.constant 0 : index
    %c0_28 = arith.constant 0 : index
    %14 = vector.load %arg14[%c0_27, %c0_28] : memref<64x64xf32, #tpu.memory_space<vmem>>, vector<64x64xf32>
    %c0_29 = arith.constant 0 : index
    %c0_30 = arith.constant 0 : index
    %15 = vector.load %arg15[%c0_29, %c0_30] : memref<64x64xf32, #tpu.memory_space<vmem>>, vector<64x64xf32>
    %c0_31 = arith.constant 0 : index
    %c0_32 = arith.constant 0 : index
    %16 = vector.load %arg16[%c0_31, %c0_32] : memref<1x64xf32, #tpu.memory_space<vmem>>, vector<1x64xf32>
    %c0_33 = arith.constant 0 : index
    %c0_34 = arith.constant 0 : index
    %17 = vector.load %arg17[%c0_33, %c0_34] : memref<64x64xf32, #tpu.memory_space<vmem>>, vector<64x64xf32>
    %c0_35 = arith.constant 0 : index
    %c0_36 = arith.constant 0 : index
    %18 = vector.load %arg18[%c0_35, %c0_36] : memref<1x64xf32, #tpu.memory_space<vmem>>, vector<1x64xf32>
    %cst = arith.constant dense<0.000000e+00> : vector<20x64xf32>
    %19 = tpu.matmul %0, %7, %cst {dimension_numbers = #tpu.dot_dimension_numbers<[1], [0], [0], [1], [0, 0, 1, 1], [], []>} : vector<20x64xf32>, vector<64x64xf32>, vector<20x64xf32> -> vector<20x64xf32>
    %cst_37 = arith.constant dense<0.000000e+00> : vector<12x64xf32>
    %20 = tpu.matmul %1, %5, %cst_37 {dimension_numbers = #tpu.dot_dimension_numbers<[1], [0], [0], [1], [0, 0, 1, 1], [], []>} : vector<12x64xf32>, vector<64x64xf32>, vector<12x64xf32> -> vector<12x64xf32>
    %21 = vector.broadcast %6 : vector<1x64xf32> to vector<12x64xf32>
    %22 = arith.addf %20, %21 : vector<12x64xf32>
    %23 = tpu.iota {dimensions = array<i32: 1>} : vector<48x20xi32>
    %24 = tpu.iota {dimensions = array<i32: 1>} : vector<48x12xi32>
    %25 = vector.broadcast %2 : vector<48x1xi32> to vector<48x20xi32>
    %26 = arith.cmpi eq, %25, %23 : vector<48x20xi32>
    %cst_38 = arith.constant 1.000000e+00 : f32
    %cst_39 = arith.constant 0.000000e+00 : f32
    %27 = vector.broadcast %cst_38 : f32 to vector<48x20xf32>
    %28 = vector.broadcast %cst_39 : f32 to vector<48x20xf32>
    %29 = arith.select %26, %27, %28 : vector<48x20xi1>, vector<48x20xf32>
    %30 = vector.broadcast %3 : vector<48x1xi32> to vector<48x12xi32>
    %31 = arith.cmpi eq, %30, %24 : vector<48x12xi32>
    %cst_40 = arith.constant 1.000000e+00 : f32
    %cst_41 = arith.constant 0.000000e+00 : f32
    %32 = vector.broadcast %cst_40 : f32 to vector<48x12xf32>
    %33 = vector.broadcast %cst_41 : f32 to vector<48x12xf32>
    %34 = arith.select %31, %32, %33 : vector<48x12xi1>, vector<48x12xf32>
    %cst_42 = arith.constant dense<0.000000e+00> : vector<48x64xf32>
    %35 = tpu.matmul %34, %22, %cst_42 {dimension_numbers = #tpu.dot_dimension_numbers<[1], [0], [0], [1], [0, 0, 1, 1], [], []>} : vector<48x12xf32>, vector<12x64xf32>, vector<48x64xf32> -> vector<48x64xf32>
    %cst_43 = arith.constant dense<0.000000e+00> : vector<48x64xf32>
    %36 = tpu.matmul %29, %19, %cst_43 {dimension_numbers = #tpu.dot_dimension_numbers<[1], [0], [0], [1], [0, 0, 1, 1], [], []>} : vector<48x20xf32>, vector<20x64xf32>, vector<48x64xf32> -> vector<48x64xf32>
    %37 = arith.addf %35, %36 : vector<48x64xf32>
    %cst_44 = arith.constant dense<0.000000e+00> : vector<48xf32>
    %38 = vector.multi_reduction <add>, %37, %cst_44 [1] : vector<48x64xf32> to vector<48xf32>
    %39 = vector.shape_cast %38 : vector<48xf32> to vector<48x1xf32>
    %cst_45 = arith.constant 6.400000e+01 : f32
    %40 = vector.broadcast %cst_45 : f32 to vector<48x1xf32>
    %41 = arith.divf %39, %40 : vector<48x1xf32>
    %42 = vector.broadcast %41 : vector<48x1xf32> to vector<48x64xf32>
    %43 = arith.subf %37, %42 : vector<48x64xf32>
    %44 = arith.mulf %43, %43 : vector<48x64xf32>
    %cst_46 = arith.constant dense<0.000000e+00> : vector<48xf32>
    %45 = vector.multi_reduction <add>, %44, %cst_46 [1] : vector<48x64xf32> to vector<48xf32>
    %46 = vector.shape_cast %45 : vector<48xf32> to vector<48x1xf32>
    %cst_47 = arith.constant 6.400000e+01 : f32
    %47 = vector.broadcast %cst_47 : f32 to vector<48x1xf32>
    %48 = arith.divf %46, %47 : vector<48x1xf32>
    %49 = vector.broadcast %41 : vector<48x1xf32> to vector<48x64xf32>
    %50 = arith.subf %37, %49 : vector<48x64xf32>
    %cst_48 = arith.constant 9.99999974E-6 : f32
    %51 = vector.broadcast %cst_48 : f32 to vector<48x1xf32>
    %52 = arith.addf %48, %51 : vector<48x1xf32>
    %53 = math.rsqrt %52 : vector<48x1xf32>
    %54 = vector.broadcast %53 : vector<48x1xf32> to vector<48x64xf32>
    %55 = arith.mulf %50, %54 : vector<48x64xf32>
    %56 = vector.broadcast %8 : vector<1x64xf32> to vector<48x64xf32>
    %57 = arith.mulf %55, %56 : vector<48x64xf32>
    %58 = vector.broadcast %9 : vector<1x64xf32> to vector<48x64xf32>
    %59 = arith.addf %57, %58 : vector<48x64xf32>
    %cst_49 = arith.constant 0.000000e+00 : f32
    %60 = vector.broadcast %cst_49 : f32 to vector<48x64xf32>
    %61 = arith.maximumf %59, %60 : vector<48x64xf32>
    %cst_50 = arith.constant dense<0.000000e+00> : vector<48x64xf32>
    %62 = tpu.matmul %61, %10, %cst_50 {dimension_numbers = #tpu.dot_dimension_numbers<[1], [0], [0], [1], [0, 0, 1, 1], [], []>} : vector<48x64xf32>, vector<64x64xf32>, vector<48x64xf32> -> vector<48x64xf32>
    %63 = vector.broadcast %11 : vector<1x64xf32> to vector<48x64xf32>
    %64 = arith.addf %62, %63 : vector<48x64xf32>
    %65 = tpu.iota {dimensions = array<i32: 0>} : vector<12x48xi32>
    %66 = vector.broadcast %4 : vector<1x48xi32> to vector<12x48xi32>
    %67 = arith.cmpi eq, %66, %65 : vector<12x48xi32>
    %cst_51 = arith.constant 1.000000e+00 : f32
    %cst_52 = arith.constant 0.000000e+00 : f32
    %68 = vector.broadcast %cst_51 : f32 to vector<12x48xf32>
    %69 = vector.broadcast %cst_52 : f32 to vector<12x48xf32>
    %70 = arith.select %67, %68, %69 : vector<12x48xi1>, vector<12x48xf32>
    %cst_53 = arith.constant dense<0.000000e+00> : vector<12x64xf32>
    %71 = tpu.matmul %70, %64, %cst_53 {dimension_numbers = #tpu.dot_dimension_numbers<[1], [0], [0], [1], [0, 0, 1, 1], [], []>} : vector<12x48xf32>, vector<48x64xf32>, vector<12x64xf32> -> vector<12x64xf32>
    %cst_54 = arith.constant dense<0.000000e+00> : vector<12xf32>
    %72 = vector.multi_reduction <add>, %71, %cst_54 [1] : vector<12x64xf32> to vector<12xf32>
    %73 = vector.shape_cast %72 : vector<12xf32> to vector<12x1xf32>
    %cst_55 = arith.constant 6.400000e+01 : f32
    %74 = vector.broadcast %cst_55 : f32 to vector<12x1xf32>
    %75 = arith.divf %73, %74 : vector<12x1xf32>
    %76 = vector.broadcast %75 : vector<12x1xf32> to vector<12x64xf32>
    %77 = arith.subf %71, %76 : vector<12x64xf32>
    %78 = arith.mulf %77, %77 : vector<12x64xf32>
    %cst_56 = arith.constant dense<0.000000e+00> : vector<12xf32>
    %79 = vector.multi_reduction <add>, %78, %cst_56 [1] : vector<12x64xf32> to vector<12xf32>
    %80 = vector.shape_cast %79 : vector<12xf32> to vector<12x1xf32>
    %cst_57 = arith.constant 6.400000e+01 : f32
    %81 = vector.broadcast %cst_57 : f32 to vector<12x1xf32>
    %82 = arith.divf %80, %81 : vector<12x1xf32>
    %83 = vector.broadcast %75 : vector<12x1xf32> to vector<12x64xf32>
    %84 = arith.subf %71, %83 : vector<12x64xf32>
    %cst_58 = arith.constant 9.99999974E-6 : f32
    %85 = vector.broadcast %cst_58 : f32 to vector<12x1xf32>
    %86 = arith.addf %82, %85 : vector<12x1xf32>
    %87 = math.rsqrt %86 : vector<12x1xf32>
    %88 = vector.broadcast %87 : vector<12x1xf32> to vector<12x64xf32>
    %89 = arith.mulf %84, %88 : vector<12x64xf32>
    %90 = vector.broadcast %12 : vector<1x64xf32> to vector<12x64xf32>
    %91 = arith.mulf %89, %90 : vector<12x64xf32>
    %92 = vector.broadcast %13 : vector<1x64xf32> to vector<12x64xf32>
    %93 = arith.addf %91, %92 : vector<12x64xf32>
    %cst_59 = arith.constant dense<0.000000e+00> : vector<12x64xf32>
    %94 = tpu.matmul %93, %14, %cst_59 {dimension_numbers = #tpu.dot_dimension_numbers<[1], [0], [0], [1], [0, 0, 1, 1], [], []>} : vector<12x64xf32>, vector<64x64xf32>, vector<12x64xf32> -> vector<12x64xf32>
    %cst_60 = arith.constant dense<0.000000e+00> : vector<12x64xf32>
    %95 = tpu.matmul %1, %15, %cst_60 {dimension_numbers = #tpu.dot_dimension_numbers<[1], [0], [0], [1], [0, 0, 1, 1], [], []>} : vector<12x64xf32>, vector<64x64xf32>, vector<12x64xf32> -> vector<12x64xf32>
    %96 = arith.addf %94, %95 : vector<12x64xf32>
    %97 = vector.broadcast %16 : vector<1x64xf32> to vector<12x64xf32>
    %98 = arith.addf %96, %97 : vector<12x64xf32>
    %cst_61 = arith.constant 0.000000e+00 : f32
    %99 = vector.broadcast %cst_61 : f32 to vector<12x64xf32>
    %100 = arith.maximumf %98, %99 : vector<12x64xf32>
    %cst_62 = arith.constant dense<0.000000e+00> : vector<12x64xf32>
    %101 = tpu.matmul %100, %17, %cst_62 {dimension_numbers = #tpu.dot_dimension_numbers<[1], [0], [0], [1], [0, 0, 1, 1], [], []>} : vector<12x64xf32>, vector<64x64xf32>, vector<12x64xf32> -> vector<12x64xf32>
    %102 = vector.broadcast %18 : vector<1x64xf32> to vector<12x64xf32>
    %103 = arith.addf %101, %102 : vector<12x64xf32>
    %c0_63 = arith.constant 0 : index
    %c0_64 = arith.constant 0 : index
    %104 = vector.load %arg22[%c0_63, %c0_64] : memref<12x64xf32, #tpu.memory_space<vmem>>, vector<12x64xf32>
    tpu.vector_store %arg22[%c0_63, %c0_64], %103 {strides = array<i32>} : memref<12x64xf32, #tpu.memory_space<vmem>>, vector<12x64xf32>,
    %c0_65 = arith.constant 0 : index
    %c0_66 = arith.constant 0 : index
    %105 = vector.load %arg19[%c0_65, %c0_66] : memref<64x64xf32, #tpu.memory_space<vmem>>, vector<64x64xf32>
    %cst_67 = arith.constant dense<0.000000e+00> : vector<12x64xf32>
    %106 = tpu.matmul %103, %105, %cst_67 {dimension_numbers = #tpu.dot_dimension_numbers<[1], [0], [0], [1], [0, 0, 1, 1], [], []>} : vector<12x64xf32>, vector<64x64xf32>, vector<12x64xf32> -> vector<12x64xf32>
    %c0_68 = arith.constant 0 : index
    %c0_69 = arith.constant 0 : index
    %107 = vector.load %arg20[%c0_68, %c0_69] : memref<1x64xf32, #tpu.memory_space<vmem>>, vector<1x64xf32>
    %108 = vector.broadcast %107 : vector<1x64xf32> to vector<12x64xf32>
    %109 = arith.addf %106, %108 : vector<12x64xf32>
    %cst_70 = arith.constant 0.000000e+00 : f32
    %110 = vector.broadcast %cst_70 : f32 to vector<12x64xf32>
    %111 = arith.maximumf %109, %110 : vector<12x64xf32>
    %c0_71 = arith.constant 0 : index
    %c0_72 = arith.constant 0 : index
    %112 = vector.load %arg21[%c0_71, %c0_72] : memref<1x64xf32, #tpu.memory_space<vmem>>, vector<1x64xf32>
    %113 = vector.broadcast %112 : vector<1x64xf32> to vector<12x64xf32>
    %114 = arith.mulf %111, %113 : vector<12x64xf32>
    %cst_73 = arith.constant dense<0.000000e+00> : vector<12xf32>
    %115 = vector.multi_reduction <add>, %114, %cst_73 [1] : vector<12x64xf32> to vector<12xf32>
    %116 = vector.shape_cast %115 : vector<12xf32> to vector<12x1xf32>
    %cst_74 = arith.constant 6.000000e-01 : f32
    %117 = vector.broadcast %cst_74 : f32 to vector<12x1xf32>
    %118 = arith.divf %116, %117 : vector<12x1xf32>
    %119 = arith.negf %118 : vector<12x1xf32>
    %120 = math.exp %119 : vector<12x1xf32>
    %cst_75 = arith.constant 1.000000e+00 : f32
    %121 = vector.broadcast %cst_75 : f32 to vector<12x1xf32>
    %122 = arith.addf %121, %120 : vector<12x1xf32>
    %123 = arith.divf %121, %122 : vector<12x1xf32>
    %c0_76 = arith.constant 0 : index
    %c0_77 = arith.constant 0 : index
    %124 = vector.load %arg23[%c0_76, %c0_77] : memref<12x1xf32, #tpu.memory_space<vmem>>, vector<12x1xf32>
    tpu.vector_store %arg23[%c0_76, %c0_77], %123 {strides = array<i32>} : memref<12x1xf32, #tpu.memory_space<vmem>>, vector<12x1xf32>,
    return
  }
}

module attributes {stable_mosaic.version = 11 : i64} {
  func.func @conv_head_kernel(%arg0: memref<12x64xf32, #tpu.memory_space<vmem>>, %arg1: memref<20x64xf32, #tpu.memory_space<vmem>>, %arg2: memref<48x1xi32, #tpu.memory_space<vmem>>, %arg3: memref<48x1xi32, #tpu.memory_space<vmem>>, %arg4: memref<1x48xi32, #tpu.memory_space<vmem>>, %arg5: memref<64x64xf32, #tpu.memory_space<vmem>>, %arg6: memref<1x64xf32, #tpu.memory_space<vmem>>, %arg7: memref<64x64xf32, #tpu.memory_space<vmem>>, %arg8: memref<1x64xf32, #tpu.memory_space<vmem>>, %arg9: memref<1x64xf32, #tpu.memory_space<vmem>>, %arg10: memref<64x64xf32, #tpu.memory_space<vmem>>, %arg11: memref<1x64xf32, #tpu.memory_space<vmem>>, %arg12: memref<1x64xf32, #tpu.memory_space<vmem>>, %arg13: memref<1x64xf32, #tpu.memory_space<vmem>>, %arg14: memref<64x64xf32, #tpu.memory_space<vmem>>, %arg15: memref<64x64xf32, #tpu.memory_space<vmem>>, %arg16: memref<1x64xf32, #tpu.memory_space<vmem>>, %arg17: memref<64x64xf32, #tpu.memory_space<vmem>>, %arg18: memref<1x64xf32, #tpu.memory_space<vmem>>, %arg19: memref<64x64xf32, #tpu.memory_space<vmem>>, %arg20: memref<1x64xf32, #tpu.memory_space<vmem>>, %arg21: memref<1x64xf32, #tpu.memory_space<vmem>>, %arg22: memref<20x64xf32, #tpu.memory_space<vmem>>, %arg23: memref<20x1xf32, #tpu.memory_space<vmem>>) attributes {dimension_semantics = [], scalar_prefetch = 0 : i64, scratch_operands = 0 : i64, tpu.core_type = #tpu.core_type<tc>} {
    %c0 = arith.constant 0 : index
    %c0_0 = arith.constant 0 : index
    %0 = vector.load %arg0[%c0, %c0_0] : memref<12x64xf32, #tpu.memory_space<vmem>>, vector<12x64xf32>
    %c0_1 = arith.constant 0 : index
    %c0_2 = arith.constant 0 : index
    %1 = vector.load %arg1[%c0_1, %c0_2] : memref<20x64xf32, #tpu.memory_space<vmem>>, vector<20x64xf32>
    %c0_3 = arith.constant 0 : index
    %c0_4 = arith.constant 0 : index
    %2 = vector.load %arg2[%c0_3, %c0_4] : memref<48x1xi32, #tpu.memory_space<vmem>>, vector<48x1xi32>
    %c0_5 = arith.constant 0 : index
    %c0_6 = arith.constant 0 : index
    %3 = vector.load %arg3[%c0_5, %c0_6] : memref<48x1xi32, #tpu.memory_space<vmem>>, vector<48x1xi32>
    %c0_7 = arith.constant 0 : index
    %c0_8 = arith.constant 0 : index
    %4 = vector.load %arg4[%c0_7, %c0_8] : memref<1x48xi32, #tpu.memory_space<vmem>>, vector<1x48xi32>
    %c0_9 = arith.constant 0 : index
    %c0_10 = arith.constant 0 : index
    %5 = vector.load %arg5[%c0_9, %c0_10] : memref<64x64xf32, #tpu.memory_space<vmem>>, vector<64x64xf32>
    %c0_11 = arith.constant 0 : index
    %c0_12 = arith.constant 0 : index
    %6 = vector.load %arg6[%c0_11, %c0_12] : memref<1x64xf32, #tpu.memory_space<vmem>>, vector<1x64xf32>
    %c0_13 = arith.constant 0 : index
    %c0_14 = arith.constant 0 : index
    %7 = vector.load %arg7[%c0_13, %c0_14] : memref<64x64xf32, #tpu.memory_space<vmem>>, vector<64x64xf32>
    %c0_15 = arith.constant 0 : index
    %c0_16 = arith.constant 0 : index
    %8 = vector.load %arg8[%c0_15, %c0_16] : memref<1x64xf32, #tpu.memory_space<vmem>>, vector<1x64xf32>
    %c0_17 = arith.constant 0 : index
    %c0_18 = arith.constant 0 : index
    %9 = vector.load %arg9[%c0_17, %c0_18] : memref<1x64xf32, #tpu.memory_space<vmem>>, vector<1x64xf32>
    %c0_19 = arith.constant 0 : index
    %c0_20 = arith.constant 0 : index
    %10 = vector.load %arg10[%c0_19, %c0_20] : memref<64x64xf32, #tpu.memory_space<vmem>>, vector<64x64xf32>
    %c0_21 = arith.constant 0 : index
    %c0_22 = arith.constant 0 : index
    %11 = vector.load %arg11[%c0_21, %c0_22] : memref<1x64xf32, #tpu.memory_space<vmem>>, vector<1x64xf32>
    %c0_23 = arith.constant 0 : index
    %c0_24 = arith.constant 0 : index
    %12 = vector.load %arg12[%c0_23, %c0_24] : memref<1x64xf32, #tpu.memory_space<vmem>>, vector<1x64xf32>
    %c0_25 = arith.constant 0 : index
    %c0_26 = arith.constant 0 : index
    %13 = vector.load %arg13[%c0_25, %c0_26] : memref<1x64xf32, #tpu.memory_space<vmem>>, vector<1x64xf32>
    %c0_27 = arith.constant 0 : index
    %c0_28 = arith.constant 0 : index
    %14 = vector.load %arg14[%c0_27, %c0_28] : memref<64x64xf32, #tpu.memory_space<vmem>>, vector<64x64xf32>
    %c0_29 = arith.constant 0 : index
    %c0_30 = arith.constant 0 : index
    %15 = vector.load %arg15[%c0_29, %c0_30] : memref<64x64xf32, #tpu.memory_space<vmem>>, vector<64x64xf32>
    %c0_31 = arith.constant 0 : index
    %c0_32 = arith.constant 0 : index
    %16 = vector.load %arg16[%c0_31, %c0_32] : memref<1x64xf32, #tpu.memory_space<vmem>>, vector<1x64xf32>
    %c0_33 = arith.constant 0 : index
    %c0_34 = arith.constant 0 : index
    %17 = vector.load %arg17[%c0_33, %c0_34] : memref<64x64xf32, #tpu.memory_space<vmem>>, vector<64x64xf32>
    %c0_35 = arith.constant 0 : index
    %c0_36 = arith.constant 0 : index
    %18 = vector.load %arg18[%c0_35, %c0_36] : memref<1x64xf32, #tpu.memory_space<vmem>>, vector<1x64xf32>
    %cst = arith.constant dense<0.000000e+00> : vector<12x64xf32>
    %19 = tpu.matmul %0, %7, %cst {dimension_numbers = #tpu.dot_dimension_numbers<[1], [0], [0], [1], [0, 0, 1, 1], [], []>} : vector<12x64xf32>, vector<64x64xf32>, vector<12x64xf32> -> vector<12x64xf32>
    %cst_37 = arith.constant dense<0.000000e+00> : vector<20x64xf32>
    %20 = tpu.matmul %1, %5, %cst_37 {dimension_numbers = #tpu.dot_dimension_numbers<[1], [0], [0], [1], [0, 0, 1, 1], [], []>} : vector<20x64xf32>, vector<64x64xf32>, vector<20x64xf32> -> vector<20x64xf32>
    %21 = vector.broadcast %6 : vector<1x64xf32> to vector<20x64xf32>
    %22 = arith.addf %20, %21 : vector<20x64xf32>
    %23 = tpu.iota {dimensions = array<i32: 1>} : vector<48x12xi32>
    %24 = tpu.iota {dimensions = array<i32: 1>} : vector<48x20xi32>
    %25 = vector.broadcast %2 : vector<48x1xi32> to vector<48x12xi32>
    %26 = arith.cmpi eq, %25, %23 : vector<48x12xi32>
    %cst_38 = arith.constant 1.000000e+00 : f32
    %cst_39 = arith.constant 0.000000e+00 : f32
    %27 = vector.broadcast %cst_38 : f32 to vector<48x12xf32>
    %28 = vector.broadcast %cst_39 : f32 to vector<48x12xf32>
    %29 = arith.select %26, %27, %28 : vector<48x12xi1>, vector<48x12xf32>
    %30 = vector.broadcast %3 : vector<48x1xi32> to vector<48x20xi32>
    %31 = arith.cmpi eq, %30, %24 : vector<48x20xi32>
    %cst_40 = arith.constant 1.000000e+00 : f32
    %cst_41 = arith.constant 0.000000e+00 : f32
    %32 = vector.broadcast %cst_40 : f32 to vector<48x20xf32>
    %33 = vector.broadcast %cst_41 : f32 to vector<48x20xf32>
    %34 = arith.select %31, %32, %33 : vector<48x20xi1>, vector<48x20xf32>
    %cst_42 = arith.constant dense<0.000000e+00> : vector<48x64xf32>
    %35 = tpu.matmul %34, %22, %cst_42 {dimension_numbers = #tpu.dot_dimension_numbers<[1], [0], [0], [1], [0, 0, 1, 1], [], []>} : vector<48x20xf32>, vector<20x64xf32>, vector<48x64xf32> -> vector<48x64xf32>
    %cst_43 = arith.constant dense<0.000000e+00> : vector<48x64xf32>
    %36 = tpu.matmul %29, %19, %cst_43 {dimension_numbers = #tpu.dot_dimension_numbers<[1], [0], [0], [1], [0, 0, 1, 1], [], []>} : vector<48x12xf32>, vector<12x64xf32>, vector<48x64xf32> -> vector<48x64xf32>
    %37 = arith.addf %35, %36 : vector<48x64xf32>
    %cst_44 = arith.constant dense<0.000000e+00> : vector<48xf32>
    %38 = vector.multi_reduction <add>, %37, %cst_44 [1] : vector<48x64xf32> to vector<48xf32>
    %39 = vector.shape_cast %38 : vector<48xf32> to vector<48x1xf32>
    %cst_45 = arith.constant 6.400000e+01 : f32
    %40 = vector.broadcast %cst_45 : f32 to vector<48x1xf32>
    %41 = arith.divf %39, %40 : vector<48x1xf32>
    %42 = vector.broadcast %41 : vector<48x1xf32> to vector<48x64xf32>
    %43 = arith.subf %37, %42 : vector<48x64xf32>
    %44 = arith.mulf %43, %43 : vector<48x64xf32>
    %cst_46 = arith.constant dense<0.000000e+00> : vector<48xf32>
    %45 = vector.multi_reduction <add>, %44, %cst_46 [1] : vector<48x64xf32> to vector<48xf32>
    %46 = vector.shape_cast %45 : vector<48xf32> to vector<48x1xf32>
    %cst_47 = arith.constant 6.400000e+01 : f32
    %47 = vector.broadcast %cst_47 : f32 to vector<48x1xf32>
    %48 = arith.divf %46, %47 : vector<48x1xf32>
    %49 = vector.broadcast %41 : vector<48x1xf32> to vector<48x64xf32>
    %50 = arith.subf %37, %49 : vector<48x64xf32>
    %cst_48 = arith.constant 9.99999974E-6 : f32
    %51 = vector.broadcast %cst_48 : f32 to vector<48x1xf32>
    %52 = arith.addf %48, %51 : vector<48x1xf32>
    %53 = math.rsqrt %52 : vector<48x1xf32>
    %54 = vector.broadcast %53 : vector<48x1xf32> to vector<48x64xf32>
    %55 = arith.mulf %50, %54 : vector<48x64xf32>
    %56 = vector.broadcast %8 : vector<1x64xf32> to vector<48x64xf32>
    %57 = arith.mulf %55, %56 : vector<48x64xf32>
    %58 = vector.broadcast %9 : vector<1x64xf32> to vector<48x64xf32>
    %59 = arith.addf %57, %58 : vector<48x64xf32>
    %cst_49 = arith.constant 0.000000e+00 : f32
    %60 = vector.broadcast %cst_49 : f32 to vector<48x64xf32>
    %61 = arith.maximumf %59, %60 : vector<48x64xf32>
    %cst_50 = arith.constant dense<0.000000e+00> : vector<48x64xf32>
    %62 = tpu.matmul %61, %10, %cst_50 {dimension_numbers = #tpu.dot_dimension_numbers<[1], [0], [0], [1], [0, 0, 1, 1], [], []>} : vector<48x64xf32>, vector<64x64xf32>, vector<48x64xf32> -> vector<48x64xf32>
    %63 = vector.broadcast %11 : vector<1x64xf32> to vector<48x64xf32>
    %64 = arith.addf %62, %63 : vector<48x64xf32>
    %65 = tpu.iota {dimensions = array<i32: 0>} : vector<20x48xi32>
    %66 = vector.broadcast %4 : vector<1x48xi32> to vector<20x48xi32>
    %67 = arith.cmpi eq, %66, %65 : vector<20x48xi32>
    %cst_51 = arith.constant 1.000000e+00 : f32
    %cst_52 = arith.constant 0.000000e+00 : f32
    %68 = vector.broadcast %cst_51 : f32 to vector<20x48xf32>
    %69 = vector.broadcast %cst_52 : f32 to vector<20x48xf32>
    %70 = arith.select %67, %68, %69 : vector<20x48xi1>, vector<20x48xf32>
    %cst_53 = arith.constant dense<0.000000e+00> : vector<20x64xf32>
    %71 = tpu.matmul %70, %64, %cst_53 {dimension_numbers = #tpu.dot_dimension_numbers<[1], [0], [0], [1], [0, 0, 1, 1], [], []>} : vector<20x48xf32>, vector<48x64xf32>, vector<20x64xf32> -> vector<20x64xf32>
    %cst_54 = arith.constant dense<0.000000e+00> : vector<20xf32>
    %72 = vector.multi_reduction <add>, %71, %cst_54 [1] : vector<20x64xf32> to vector<20xf32>
    %73 = vector.shape_cast %72 : vector<20xf32> to vector<20x1xf32>
    %cst_55 = arith.constant 6.400000e+01 : f32
    %74 = vector.broadcast %cst_55 : f32 to vector<20x1xf32>
    %75 = arith.divf %73, %74 : vector<20x1xf32>
    %76 = vector.broadcast %75 : vector<20x1xf32> to vector<20x64xf32>
    %77 = arith.subf %71, %76 : vector<20x64xf32>
    %78 = arith.mulf %77, %77 : vector<20x64xf32>
    %cst_56 = arith.constant dense<0.000000e+00> : vector<20xf32>
    %79 = vector.multi_reduction <add>, %78, %cst_56 [1] : vector<20x64xf32> to vector<20xf32>
    %80 = vector.shape_cast %79 : vector<20xf32> to vector<20x1xf32>
    %cst_57 = arith.constant 6.400000e+01 : f32
    %81 = vector.broadcast %cst_57 : f32 to vector<20x1xf32>
    %82 = arith.divf %80, %81 : vector<20x1xf32>
    %83 = vector.broadcast %75 : vector<20x1xf32> to vector<20x64xf32>
    %84 = arith.subf %71, %83 : vector<20x64xf32>
    %cst_58 = arith.constant 9.99999974E-6 : f32
    %85 = vector.broadcast %cst_58 : f32 to vector<20x1xf32>
    %86 = arith.addf %82, %85 : vector<20x1xf32>
    %87 = math.rsqrt %86 : vector<20x1xf32>
    %88 = vector.broadcast %87 : vector<20x1xf32> to vector<20x64xf32>
    %89 = arith.mulf %84, %88 : vector<20x64xf32>
    %90 = vector.broadcast %12 : vector<1x64xf32> to vector<20x64xf32>
    %91 = arith.mulf %89, %90 : vector<20x64xf32>
    %92 = vector.broadcast %13 : vector<1x64xf32> to vector<20x64xf32>
    %93 = arith.addf %91, %92 : vector<20x64xf32>
    %cst_59 = arith.constant dense<0.000000e+00> : vector<20x64xf32>
    %94 = tpu.matmul %93, %14, %cst_59 {dimension_numbers = #tpu.dot_dimension_numbers<[1], [0], [0], [1], [0, 0, 1, 1], [], []>} : vector<20x64xf32>, vector<64x64xf32>, vector<20x64xf32> -> vector<20x64xf32>
    %cst_60 = arith.constant dense<0.000000e+00> : vector<20x64xf32>
    %95 = tpu.matmul %1, %15, %cst_60 {dimension_numbers = #tpu.dot_dimension_numbers<[1], [0], [0], [1], [0, 0, 1, 1], [], []>} : vector<20x64xf32>, vector<64x64xf32>, vector<20x64xf32> -> vector<20x64xf32>
    %96 = arith.addf %94, %95 : vector<20x64xf32>
    %97 = vector.broadcast %16 : vector<1x64xf32> to vector<20x64xf32>
    %98 = arith.addf %96, %97 : vector<20x64xf32>
    %cst_61 = arith.constant 0.000000e+00 : f32
    %99 = vector.broadcast %cst_61 : f32 to vector<20x64xf32>
    %100 = arith.maximumf %98, %99 : vector<20x64xf32>
    %cst_62 = arith.constant dense<0.000000e+00> : vector<20x64xf32>
    %101 = tpu.matmul %100, %17, %cst_62 {dimension_numbers = #tpu.dot_dimension_numbers<[1], [0], [0], [1], [0, 0, 1, 1], [], []>} : vector<20x64xf32>, vector<64x64xf32>, vector<20x64xf32> -> vector<20x64xf32>
    %102 = vector.broadcast %18 : vector<1x64xf32> to vector<20x64xf32>
    %103 = arith.addf %101, %102 : vector<20x64xf32>
    %c0_63 = arith.constant 0 : index
    %c0_64 = arith.constant 0 : index
    %104 = vector.load %arg22[%c0_63, %c0_64] : memref<20x64xf32, #tpu.memory_space<vmem>>, vector<20x64xf32>
    tpu.vector_store %arg22[%c0_63, %c0_64], %103 {strides = array<i32>} : memref<20x64xf32, #tpu.memory_space<vmem>>, vector<20x64xf32>,
    %c0_65 = arith.constant 0 : index
    %c0_66 = arith.constant 0 : index
    %105 = vector.load %arg19[%c0_65, %c0_66] : memref<64x64xf32, #tpu.memory_space<vmem>>, vector<64x64xf32>
    %cst_67 = arith.constant dense<0.000000e+00> : vector<20x64xf32>
    %106 = tpu.matmul %103, %105, %cst_67 {dimension_numbers = #tpu.dot_dimension_numbers<[1], [0], [0], [1], [0, 0, 1, 1], [], []>} : vector<20x64xf32>, vector<64x64xf32>, vector<20x64xf32> -> vector<20x64xf32>
    %c0_68 = arith.constant 0 : index
    %c0_69 = arith.constant 0 : index
    %107 = vector.load %arg20[%c0_68, %c0_69] : memref<1x64xf32, #tpu.memory_space<vmem>>, vector<1x64xf32>
    %108 = vector.broadcast %107 : vector<1x64xf32> to vector<20x64xf32>
    %109 = arith.addf %106, %108 : vector<20x64xf32>
    %cst_70 = arith.constant 0.000000e+00 : f32
    %110 = vector.broadcast %cst_70 : f32 to vector<20x64xf32>
    %111 = arith.maximumf %109, %110 : vector<20x64xf32>
    %c0_71 = arith.constant 0 : index
    %c0_72 = arith.constant 0 : index
    %112 = vector.load %arg21[%c0_71, %c0_72] : memref<1x64xf32, #tpu.memory_space<vmem>>, vector<1x64xf32>
    %113 = vector.broadcast %112 : vector<1x64xf32> to vector<20x64xf32>
    %114 = arith.mulf %111, %113 : vector<20x64xf32>
    %cst_73 = arith.constant dense<0.000000e+00> : vector<20xf32>
    %115 = vector.multi_reduction <add>, %114, %cst_73 [1] : vector<20x64xf32> to vector<20xf32>
    %116 = vector.shape_cast %115 : vector<20xf32> to vector<20x1xf32>
    %cst_74 = arith.constant 6.000000e-01 : f32
    %117 = vector.broadcast %cst_74 : f32 to vector<20x1xf32>
    %118 = arith.divf %116, %117 : vector<20x1xf32>
    %119 = arith.negf %118 : vector<20x1xf32>
    %120 = math.exp %119 : vector<20x1xf32>
    %cst_75 = arith.constant 1.000000e+00 : f32
    %121 = vector.broadcast %cst_75 : f32 to vector<20x1xf32>
    %122 = arith.addf %121, %120 : vector<20x1xf32>
    %123 = arith.divf %121, %122 : vector<20x1xf32>
    %c0_76 = arith.constant 0 : index
    %c0_77 = arith.constant 0 : index
    %124 = vector.load %arg23[%c0_76, %c0_77] : memref<20x1xf32, #tpu.memory_space<vmem>>, vector<20x1xf32>
    tpu.vector_store %arg23[%c0_76, %c0_77], %123 {strides = array<i32>} : memref<20x1xf32, #tpu.memory_space<vmem>>, vector<20x1xf32>,
    return
  }
}

</mosaic_0001>

<bundles_post_ra>
// kernel: gnn_policy_constraint_forward.8
= control target key start
LH: loop header
LB: loop body
LE: loop exit
PB: predicated region body
PF: predicated region fallthrough
CT: control target
= control target key end

     0   :  { %vm37_vm0 = vcmask 48128   ;;  %vm44_vm1 = vcmask 44032   ;;  %vm114_vm2 = vcmask 1045504   ;;  %v642_v21 = vmov 0.0   ;;  %s829_s0 = inlined_call_operand.vmem [shape: f32[20,6], index: 0, kind: input, shape index: {}]   ;;  %s830_s3 = inlined_call_operand.vmem [shape: f32[6,64], index: 3, kind: input, shape index: {}]   ;;  %s831_s5 = inlined_call_operand.vmem [shape: f32[64,64], index: 5, kind: input, shape index: {}]   ;;  %s832_s1 = inlined_call_operand.vmem [shape: f32[1,6], index: 1, kind: input, shape index: {}]   ;;  %s833_s2 = inlined_call_operand.vmem [shape: f32[1,6], index: 2, kind: input, shape index: {}]   ;;  %s834_s4 = inlined_call_operand.vmem [shape: f32[1,64], index: 4, kind: input, shape index: {}]   ;;  %s835_s7 = inlined_call_operand.vmem [shape: f32[64,4], index: 7, kind: input, shape index: {}]   ;;  %s836_s6 = inlined_call_operand.vmem [shape: f32[1,64], index: 6, kind: input, shape index: {}]   ;;  %s837_s8 = inlined_call_operand.vmem [shape: f32[4,64], index: 8, kind: input, shape index: {}]   ;;  %s838_s9 = inlined_call_operand.vmem [shape: f32[20,64], index: 9, kind: output, shape index: {}]  }
   0x1   :  { %v32_v0 = vld [vmem:[%s829_s0] sm:$0xff]  ;;  %v34_v1 = vld [vmem:[%s829_s0 + $0x10] sm:$0xf]  ;;  %v33_v2 = vld [vmem:[%s829_s0 + $0x8] sm:$0xff]  ;;  %545 = vmatprep.subr.mxu0 %v642_v21  ;;  %vm643_vm3 = vmmov 0   ;;  %v644_v23 = vmov 0.0|0.0  }
   0x2   :  { %v38_v3 = vsel %vm37_vm0, %v32_v0, 0.0  ;;  %v45_v4 = vsel %vm44_vm1, %v34_v1, 0.0  ;;  %v41_v5 = vsel %vm37_vm0, %v33_v2, 0.0  ;;  %v97_v22 = vld [vmem:[%s830_s3] sm:$0x3f]  ;;  %547 = vmatprep.mubr.msk.f32.mxu0 %vm643_vm3, %v642_v21  ;;  %572 = vmatprep.mubr.msk.f32.mxu1 %vm643_vm3, %v642_v21  ;;  %v202_v25 = vld [vmem:[%s831_s5 + $0x8] sm:$0xff] }
   0x3   :  { %39 = vadd.xlane.f32.xlu0 %v38_v3  ;;  %46 = vadd.xlane.f32.xlu1 %v45_v4  ;;  %v201_v24 = vld [vmem:[%s831_s5] sm:$0xff]  ;;  %v203_v26 = vld [vmem:[%s831_s5 + $0x10] sm:$0xff]  ;;  %v204_v28 = vld [vmem:[%s831_s5 + $0x18] sm:$0xff]  ;;  %vm216_vm4 = vcmask 523264   ;;  %vm312_vm5 = vcmask 519168   ;;  %vm410_vm6 = vcmask 1043456  }
   0x4   :  { %546 = vmatpush3.msk.msra.mxu0 %vm114_vm2, %v97_v22  ;;  %605 = vmatprep.subr.bf16.mxu1 %v644_v23  ;;  %v606_v27 = vpack.c.bf16 %v202_v25, %v201_v24  ;;  %v609_v29 = vpack.c.bf16 %v204_v28, %v203_v26  ;;  %v205_v30 = vld [vmem:[%s831_s5 + $0x20] sm:$0xff]  ;;  %v206_v31 = vld [vmem:[%s831_s5 + $0x28] sm:$0xff]  ;;  %v207_v56 = vld [vmem:[%s831_s5 + $0x30] sm:$0xff]  ;;  %vm406_vm7 = vcmask 31744  }
   0x5   :  { %617 = vmatprep.subr.bf16.mxu0 %v644_v23  ;;  %v612_v32 = vpack.c.bf16 %v206_v31, %v205_v30  ;;  %v504_v43 = vld [vmem:[%s832_s1] ss:$0 sm:$0xff]  ;;  %v208_v57 = vld [vmem:[%s831_s5 + $0x38] sm:$0xff] }
   0x6   :  { %607 = vmatpush3.bf16.msra.mxu1 %v606_v27  ;;  %v505_v45 = vld [vmem:[%s833_s2] ss:$0 sm:$0xff]  ;;  %v615_v58 = vpack.c.bf16 %v208_v57, %v207_v56 }
   0x7   :  { %42 = vadd.xlane.f32.xlu0 %v41_v5  ;;  %608 = vmatprep.subr.bf16.mxu1 %v644_v23  ;;  %v506_v59 = vld [vmem:[%s834_s4] ss:$0 sm:$0xff] }
   0x8   :  { %v511_v22 = vld [vmem:[%s836_s6] ss:$0 sm:$0xff] }
   0xa   :  { %610 = vmatpush3.bf16.msra.mxu1 %v609_v29 }
   0xb   :  { %611 = vmatprep.subr.bf16.mxu1 %v644_v23 }
   0xe   :  { %613 = vmatpush3.bf16.msra.mxu1 %v612_v32 }
   0xf   :  { %614 = vmatprep.subr.bf16.mxu1 %v644_v23 }
  0x12   :  { %616 = vmatpush3.bf16.msra.mxu1 %v615_v58 }
  0x90   :  { %v40_v6 = vpop.xlane.xlu0 %39  ;;  %v47_v7 = vpop.xlane.xlu1 %46 }
  0x91   :  { %v49_v8 = vmul.f32 0.16666667, %v40_v6  ;;  %v51_v9 = vmul.f32 0.16666667, %v47_v7 }
  0x93   :  { %v52_v10 = vsub.f32 %v32_v0, %v49_v8  ;;  %v707_v11 = vsub.f32 %v34_v1, %v51_v9  ;;  %v323_v8 = vld [vmem:[%s835_s7] sm:$0xff]  ;;  %v324_v9 = vld [vmem:[%s835_s7 + $0x8] sm:$0xff] }
  0x94   :  { %v43_v12 = vpop.xlane.xlu0 %42 }
  0x95   :  { %v50_v13 = vmul.f32 0.16666667, %v43_v12  ;;  %v55_v14 = vmul.f32 %v52_v10, %v52_v10  ;;  %v57_v15 = vmul.f32 %v707_v11, %v707_v11  ;;  %v326_v12 = vld [vmem:[%s835_s7 + $0x18] sm:$0xff] }
  0x97   :  { %v53_v16 = vsub.f32 %v33_v2, %v50_v13  ;;  %v58_v17 = vsel %vm37_vm0, %v55_v14, 0.0  ;;  %v64_v18 = vsel %vm44_vm1, %v57_v15, 0.0  ;;  %v327_v14 = vld [vmem:[%s835_s7 + $0x20] sm:$0xff]  ;;  %v328_v15 = vld [vmem:[%s835_s7 + $0x28] sm:$0xff] }
  0x98   :  { %59 = vadd.xlane.f32.xlu1 %v58_v17  ;;  %v329_v17 = vld [vmem:[%s835_s7 + $0x30] sm:$0xff] }
  0x99   :  { %v56_v19 = vmul.f32 %v53_v16, %v53_v16 }
  0x9b   :  { %v61_v20 = vsel %vm37_vm0, %v56_v19, 0.0 }
  0x9c   :  { %65 = vadd.xlane.f32.xlu1 %v64_v18  ;;  %62 = vadd.xlane.f32.xlu0 %v61_v20  ;;  %v330_v18 = vld [vmem:[%s835_s7 + $0x38] sm:$0xff] }
  0x9d   :  { %v627_v19 = vpack.c.bf16 %v330_v18, %v329_v17 }
 0x125   :  { %v60_v33 = vpop.xlane.xlu1 %59 }
 0x126   :  { %v67_v34 = vmul.f32 0.16666667, %v60_v33 }
 0x128   :  { %v70_v35 = vadd.f32 1e-05, %v67_v34 }
 0x129   :  { %v66_v36 = vpop.xlane.xlu1 %65  ;;  %v63_v37 = vpop.xlane.xlu0 %62 }
 0x12a   :  { %632 = vrsqrt.f32 %v70_v35  ;;  %v69_v38 = vmul.f32 0.16666667, %v66_v36  ;;  %v68_v39 = vmul.f32 0.16666667, %v63_v37 }
 0x12c   :  { %v72_v40 = vadd.f32 1e-05, %v69_v38  ;;  %v71_v41 = vadd.f32 1e-05, %v68_v39 }
 0x12e   :  { %634 = vrsqrt.f32 %v72_v40 }
 0x12f   :  { %636 = vrsqrt.f32 %v71_v41 }
 0x134   :  { %v633_v42 = vpop.eup %632 }
 0x135   :  { %v76_v44 = vmul.f32 %v633_v42, %v52_v10  ;;  %v618_v10 = vpack.c.bf16 %v324_v9, %v323_v8 }
 0x137   :  { %v85_v46 = vmul.f32 %v504_v43, %v76_v44 }
 0x138   :  { %v635_v47 = vpop.eup %634 }
 0x139   :  { %v637_v48 = vpop.eup %636  ;;  %v94_v49 = vadd.f32 %v505_v45, %v85_v46  ;;  %v78_v51 = vmul.f32 %v635_v47, %v707_v11  ;;  %v325_v11 = vld [vmem:[%s835_s7 + $0x10] sm:$0xff]  ;;  %v405_v46 = vld [vmem:[%s837_s8] sm:$0xf] }
 0x13a   :  { %v77_v50 = vmul.f32 %v637_v48, %v53_v16  ;;  %v621_v13 = vpack.c.bf16 %v326_v12, %v325_v11  ;;  %v624_v16 = vpack.c.bf16 %v328_v15, %v327_v14 }
 0x13b   :  { %548 = vmatmul.mubr.msk.f32.vlgmr.msra.gmra.mrb[0].mxu0 %vm37_vm0, %v94_v49  ;;  %v87_v54 = vmul.f32 %v504_v43, %v78_v51 }
 0x13c   :  { %550 = vmatprep.mubr.msk.f32.mxu0 %vm643_vm3, %v642_v21  ;;  %v86_v52 = vmul.f32 %v504_v43, %v77_v50  ;;  %619 = vmatpush3.bf16.msra.mxu0 %v618_v10 }
 0x13d   :  { %v96_v55 = vadd.f32 %v505_v45, %v87_v54  ;;  %620 = vmatprep.subr.bf16.mxu0 %v644_v23 }
 0x13e   :  { %v95_v53 = vadd.f32 %v505_v45, %v86_v52 }
 0x140   :  { %551 = vmatmul.mubr.msk.f32.gmra.mrb[2].mxu0 %vm37_vm0, %v95_v53 }
 0x141   :  { %553 = vmatprep.mubr.msk.f32.mxu0 %vm643_vm3, %v642_v21  ;;  %622 = vmatpush3.bf16.msra.mxu0 %v621_v13 }
 0x142   :  { %623 = vmatprep.subr.bf16.mxu0 %v644_v23 }
 0x144   :  { %554 = vmatmul.mubr.msk.f32.gmra.mrb[4].mxu0 %vm37_vm0, %v96_v55  ;;  %v490_v55 = vlaneseq }
 0x145   :  { %597 = vmatprep.mubr.msk.f32.mxu0 %vm643_vm3, %v642_v21  ;;  %625 = vmatpush3.bf16.msra.mxu0 %v624_v16 }
 0x146   :  { %626 = vmatprep.subr.bf16.mxu0 %v644_v23  ;;  %v491_v56 = vshrl.u32 %v490_v55, 7 }
 0x148   :  { %v492_v57 = vsub.s32 0, %v491_v56 }
 0x149   :  { %628 = vmatpush3.bf16.msra.mxu0 %v627_v19 }
 0x14a   :  { %600 = vmatprep.subr.mxu0 %v642_v21 }
 0x20e   :  { %v184_v60 = vpop.f32.mrb[0].mxu0 }
 0x20f   :  { %v185_v61 = vadd.f32 %v506_v59, %v184_v60  ;;  %v549_v62 = vpop.f32.mrb[1].mxu0 }
 0x211   :  { %v198_v63 = vmax.f32 %v185_v61, 0.0 }
 0x213   :  { %v189_v0 = vpop.f32.mrb[2].mxu0  ;;  %573 = vmatmul.mubr.msk.f32.vlgmr.msra.gmra.mrb[0].mxu1 %vm216_vm4, %v198_v63 }
 0x214   :  { %v190_v1 = vadd.f32 %v506_v59, %v189_v0  ;;  %v552_v2 = vpop.f32.mrb[3].mxu0  ;;  %575 = vmatprep.mubr.msk.f32.mxu1 %vm643_vm3, %v642_v21 }
 0x216   :  { %v199_v3 = vmax.f32 %v190_v1, 0.0 }
 0x217   :  { %v194_v4 = vpop.f32.mrb[4].mxu0 }
 0x218   :  { %v195_v5 = vadd.f32 %v506_v59, %v194_v4  ;;  %v555_v6 = vpop.f32.mrb[5].mxu0  ;;  %576 = vmatmul.mubr.msk.f32.gmra.mrb[2].mxu1 %vm216_vm4, %v199_v3 }
 0x219   :  { %578 = vmatprep.mubr.msk.f32.mxu1 %vm643_vm3, %v642_v21 }
 0x21a   :  { %v200_v7 = vmax.f32 %v195_v5, 0.0 }
 0x21c   :  { %579 = vmatmul.mubr.msk.f32.gmra.mrb[4].mxu1 %vm216_vm4, %v200_v7 }
 0x2e6   :  { %v292_v20 = vpop.f32.mrb[0].mxu1 }
 0x2e7   :  { %v574_v24 = vpop.f32.mrb[1].mxu1  ;;  %v293_v25 = vadd.f32 %v511_v22, %v292_v20 }
 0x2e9   :  { %v306_v28 = vmax.f32 %v293_v25, 0.0 }
 0x2eb   :  { %v297_v23 = vpop.f32.mrb[2].mxu1  ;;  %v309_v34 = vsel %vm216_vm4, %v306_v28, 0.0 }
 0x2ec   :  { %v298_v26 = vadd.f32 %v511_v22, %v297_v23  ;;  %v577_v27 = vpop.f32.mrb[3].mxu1 }
 0x2ee   :  { %v307_v29 = vmax.f32 %v298_v26, 0.0 }
 0x2ef   :  { %v302_v30 = vpop.f32.mrb[4].mxu1 }
 0x2f0   :  { %v310_v31 = vsel %vm216_vm4, %v307_v29, 0.0  ;;  %v303_v32 = vadd.f32 %v511_v22, %v302_v30  ;;  %v580_v33 = vpop.f32.mrb[5].mxu1 }
 0x2f1   :  { %v311_v36 = vadd.f32 %v310_v31, %v309_v34 }
 0x2f2   :  { %v308_v35 = vmax.f32 %v303_v32, 0.0 }
 0x2f4   :  { %v313_v37 = vsel %vm312_vm5, %v308_v35, 0.0 }
 0x2f5   :  { %v314_v38 = vadd.f32 %v313_v37, %v311_v36 }
 0x2f7   :  { %v315_v39 = vrot.slane %v314_v38, 4 }
 0x2f9   :  { %v316_v40 = vadd.f32 %v315_v39, %v314_v38 }
 0x2fb   :  { %v317_v41 = vrot.slane %v316_v40, 2 }
 0x2fd   :  { %v318_v42 = vadd.f32 %v317_v41, %v316_v40 }
 0x2ff   :  { %v319_v43 = vrot.slane %v318_v42, 1 }
 0x301   :  { %v320_v44 = vadd.f32 %v319_v43, %v318_v42 }
 0x303   :  { %v322_v45 = vmul.f32 0.05, %v320_v44 }
 0x305   :  { %598 = vmatmul.mubr.msk.f32.vlgmr.msra.gmra.mrb[6].mxu0 %vm216_vm4, %v322_v45 }
 0x306   :  { %601 = vmatpush3.msk.msra.mxu0 %vm410_vm6, %v405_v46  ;;  %602 = vmatprep.mubr.msk.f32.mxu0 %vm643_vm3, %v642_v21 }
 0x3d8   :  { %v400_v47 = vpop.f32.mrb[6].mxu0 }
 0x3d9   :  { %v404_v48 = vmax.f32 %v400_v47, 0.0  ;;  %v599_v49 = vpop.f32.mrb[7].mxu0 }
 0x3db   :  { %603 = vmatmul.mubr.msk.f32.vlgmr.msra.gmra.mrb[8].mxu0 %vm406_vm7, %v404_v48 }
 0x4ae   :  { %v480_v50 = vpop.f32.mrb[8].mxu0 }
 0x4af   :  { %v518_v51 = vmul.f32 -1.442695, %v480_v50  ;;  %v604_v52 = vpop.f32.mrb[9].mxu0 }
 0x4b1   :  { %638 = vpow2.f32 %v518_v51 }
 0x4bb   :  { %v639_v53 = vpop.eup %638 }
 0x4bc   :  { %v487_v54 = vadd.f32 1.0, %v639_v53 }
 0x4be   :  { %640 = vrcp.f32 %v487_v54 }
 0x4c8   :  { %v641_v58 = vpop.eup %640 }
 0x4c9   :  { %v493_v59 = vrot.slane %v641_v58, %v492_v57 }
 0x4cb   :  { %v494_v60 = vmul.f32 %v493_v59, %v306_v28  ;;  %v495_v61 = vmul.f32 %v493_v59, %v307_v29  ;;  %v496_v21 = vmul.f32 %v493_v59, %v308_v35 }
 0x4cd   :  { %497 = vst.msk [vmem:[%s838_s9] sm:$0xff] %vm216_vm4, %v494_v60  ;;  %498 = vst.msk [vmem:[%s838_s9 + $0x8] sm:$0xff] %vm216_vm4, %v495_v61 }
 0x4ce   :  { %499 = vst.msk [vmem:[%s838_s9 + $0x10] sm:$0xf] %vm312_vm5, %v496_v21 }

// kernel: gnn_policy_constraint_forward.7
= control target key start
LH: loop header
LB: loop body
LE: loop exit
PB: predicated region body
PF: predicated region fallthrough
CT: control target
= control target key end

     0   :  { %vm36_vm0 = vcmask 31744   ;;  %vm40_vm1 = vcmask 27648   ;;  %vm95_vm2 = vcmask 1043456   ;;  %vm191_vm3 = vcmask 523264   ;;  %s734_s0 = inlined_call_operand.vmem [shape: f32[12,4], index: 0, kind: input, shape index: {}]   ;;  %s735_s3 = inlined_call_operand.vmem [shape: f32[4,64], index: 3, kind: input, shape index: {}]   ;;  %s736_s5 = inlined_call_operand.vmem [shape: f32[64,64], index: 5, kind: input, shape index: {}]   ;;  %s737_s1 = inlined_call_operand.vmem [shape: f32[1,4], index: 1, kind: input, shape index: {}]   ;;  %s738_s2 = inlined_call_operand.vmem [shape: f32[1,4], index: 2, kind: input, shape index: {}]   ;;  %s739_s4 = inlined_call_operand.vmem [shape: f32[1,64], index: 4, kind: input, shape index: {}]   ;;  %s740_s7 = inlined_call_operand.vmem [shape: f32[64,4], index: 7, kind: input, shape index: {}]   ;;  %s741_s8 = inlined_call_operand.vmem [shape: f32[4,64], index: 8, kind: input, shape index: {}]   ;;  %s742_s6 = inlined_call_operand.vmem [shape: f32[1,64], index: 6, kind: input, shape index: {}]   ;;  %s743_s9 = inlined_call_operand.vmem [shape: f32[12,64], index: 9, kind: output, shape index: {}]  }
   0x1   :  { %v32_v0 = vld [vmem:[%s734_s0] sm:$0xff]  ;;  %v33_v1 = vld [vmem:[%s734_s0 + $0x8] sm:$0xf]  ;;  %v178_v17 = vld [vmem:[%s736_s5 + $0x10] sm:$0xff]  ;;  %v588_v53 = vmov 0.0|0.0   ;;  %vm589_vm4 = vmmov 0  }
   0x2   :  { %v37_v2 = vsel %vm36_vm0, %v32_v0, 0.0  ;;  %v41_v3 = vsel %vm40_vm1, %v33_v1, 0.0  ;;  %v81_v14 = vld [vmem:[%s735_s3] sm:$0xf]  ;;  %v177_v16 = vld [vmem:[%s736_s5 + $0x8] sm:$0xff]  ;;  %v179_v19 = vld [vmem:[%s736_s5 + $0x18] sm:$0xff] }
   0x3   :  { %38 = vadd.xlane.f32.xlu0 %v37_v2  ;;  %501 = vmatprep.subr.msk.mxu0 %vm95_vm2, %v81_v14  ;;  %v176_v15 = vld [vmem:[%s736_s5] sm:$0xff]  ;;  %v553_v20 = vpack.c.bf16 %v179_v19, %v178_v17  ;;  %v181_v22 = vld [vmem:[%s736_s5 + $0x28] sm:$0xff]  ;;  %v182_v40 = vld [vmem:[%s736_s5 + $0x30] sm:$0xff]  ;;  %v590_v63 = vmov 0.0   ;;  %vm276_vm5 = vcmask 519168  }
   0x4   :  { %502 = vmatpush3.msk.msra.mxu0 %vm95_vm2, %v81_v14  ;;  %v549_v18 = vpack.c.bf16 %v177_v16, %v176_v15  ;;  %v180_v21 = vld [vmem:[%s736_s5 + $0x20] sm:$0xff]  ;;  %v183_v41 = vld [vmem:[%s736_s5 + $0x38] sm:$0xff]  ;;  %v288_v51 = vld [vmem:[%s740_s7 + $0x8] sm:$0xff] }
   0x5   :  { %v557_v23 = vpack.c.bf16 %v181_v22, %v180_v21  ;;  %v464_v31 = vld [vmem:[%s737_s1] ss:$0 sm:$0xff]  ;;  %v561_v42 = vpack.c.bf16 %v183_v41, %v182_v40  ;;  %565 = vmatprep.subr.bf16.mxu0 %v588_v53  ;;  %v289_v54 = vld [vmem:[%s740_s7 + $0x10] sm:$0xff]  ;;  %v290_v55 = vld [vmem:[%s740_s7 + $0x18] sm:$0xff] }
   0x6   :  { %550 = vmatprep.subr.bf16.mxu1 %v549_v18  ;;  %v465_v33 = vld [vmem:[%s738_s2] ss:$0 sm:$0xff]  ;;  %v569_v56 = vpack.c.bf16 %v290_v55, %v289_v54  ;;  %v292_v58 = vld [vmem:[%s740_s7 + $0x28] sm:$0xff]  ;;  %v293_v60 = vld [vmem:[%s740_s7 + $0x30] sm:$0xff] }
   0x7   :  { %42 = vadd.xlane.f32.xlu0 %v41_v3  ;;  %552 = vmatpush3.bf16.msra.mxu1 %v549_v18  ;;  %v466_v43 = vld [vmem:[%s739_s4] ss:$0 sm:$0xff]  ;;  %v294_v61 = vld [vmem:[%s740_s7 + $0x38] sm:$0xff] }
   0x8   :  { %554 = vmatprep.subr.bf16.mxu1 %v553_v20  ;;  %v287_v50 = vld [vmem:[%s740_s7] sm:$0xff]  ;;  %v575_v62 = vpack.c.bf16 %v294_v61, %v293_v60 }
   0x9   :  { %v566_v52 = vpack.c.bf16 %v288_v51, %v287_v50  ;;  %v291_v57 = vld [vmem:[%s740_s7 + $0x20] sm:$0xff] }
   0xa   :  { %v572_v59 = vpack.c.bf16 %v292_v58, %v291_v57 }
   0xb   :  { %556 = vmatpush3.bf16.msra.mxu1 %v553_v20 }
   0xc   :  { %558 = vmatprep.subr.bf16.mxu1 %v557_v23 }
   0xf   :  { %560 = vmatpush3.bf16.msra.mxu1 %v557_v23 }
  0x10   :  { %562 = vmatprep.subr.bf16.mxu1 %v561_v42 }
  0x13   :  { %564 = vmatpush3.bf16.msra.mxu1 %v561_v42 }
  0x14   :  { %544 = vmatprep.subr.mxu1 %v590_v63 }
  0x90   :  { %v39_v4 = vpop.xlane.xlu0 %38 }
  0x91   :  { %v45_v5 = vmul.f32 0.25, %v39_v4 }
  0x93   :  { %v47_v6 = vsub.f32 %v32_v0, %v45_v5  ;;  %v369_v0 = vld [vmem:[%s741_s8] sm:$0xf] }
  0x94   :  { %v43_v7 = vpop.xlane.xlu0 %42 }
  0x95   :  { %v46_v8 = vmul.f32 0.25, %v43_v7  ;;  %v49_v9 = vmul.f32 %v47_v6, %v47_v6 }
  0x97   :  { %v48_v10 = vsub.f32 %v33_v1, %v46_v8  ;;  %v51_v11 = vsel %vm36_vm0, %v49_v9, 0.0  ;;  %v470_v1 = vld [vmem:[%s742_s6] ss:$0 sm:$0xff] }
  0x98   :  { %52 = vadd.xlane.f32.xlu1 %v51_v11 }
  0x99   :  { %v50_v12 = vmul.f32 %v48_v10, %v48_v10 }
  0x9b   :  { %v54_v13 = vsel %vm40_vm1, %v50_v12, 0.0 }
  0x9c   :  { %55 = vadd.xlane.f32.xlu1 %v54_v13 }
 0x125   :  { %v53_v24 = vpop.xlane.xlu1 %52 }
 0x126   :  { %v57_v25 = vmul.f32 0.25, %v53_v24 }
 0x128   :  { %v59_v26 = vadd.f32 1e-05, %v57_v25 }
 0x129   :  { %v56_v27 = vpop.xlane.xlu1 %55 }
 0x12a   :  { %580 = vrsqrt.f32 %v59_v26  ;;  %v58_v28 = vmul.f32 0.25, %v56_v27  ;;  %v452_v26 = vlaneseq }
 0x12c   :  { %v60_v29 = vadd.f32 1e-05, %v58_v28  ;;  %v453_v27 = vshrl.u32 %v452_v26, 7 }
 0x12e   :  { %582 = vrsqrt.f32 %v60_v29  ;;  %v454_v28 = vsub.s32 0, %v453_v27 }
 0x134   :  { %v581_v30 = vpop.eup %580 }
 0x135   :  { %v63_v32 = vmul.f32 %v581_v30, %v47_v6 }
 0x137   :  { %v71_v34 = vmul.f32 %v464_v31, %v63_v32 }
 0x138   :  { %v583_v35 = vpop.eup %582 }
 0x139   :  { %v64_v36 = vmul.f32 %v583_v35, %v48_v10  ;;  %v79_v37 = vadd.f32 %v465_v33, %v71_v34 }
 0x13b   :  { %v72_v38 = vmul.f32 %v464_v31, %v64_v36  ;;  %503 = vmatprep.mubr.msk.f32.mxu0 %vm36_vm0, %v79_v37 }
 0x13d   :  { %v80_v39 = vadd.f32 %v465_v33, %v72_v38 }
 0x13f   :  { %504 = vmatmul.mubr.msk.f32.vlgmr.msra.gmra.mrb[0].mxu0 %vm36_vm0, %v80_v39 }
 0x140   :  { %567 = vmatpush3.bf16.msra.mxu0 %v566_v52  ;;  %541 = vmatprep.mubr.msk.f32.mxu0 %vm589_vm4, %v590_v63 }
 0x141   :  { %568 = vmatprep.subr.bf16.mxu0 %v588_v53 }
 0x144   :  { %570 = vmatpush3.bf16.msra.mxu0 %v569_v56 }
 0x145   :  { %571 = vmatprep.subr.bf16.mxu0 %v588_v53 }
 0x148   :  { %573 = vmatpush3.bf16.msra.mxu0 %v572_v59 }
 0x149   :  { %574 = vmatprep.subr.bf16.mxu0 %v588_v53 }
 0x14c   :  { %576 = vmatpush3.bf16.msra.mxu0 %v575_v62 }
 0x212   :  { %v505_v44 = vpop.f32.mrb[0].mxu0 }
 0x213   :  { %v171_v45 = vadd.f32 %v505_v44, %v466_v43  ;;  %v165_v46 = vpop.f32.mrb[1].mxu0 }
 0x214   :  { %v166_v47 = vadd.f32 %v466_v43, %v165_v46 }
 0x215   :  { %v175_v49 = vmax.f32 %v171_v45, 0.0 }
 0x216   :  { %v174_v48 = vmax.f32 %v166_v47, 0.0 }
 0x218   :  { %522 = vmatprep.mubr.msk.f32.mxu1 %vm191_vm3, %v174_v48 }
 0x219   :  { %523 = vmatmul.mubr.msk.f32.vlgmr.msra.gmra.mrb[0].mxu1 %vm191_vm3, %v175_v49 }
 0x21a   :  { %546 = vmatprep.mubr.msk.f32.mxu1 %vm589_vm4, %v590_v63  ;;  %545 = vmatpush3.msk.msra.mxu1 %vm95_vm2, %v369_v0 }
 0x2ec   :  { %v524_v2 = vpop.f32.mrb[0].mxu1 }
 0x2ed   :  { %v270_v3 = vadd.f32 %v524_v2, %v470_v1  ;;  %v264_v4 = vpop.f32.mrb[1].mxu1 }
 0x2ee   :  { %v265_v5 = vadd.f32 %v470_v1, %v264_v4 }
 0x2ef   :  { %v274_v6 = vmax.f32 %v270_v3, 0.0 }
 0x2f0   :  { %v273_v7 = vmax.f32 %v265_v5, 0.0 }
 0x2f1   :  { %v277_v8 = vsel %vm276_vm5, %v274_v6, 0.0 }
 0x2f2   :  { %v275_v9 = vsel %vm191_vm3, %v273_v7, 0.0 }
 0x2f3   :  { %v278_v10 = vadd.f32 %v277_v8, %v275_v9 }
 0x2f5   :  { %v279_v11 = vrot.slane %v278_v10, 4 }
 0x2f7   :  { %v280_v12 = vadd.f32 %v279_v11, %v278_v10 }
 0x2f9   :  { %v281_v13 = vrot.slane %v280_v12, 2 }
 0x2fb   :  { %v282_v14 = vadd.f32 %v281_v13, %v280_v12 }
 0x2fd   :  { %v283_v15 = vrot.slane %v282_v14, 1 }
 0x2ff   :  { %v284_v16 = vadd.f32 %v283_v15, %v282_v14 }
 0x301   :  { %v286_v17 = vmul.f32 0.083333336, %v284_v16 }
 0x303   :  { %542 = vmatmul.mubr.msk.f32.vlgmr.msra.gmra.mrb[2].mxu0 %vm191_vm3, %v286_v17 }
 0x3d6   :  { %v364_v18 = vpop.f32.mrb[2].mxu0 }
 0x3d7   :  { %v368_v19 = vmax.f32 %v364_v18, 0.0  ;;  %v543_v20 = vpop.f32.mrb[3].mxu0 }
 0x3d9   :  { %547 = vmatmul.mubr.msk.f32.vlgmr.msra.gmra.mrb[2].mxu1 %vm36_vm0, %v368_v19 }
 0x4ac   :  { %v442_v21 = vpop.f32.mrb[2].mxu1 }
 0x4ad   :  { %v476_v22 = vmul.f32 -1.442695, %v442_v21  ;;  %v548_v23 = vpop.f32.mrb[3].mxu1 }
 0x4af   :  { %584 = vpow2.f32 %v476_v22 }
 0x4b9   :  { %v585_v24 = vpop.eup %584 }
 0x4ba   :  { %v449_v25 = vadd.f32 1.0, %v585_v24 }
 0x4bc   :  { %586 = vrcp.f32 %v449_v25 }
 0x4c6   :  { %v587_v29 = vpop.eup %586 }
 0x4c7   :  { %v455_v30 = vrot.slane %v587_v29, %v454_v28 }
 0x4c9   :  { %v456_v31 = vmul.f32 %v455_v30, %v273_v7  ;;  %v457_v32 = vmul.f32 %v455_v30, %v274_v6 }
 0x4cb   :  { %458 = vst.msk [vmem:[%s743_s9] sm:$0xff] %vm191_vm3, %v456_v31 }
 0x4cc   :  { %459 = vst.msk [vmem:[%s743_s9 + $0x8] sm:$0xf] %vm276_vm5, %v457_v32 }

// kernel: gnn_policy_constraint_forward.10
= control target key start
LH: loop header
LB: loop body
LE: loop exit
PB: predicated region body
PF: predicated region fallthrough
CT: control target
= control target key end

     0   :  { %v1679_v0 = vmov 0.0|0.0   ;;  %vm1680_vm0 = vmmov 0   ;;  %v1681_v4 = vmov 0.0   ;;  %v1682_v9 = vmov 0   ;;  %s2146_s7 = inlined_call_operand.vmem [shape: f32[64,64], index: 7, kind: input, shape index: {}]   ;;  %s2147_s5 = inlined_call_operand.vmem [shape: f32[64,64], index: 5, kind: input, shape index: {}]   ;;  %s2148_s1 = inlined_call_operand.vmem [shape: f32[12,64], index: 1, kind: input, shape index: {}]   ;;  %s2149_s2 = inlined_call_operand.vmem [shape: s32[48,1], index: 2, kind: input, shape index: {}]   ;;  %s2150_s0 = inlined_call_operand.vmem [shape: f32[20,64], index: 0, kind: input, shape index: {}]   ;;  %s2151_s3 = inlined_call_operand.vmem [shape: s32[48,1], index: 3, kind: input, shape index: {}]   ;;  %s2152_s6 = inlined_call_operand.vmem [shape: f32[1,64], index: 6, kind: input, shape index: {}]   ;;  %s2153_s10 = inlined_call_operand.vmem [shape: f32[64,64], index: 10, kind: input, shape index: {}]   ;;  %s2154_s8 = inlined_call_operand.vmem [shape: f32[1,64], index: 8, kind: input, shape index: {}, may-alias: {8,12}]   ;;  %s2155_s9 = inlined_call_operand.vmem [shape: f32[1,64], index: 9, kind: input, shape index: {}, may-alias: {9,13}]   ;;  %s2156_s4 = inlined_call_operand.vmem [shape: s32[1,48], index: 4, kind: input, shape index: {}]   ;;  %s2157_s11 = inlined_call_operand.vmem [shape: f32[1,64], index: 11, kind: input, shape index: {}]   ;;  %s2158_s15 = inlined_call_operand.vmem [shape: f32[64,64], index: 15, kind: input, shape index: {}]   ;;  %s2159_s14 = inlined_call_operand.vmem [shape: f32[64,64], index: 14, kind: input, shape index: {}]   ;;  %s2160_s17 = inlined_call_operand.vmem [shape: f32[64,64], index: 17, kind: input, shape index: {}]   ;;  %s2161_s12 = inlined_call_operand.vmem [shape: f32[1,64], index: 12, kind: input, shape index: {}, may-alias: {8,12}]   ;;  %s2162_s13 = inlined_call_operand.vmem [shape: f32[1,64], index: 13, kind: input, shape index: {}, may-alias: {9,13}]   ;;  %s2163_s16 = inlined_call_operand.vmem [shape: f32[1,64], index: 16, kind: input, shape index: {}]   ;;  %s2164_s18 = inlined_call_operand.vmem [shape: f32[1,64], index: 18, kind: input, shape index: {}]   ;;  %s2165_s19 = inlined_call_operand.vmem [shape: f32[12,64], index: 19, kind: output, shape index: {}]  }
   0x1   :  { %2170 = sst [smem:[#allocation2_spill]] %s2146_s7  ;;  %1534 = vmatprep.subr.bf16.mxu0 %v1679_v0  ;;  %1381 = vmatprep.mubr.msk.f32.mxu0 %vm1680_vm0, %v1681_v4  ;;  %vm136_vm1 = vcmask 523264   ;;  %v62_v34 = vld [vmem:[%s2150_s0] sm:$0xff]  ;;  %v74_v37 = vld [vmem:[%s2151_s3 + $0x8] sm:$0xff]  ;;  %v75_v39 = vld [vmem:[%s2151_s3 + $0x10] sm:$0xff]  ;;  %v313_v44 = vlaneseq  ;;  %vm375_vm2 = vcmask 162816  }
   0x2   :  { %2171 = sst [smem:[#allocation3_spill]] %s2147_s5  ;;  %s2174_s20 = sld [smem:[#allocation2_spill]]  ;;  %1661 = vset.pattern.permute.xlu0 %v1682_v9  ;;  %1662 = vset.pattern.permute.xlu1 %v1682_v9  ;;  %v73_v36 = vld [vmem:[%s2151_s3] sm:$0xff]  ;;  %v63_v38 = vld [vmem:[%s2150_s0 + $0x8] sm:$0xff]  ;;  %v76_v40 = vld [vmem:[%s2151_s3 + $0x18] sm:$0xff]  ;;  %vm394_vm4 = vcmask 1043456  }
   0x3   :  { %2172 = sst [smem:[#allocation4_spill]] %s2148_s1  ;;  %s2175_s26 = sld [smem:[#allocation3_spill]]  ;;  %v64_v41 = vld [vmem:[%s2150_s0 + $0x10] sm:$0xf]  ;;  %v77_v42 = vld [vmem:[%s2151_s3 + $0x20] sm:$0xff]  ;;  %v78_v43 = vld [vmem:[%s2151_s3 + $0x28] sm:$0xff] }
   0x4   :  { %2173 = sst [smem:[#allocation5_spill]] %s2149_s2  ;;  %s2176_s21 = sld [smem:[#allocation4_spill]]  ;;  %v1901_v45 = vand.u32 127, %v313_v44  ;;  %v1236_v51 = vld [vmem:[%s2152_s6] ss:$0 sm:$0xff]  ;;  %vm1683_vm7 = vmmov 1  }
   0x5   :  { %s2177_s24 = sld [smem:[#allocation5_spill]]  ;;  %vm1567_vm8 = vmpackc.low %vm394_vm4, %vm1683_vm7  ;;  %vm493_vm13 = vcmask 97280   ;;  %vm934_vm7 = vcmask 519168  }
   0x8   :  { %v89_v1 = vld [vmem:[%s2174_s20] sm:$0xff]  ;;  %v90_v2 = vld [vmem:[%s2174_s20 + $0x8] sm:$0xff]  ;;  %v91_v3 = vld [vmem:[%s2174_s20 + $0x10] sm:$0xff] }
   0x9   :  { %v1535_v5 = vpack.c.bf16 %v90_v2, %v89_v1  ;;  %v92_v6 = vld [vmem:[%s2174_s20 + $0x18] sm:$0xff]  ;;  %v80_v7 = vld [vmem:[%s2175_s26] sm:$0xff]  ;;  %v81_v8 = vld [vmem:[%s2175_s26 + $0x8] sm:$0xff] }
   0xa   :  { %v1546_v10 = vpack.c.bf16 %v81_v8, %v80_v7  ;;  %v82_v11 = vld [vmem:[%s2175_s26 + $0x10] sm:$0xff]  ;;  %v1538_v12 = vpack.c.bf16 %v92_v6, %v91_v3  ;;  %v93_v13 = vld [vmem:[%s2174_s20 + $0x20] sm:$0xff]  ;;  %v83_v14 = vld [vmem:[%s2175_s26 + $0x18] sm:$0xff] }
   0xb   :  { %1536 = vmatpush3.bf16.msra.mxu0 %v1535_v5  ;;  %v94_v15 = vld [vmem:[%s2174_s20 + $0x28] sm:$0xff]  ;;  %v1550_v16 = vpack.c.bf16 %v83_v14, %v82_v11  ;;  %v84_v17 = vld [vmem:[%s2175_s26 + $0x20] sm:$0xff]  ;;  %v86_v20 = vld [vmem:[%s2175_s26 + $0x30] sm:$0xff] }
   0xc   :  { %1537 = vmatprep.subr.bf16.mxu0 %v1679_v0  ;;  %1547 = vmatprep.subr.bf16.mxu1 %v1546_v10  ;;  %v85_v18 = vld [vmem:[%s2175_s26 + $0x28] sm:$0xff]  ;;  %v1828_v21 = vld [vmem:[%s2176_s21] sm:$0xff]  ;;  %v1541_v22 = vpack.c.bf16 %v94_v15, %v93_v13  ;;  %v87_v23 = vld [vmem:[%s2175_s26 + $0x38] sm:$0xff] }
   0xd   :  { %1549 = vmatpush3.bf16.msra.mxu1 %v1546_v10  ;;  %v1554_v19 = vpack.c.bf16 %v85_v18, %v84_v17  ;;  %1406 = vmatprep.mubr.msk.f32.mxu1 %vm136_vm1, %v1828_v21  ;;  %v67_v24 = vld [vmem:[%s2177_s24] sm:$0xff]  ;;  %v69_v25 = vld [vmem:[%s2177_s24 + $0x10] sm:$0xff]  ;;  %v96_v27 = vld [vmem:[%s2174_s20 + $0x38] sm:$0xff]  ;;  %v1558_v29 = vpack.c.bf16 %v87_v23, %v86_v20 }
   0xe   :  { %1551 = vmatprep.subr.bf16.mxu1 %v1550_v16  ;;  %v95_v26 = vld [vmem:[%s2174_s20 + $0x30] sm:$0xff]  ;;  %316 = vperm.xlu0 %1661, %v67_v24   ;;  %v68_v28 = vld [vmem:[%s2177_s24 + $0x8] sm:$0xff]  ;;  %v70_v30 = vld [vmem:[%s2177_s24 + $0x18] sm:$0xff] }
   0xf   :  { %1539 = vmatpush3.bf16.msra.mxu0 %v1538_v12  ;;  %322 = vperm.xlu1 %1662, %v69_v25   ;;  %v1544_v31 = vpack.c.bf16 %v96_v27, %v95_v26  ;;  %v71_v32 = vld [vmem:[%s2177_s24 + $0x20] sm:$0xff]  ;;  %v72_v33 = vld [vmem:[%s2177_s24 + $0x28] sm:$0xff] }
  0x10   :  { %1540 = vmatprep.subr.bf16.mxu0 %v1679_v0  ;;  %v1865_v35 = vld [vmem:[%s2176_s21 + $0x8] sm:$0xf] }
  0x11   :  { %1553 = vmatpush3.bf16.msra.mxu1 %v1550_v16 }
  0x12   :  { %1555 = vmatprep.subr.bf16.mxu1 %v1554_v19  ;;  %319 = vperm.xlu0 %1661, %v68_v28  }
  0x13   :  { %1542 = vmatpush3.bf16.msra.mxu0 %v1541_v22  ;;  %325 = vperm.xlu1 %1662, %v70_v30  }
  0x14   :  { %1543 = vmatprep.subr.bf16.mxu0 %v1679_v0 }
  0x15   :  { %1557 = vmatpush3.bf16.msra.mxu1 %v1554_v19 }
  0x16   :  { %1559 = vmatprep.subr.bf16.mxu1 %v1558_v29  ;;  %328 = vperm.xlu0 %1661, %v71_v32  }
  0x17   :  { %1545 = vmatpush3.bf16.msra.mxu0 %v1544_v31  ;;  %331 = vperm.xlu1 %1662, %v72_v33  }
  0x19   :  { %1561 = vmatpush3.bf16.msra.mxu1 %v1558_v29 }
  0x1a   :  { %1382 = vmatmul.mubr.msk.f32.vlgmr.msra.gmra.mrb[0].mxu0 %vm136_vm1, %v62_v34  ;;  %346 = vperm.xlu0 %1661, %v73_v36  }
  0x1b   :  { %1384 = vmatprep.mubr.msk.f32.mxu0 %vm1680_vm0, %v1681_v4  ;;  %349 = vperm.xlu1 %1662, %v74_v37  }
  0x1c   :  { %1407 = vmatmul.mubr.msk.f32.vlgmr.msra.gmra.mrb[0].mxu1 %vm136_vm1, %v1865_v35 }
  0x1e   :  { %1385 = vmatmul.mubr.msk.f32.gmra.mrb[2].mxu0 %vm136_vm1, %v63_v38  ;;  %352 = vperm.xlu0 %1661, %v75_v39  }
  0x1f   :  { %1387 = vmatprep.mubr.msk.f32.mxu0 %vm1680_vm0, %v1681_v4  ;;  %355 = vperm.xlu1 %1662, %v76_v40  }
  0x22   :  { %1388 = vmatmul.mubr.msk.f32.gmra.mrb[4].mxu0 %vm136_vm1, %v64_v41  ;;  %358 = vperm.xlu0 %1661, %v77_v42  }
  0x23   :  { %361 = vperm.xlu1 %1662, %v78_v43  }
  0x8d   :  { %v317_v46 = vpop.permute.xlu0 %316 }
  0x8e   :  { %vm333_vm3 = vcmp.eq.s32.totalorder %v317_v46, %v1901_v45  ;;  %v323_v48 = vpop.permute.xlu1 %322 }
  0x8f   :  { %v339_v47 = vsel %vm333_vm3, 1.0, %v1681_v4  ;;  %vm335_vm5 = vcmp.eq.s32.totalorder %v323_v48, %v1901_v45 }
  0x90   :  { %1415 = vmatprep.mubr.msk.f32.mxu1 %vm375_vm2, %v339_v47  ;;  %v341_v2 = vsel %vm335_vm5, 1.0, %v1681_v4 }
  0x91   :  { %v320_v49 = vpop.permute.xlu0 %319 }
  0x92   :  { %v326_v53 = vpop.permute.xlu1 %325  ;;  %vm334_vm6 = vcmp.eq.s32.totalorder %v320_v49, %v1901_v45 }
  0x93   :  { %v340_v5 = vsel %vm334_vm6, 1.0, %v1681_v4  ;;  %vm336_vm9 = vcmp.eq.s32.totalorder %v326_v53, %v1901_v45 }
  0x94   :  { %v342_v7 = vsel %vm336_vm9, 1.0, %v1681_v4 }
  0x95   :  { %v329_v59 = vpop.permute.xlu0 %328 }
  0x96   :  { %v332_v63 = vpop.permute.xlu1 %331  ;;  %vm337_vm10 = vcmp.eq.s32.totalorder %v329_v59, %v1901_v45 }
  0x97   :  { %v343_v8 = vsel %vm337_vm10, 1.0, %v1681_v4  ;;  %vm338_vm11 = vcmp.eq.s32.totalorder %v332_v63, %v1901_v45 }
  0x98   :  { %v344_v10 = vsel %vm338_vm11, 1.0, %v1681_v4 }
  0x99   :  { %v347_v3 = vpop.permute.xlu0 %346 }
  0x9a   :  { %v350_v6 = vpop.permute.xlu1 %349  ;;  %vm363_vm12 = vcmp.eq.s32.totalorder %v347_v3, %v1901_v45  ;;  %v101_v3 = vld [vmem:[%s2153_s10 + $0x10] sm:$0xff] }
  0x9b   :  { %v369_v12 = vsel %vm363_vm12, 1.0, %v1681_v4  ;;  %vm364_vm14 = vcmp.eq.s32.totalorder %v350_v6, %v1901_v45 }
  0x9c   :  { %v370_v14 = vsel %vm364_vm14, 1.0, %v1681_v4 }
  0x9d   :  { %v353_v9 = vpop.permute.xlu0 %352 }
  0x9e   :  { %v356_v11 = vpop.permute.xlu1 %355  ;;  %vm365_vm15 = vcmp.eq.s32.totalorder %v353_v9, %v1901_v45 }
  0x9f   :  { %v371_v15 = vsel %vm365_vm15, 1.0, %v1681_v4  ;;  %vm366_vm0 = vcmp.eq.s32.totalorder %v356_v11, %v1901_v45  ;;  %v106_v11 = vld [vmem:[%s2153_s10 + $0x38] sm:$0xff] }
  0xa0   :  { %v372_v17 = vsel %vm366_vm0, 1.0, %v1681_v4 }
  0xa1   :  { %v359_v13 = vpop.permute.xlu0 %358 }
  0xa2   :  { %vm367_vm3 = vcmp.eq.s32.totalorder %v359_v13, %v1901_v45  ;;  %v362_v16 = vpop.permute.xlu1 %361 }
  0xa3   :  { %v373_v18 = vsel %vm367_vm3, 1.0, %v1681_v4 }
  0xed   :  { %v212_v50 = vpop.f32.mrb[0].mxu0 }
  0xee   :  { %v1383_v52 = vpop.f32.mrb[1].mxu0 }
  0xef   :  { %v1408_v54 = vpop.f32.mrb[0].mxu1 }
  0xf0   :  { %v310_v55 = vadd.f32 %v1408_v54, %v1236_v51  ;;  %v304_v56 = vpop.f32.mrb[1].mxu1 }
  0xf1   :  { %v217_v57 = vpop.f32.mrb[2].mxu0  ;;  %v305_v58 = vadd.f32 %v1236_v51, %v304_v56 }
  0xf2   :  { %v1562_v60 = vpack.c.bf16 %v217_v57, %v212_v50  ;;  %v1386_v61 = vpop.f32.mrb[3].mxu0 }
  0xf3   :  { %v1566_v62 = vpack.c.bf16 %v310_v55, %v305_v58 }
  0xf4   :  { %1563 = vmatprep.subr.bf16.mxu1 %v1562_v60 }
  0xf5   :  { %1565 = vmatpush3.bf16.msra.mxu1 %v1562_v60  ;;  %v222_v0 = vpop.f32.mrb[4].mxu0 }
  0xf6   :  { %v1389_v1 = vpop.f32.mrb[5].mxu0  ;;  %1413 = vmatprep.subr.msk.mxu1 %vm394_vm4, %v222_v0 }
  0xf7   :  { %v100_v1 = vld [vmem:[%s2153_s10 + $0x8] sm:$0xff] }
  0xf9   :  { %1414 = vmatpush3.msk.msra.mxu1 %vm394_vm4, %v222_v0  ;;  %v99_v0 = vld [vmem:[%s2153_s10] sm:$0xff]  ;;  %vm849_vm4 = vcmask 392192  }
  0xfa   :  { %1416 = vmatmul.mubr.msk.f32.vlgmr.msra.gmra.mrb[2].mxu1 %vm375_vm2, %v340_v5  ;;  %1568 = vmatprep.subr.msk.bf16.mxu1 %vm1567_vm8, %v1566_v62  ;;  %v102_v5 = vld [vmem:[%s2153_s10 + $0x18] sm:$0xff] }
  0xfb   :  { %1418 = vmatprep.mubr.msk.f32.mxu1 %vm375_vm2, %v341_v2  ;;  %1571 = vmatpush3.bf16.msk.msra.mxu1 %vm1567_vm8, %v1566_v62  ;;  %v1572_v2 = vpack.c.bf16 %v100_v1, %v99_v0  ;;  %v1576_v6 = vpack.c.bf16 %v102_v5, %v101_v3  ;;  %v1262_v3 = vld [vmem:[%s2156_s4] ss:$0 sm:$0xff] }
  0xfd   :  { %1573 = vmatprep.subr.bf16.mxu0 %v1572_v2 }
  0xfe   :  { %1419 = vmatmul.mubr.msk.f32.gmra.mrb[4].mxu1 %vm375_vm2, %v342_v7  ;;  %1575 = vmatpush3.bf16.msra.mxu0 %v1572_v2  ;;  %v103_v7 = vld [vmem:[%s2153_s10 + $0x20] sm:$0xff] }
  0xff   :  { %1421 = vmatprep.mubr.msk.f32.mxu1 %vm375_vm2, %v343_v8  ;;  %1577 = vmatprep.subr.bf16.mxu0 %v1576_v6  ;;  %v104_v8 = vld [vmem:[%s2153_s10 + $0x28] sm:$0xff] }
 0x100   :  { %v1580_v9 = vpack.c.bf16 %v104_v8, %v103_v7 }
 0x102   :  { %1422 = vmatmul.mubr.msk.f32.gmra.mrb[6].mxu1 %vm375_vm2, %v344_v10  ;;  %vm368_vm2 = vcmp.eq.s32.totalorder %v362_v16, %v1901_v45  ;;  %1579 = vmatpush3.bf16.msra.mxu0 %v1576_v6  ;;  %v105_v10 = vld [vmem:[%s2153_s10 + $0x30] sm:$0xff]  ;;  %v1255_v6 = vld [vmem:[%s2157_s11] ss:$0 sm:$0xff] }
 0x103   :  { %1428 = vmatprep.mubr.msk.f32.mxu1 %vm493_vm13, %v369_v12  ;;  %v374_v19 = vsel %vm368_vm2, 1.0, %v1681_v4  ;;  %1581 = vmatprep.subr.bf16.mxu0 %v1580_v9  ;;  %v1584_v12 = vpack.c.bf16 %v106_v11, %v105_v10 }
 0x106   :  { %1429 = vmatmul.mubr.msk.f32.vlgmr.msra.gmra.mrb[2].mxu1 %vm493_vm13, %v370_v14  ;;  %1583 = vmatpush3.bf16.msra.mxu0 %v1580_v9 }
 0x107   :  { %1431 = vmatprep.mubr.msk.f32.mxu1 %vm493_vm13, %v371_v15  ;;  %1585 = vmatprep.subr.bf16.mxu0 %v1584_v12 }
 0x10a   :  { %1432 = vmatmul.mubr.msk.f32.gmra.mrb[4].mxu1 %vm493_vm13, %v372_v17  ;;  %1587 = vmatpush3.bf16.msra.mxu0 %v1584_v12 }
 0x10b   :  { %1434 = vmatprep.mubr.msk.f32.mxu1 %vm493_vm13, %v373_v18 }
 0x10e   :  { %1435 = vmatmul.mubr.msk.f32.gmra.mrb[6].mxu1 %vm493_vm13, %v374_v19 }
 0x10f   :  { %1493 = vmatprep.mubr.msk.f32.mxu1 %vm136_vm1, %v1828_v21 }
 0x1d9   :  { %v1430_v20 = vpop.f32.mrb[2].mxu1 }
 0x1da   :  { %v581_v22 = vpop.f32.mrb[3].mxu1  ;;  %v613_v23 = vsel %vm136_vm1, %v1430_v20, 0.0 }
 0x1db   :  { %614 = vadd.xlane.f32.xlu1 %v613_v23  ;;  %v610_v24 = vsel %vm136_vm1, %v581_v22, 0.0 }
 0x1dc   :  { %611 = vadd.xlane.f32.xlu0 %v610_v24 }
 0x1dd   :  { %v1433_v25 = vpop.f32.mrb[4].mxu1 }
 0x1de   :  { %v591_v26 = vpop.f32.mrb[5].mxu1  ;;  %v619_v30 = vsel %vm136_vm1, %v1433_v25, 0.0 }
 0x1df   :  { %v616_v27 = vsel %vm136_vm1, %v591_v26, 0.0 }
 0x1e0   :  { %617 = vadd.xlane.f32.xlu0 %v616_v27 }
 0x1e1   :  { %v1436_v28 = vpop.f32.mrb[6].mxu1 }
 0x1e2   :  { %v601_v29 = vpop.f32.mrb[7].mxu1  ;;  %v625_v21 = vsel %vm136_vm1, %v1436_v28, 0.0 }
 0x1e3   :  { %v622_v31 = vsel %vm136_vm1, %v601_v29, 0.0 }
 0x1e4   :  { %620 = vadd.xlane.f32.xlu0 %v619_v30  ;;  %623 = vadd.xlane.f32.xlu1 %v622_v31 }
 0x1e8   :  { %626 = vadd.xlane.f32.xlu0 %v625_v21  ;;  %v1253_v21 = vld [vmem:[%s2154_s8] ss:$0 sm:$0xff] }
 0x268   :  { %v615_v32 = vpop.xlane.xlu1 %614 }
 0x269   :  { %v630_v33 = vmul.f32 0.015625, %v615_v32  ;;  %v612_v34 = vpop.xlane.xlu0 %611 }
 0x26a   :  { %v629_v36 = vmul.f32 0.015625, %v612_v34 }
 0x26b   :  { %v1950_v37 = vsub.f32 %v1430_v20, %v630_v33 }
 0x26c   :  { %v1952_v38 = vsub.f32 %v581_v22, %v629_v36  ;;  %v1254_v36 = vld [vmem:[%s2155_s9] ss:$0 sm:$0xff] }
 0x26d   :  { %v618_v39 = vpop.xlane.xlu0 %617  ;;  %v642_v40 = vmul.f32 %v1950_v37, %v1950_v37 }
 0x26e   :  { %v631_v41 = vmul.f32 0.015625, %v618_v39  ;;  %v641_v42 = vmul.f32 %v1952_v38, %v1952_v38 }
 0x26f   :  { %v650_v43 = vsel %vm136_vm1, %v642_v40, 0.0 }
 0x270   :  { %v1959_v45 = vsub.f32 %v591_v26, %v631_v41  ;;  %651 = vadd.xlane.f32.xlu0 %v650_v43  ;;  %v647_v46 = vsel %vm136_vm1, %v641_v42, 0.0 }
 0x271   :  { %v621_v47 = vpop.xlane.xlu0 %620  ;;  %648 = vadd.xlane.f32.xlu1 %v647_v46  ;;  %v624_v48 = vpop.xlane.xlu1 %623 }
 0x272   :  { %v632_v49 = vmul.f32 0.015625, %v621_v47  ;;  %v633_v50 = vmul.f32 0.015625, %v624_v48  ;;  %v643_v51 = vmul.f32 %v1959_v45, %v1959_v45 }
 0x274   :  { %v1964_v52 = vsub.f32 %v1433_v25, %v632_v49  ;;  %v1966_v53 = vsub.f32 %v601_v29, %v633_v50  ;;  %v653_v54 = vsel %vm136_vm1, %v643_v51, 0.0 }
 0x275   :  { %v627_v55 = vpop.xlane.xlu0 %626  ;;  %654 = vadd.xlane.f32.xlu1 %v653_v54 }
 0x276   :  { %v634_v56 = vmul.f32 0.015625, %v627_v55  ;;  %v644_v57 = vmul.f32 %v1964_v52, %v1964_v52  ;;  %v645_v58 = vmul.f32 %v1966_v53, %v1966_v53 }
 0x278   :  { %v1973_v59 = vsub.f32 %v1436_v28, %v634_v56  ;;  %v656_v60 = vsel %vm136_vm1, %v644_v57, 0.0  ;;  %v659_v61 = vsel %vm136_vm1, %v645_v58, 0.0 }
 0x279   :  { %657 = vadd.xlane.f32.xlu0 %v656_v60  ;;  %660 = vadd.xlane.f32.xlu1 %v659_v61 }
 0x27a   :  { %v646_v62 = vmul.f32 %v1973_v59, %v1973_v59 }
 0x27c   :  { %v662_v63 = vsel %vm136_vm1, %v646_v62, 0.0 }
 0x27d   :  { %663 = vadd.xlane.f32.xlu0 %v662_v63 }
 0x2fd   :  { %v652_v13 = vpop.xlane.xlu0 %651 }
 0x2fe   :  { %v666_v14 = vmul.f32 0.015625, %v652_v13  ;;  %v649_v15 = vpop.xlane.xlu1 %648 }
 0x2ff   :  { %v665_v16 = vmul.f32 0.015625, %v649_v15 }
 0x300   :  { %v672_v17 = vadd.f32 1e-05, %v666_v14 }
 0x301   :  { %v671_v18 = vadd.f32 1e-05, %v665_v16 }
 0x302   :  { %1663 = vrsqrt.f32 %v672_v17  ;;  %v655_v19 = vpop.xlane.xlu1 %654 }
 0x303   :  { %1665 = vrsqrt.f32 %v671_v18  ;;  %v667_v20 = vmul.f32 0.015625, %v655_v19 }
 0x305   :  { %v673_v22 = vadd.f32 1e-05, %v667_v20 }
 0x306   :  { %v658_v23 = vpop.xlane.xlu0 %657  ;;  %v661_v24 = vpop.xlane.xlu1 %660 }
 0x307   :  { %1667 = vrsqrt.f32 %v673_v22  ;;  %v668_v25 = vmul.f32 0.015625, %v658_v23  ;;  %v669_v26 = vmul.f32 0.015625, %v661_v24 }
 0x309   :  { %v674_v27 = vadd.f32 1e-05, %v668_v25  ;;  %v675_v28 = vadd.f32 1e-05, %v669_v26 }
 0x30a   :  { %v664_v29 = vpop.xlane.xlu0 %663 }
 0x30b   :  { %1669 = vrsqrt.f32 %v674_v27  ;;  %v670_v30 = vmul.f32 0.015625, %v664_v29  ;;  %v118_v27 = vld [vmem:[%s2158_s15] sm:$0xff] }
 0x30c   :  { %v1664_v31 = vpop.eup %1663  ;;  %1671 = vrsqrt.f32 %v675_v28  ;;  %v119_v28 = vld [vmem:[%s2158_s15 + $0x8] sm:$0xff] }
 0x30d   :  { %v1666_v32 = vpop.eup %1665  ;;  %v684_v33 = vmul.f32 %v1664_v31, %v1950_v37  ;;  %v676_v34 = vadd.f32 1e-05, %v670_v30  ;;  %v1600_v29 = vpack.c.bf16 %v119_v28, %v118_v27  ;;  %v121_v30 = vld [vmem:[%s2158_s15 + $0x18] sm:$0xff] }
 0x30e   :  { %v683_v39 = vmul.f32 %v1666_v32, %v1952_v38  ;;  %v123_v32 = vld [vmem:[%s2158_s15 + $0x28] sm:$0xff] }
 0x30f   :  { %v696_v40 = vmul.f32 %v1253_v21, %v684_v33  ;;  %1673 = vrsqrt.f32 %v676_v34  ;;  %1601 = vmatprep.subr.bf16.mxu1 %v1600_v29 }
 0x310   :  { %v695_v41 = vmul.f32 %v1253_v21, %v683_v39  ;;  %1603 = vmatpush3.bf16.msra.mxu1 %v1600_v29 }
 0x311   :  { %v1668_v42 = vpop.eup %1667  ;;  %v708_v43 = vadd.f32 %v1254_v36, %v696_v40 }
 0x312   :  { %v707_v46 = vadd.f32 %v1254_v36, %v695_v41  ;;  %v685_v47 = vmul.f32 %v1668_v42, %v1959_v45 }
 0x313   :  { %v714_v51 = vmax.f32 %v708_v43, 0.0 }
 0x314   :  { %v713_v48 = vmax.f32 %v707_v46, 0.0  ;;  %v697_v49 = vmul.f32 %v1253_v21, %v685_v47 }
 0x315   :  { %v1670_v50 = vpop.eup %1669 }
 0x316   :  { %v1672_v37 = vpop.eup %1671  ;;  %1453 = vmatprep.mubr.msk.f32.mxu0 %vm136_vm1, %v713_v48  ;;  %v709_v54 = vadd.f32 %v1254_v36, %v697_v49  ;;  %v686_v55 = vmul.f32 %v1670_v50, %v1964_v52  ;;  %v124_v49 = vld [vmem:[%s2158_s15 + $0x30] sm:$0xff]  ;;  %v125_v50 = vld [vmem:[%s2158_s15 + $0x38] sm:$0xff] }
 0x317   :  { %1454 = vmatmul.mubr.msk.f32.vlgmr.msra.gmra.mrb[6].mxu0 %vm136_vm1, %v714_v51  ;;  %v687_v38 = vmul.f32 %v1672_v37, %v1966_v53  ;;  %v839_v53 = vshrl.u32 %v313_v44, 7  ;;  %v1612_v51 = vpack.c.bf16 %v125_v50, %v124_v49  ;;  %v110_v37 = vld [vmem:[%s2159_s14] sm:$0xff] }
 0x318   :  { %v715_v56 = vmax.f32 %v709_v54, 0.0  ;;  %v698_v57 = vmul.f32 %v1253_v21, %v686_v55  ;;  %v111_v54 = vld [vmem:[%s2159_s14 + $0x8] sm:$0xff] }
 0x319   :  { %v1674_v58 = vpop.eup %1673  ;;  %v699_v60 = vmul.f32 %v1253_v21, %v687_v38  ;;  %v840_v5 = vadd.s32 8, %v839_v53  ;;  %vm845_vm5 = vcmp.eq.s32.totalorder %v1262_v3, %v839_v53  ;;  %v1616_v55 = vpack.c.bf16 %v111_v54, %v110_v37  ;;  %v112_v38 = vld [vmem:[%s2159_s14 + $0x10] sm:$0xff] }
 0x31a   :  { %1456 = vmatprep.mubr.msk.f32.mxu0 %vm136_vm1, %v715_v56  ;;  %v710_v45 = vadd.f32 %v1254_v36, %v698_v57  ;;  %v688_v61 = vmul.f32 %v1674_v58, %v1973_v59  ;;  %v847_v59 = vsel %vm845_vm5, 1.0, %v1681_v4  ;;  %v113_v56 = vld [vmem:[%s2159_s14 + $0x18] sm:$0xff]  ;;  %v114_v58 = vld [vmem:[%s2159_s14 + $0x20] sm:$0xff] }
 0x31b   :  { %v711_v62 = vadd.f32 %v1254_v36, %v699_v60  ;;  %vm846_vm6 = vcmp.eq.s32.totalorder %v1262_v3, %v840_v5  ;;  %v1620_v57 = vpack.c.bf16 %v113_v56, %v112_v38  ;;  %v131_v3 = vld [vmem:[%s2160_s17 + $0x20] sm:$0xff]  ;;  %v132_v5 = vld [vmem:[%s2160_s17 + $0x28] sm:$0xff] }
 0x31c   :  { %v716_v63 = vmax.f32 %v710_v45, 0.0  ;;  %v700_v0 = vmul.f32 %v1253_v21, %v688_v61  ;;  %v848_v22 = vsel %vm846_vm6, 1.0, %v1681_v4  ;;  %v120_v4 = vld [vmem:[%s2158_s15 + $0x10] sm:$0xff]  ;;  %v122_v21 = vld [vmem:[%s2158_s15 + $0x20] sm:$0xff]  ;;  %v117_v61 = vld [vmem:[%s2159_s14 + $0x38] sm:$0xff] }
 0x31d   :  { %v717_v1 = vmax.f32 %v711_v62, 0.0  ;;  %v1604_v31 = vpack.c.bf16 %v121_v30, %v120_v4  ;;  %v1608_v33 = vpack.c.bf16 %v123_v32, %v122_v21  ;;  %v116_v45 = vld [vmem:[%s2159_s14 + $0x30] sm:$0xff] }
 0x31e   :  { %1457 = vmatmul.mubr.msk.f32.gmra.mrb[8].mxu0 %vm136_vm1, %v716_v63  ;;  %v712_v52 = vadd.f32 %v1254_v36, %v700_v0  ;;  %v1628_v62 = vpack.c.bf16 %v117_v61, %v116_v45  ;;  %v127_v63 = vld [vmem:[%s2160_s17] sm:$0xff]  ;;  %v128_v0 = vld [vmem:[%s2160_s17 + $0x8] sm:$0xff] }
 0x31f   :  { %1459 = vmatprep.mubr.msk.f32.mxu0 %vm136_vm1, %v717_v1  ;;  %1605 = vmatprep.subr.bf16.mxu1 %v1604_v31  ;;  %v129_v1 = vld [vmem:[%s2160_s17 + $0x10] sm:$0xff] }
 0x320   :  { %v718_v2 = vmax.f32 %v712_v52, 0.0  ;;  %1607 = vmatpush3.bf16.msra.mxu1 %v1604_v31  ;;  %v1632_v52 = vpack.c.bf16 %v128_v0, %v127_v63  ;;  %v1272_v31 = vld [vmem:[%s2164_s18] ss:$0 sm:$0xff] }
 0x321   :  { %1609 = vmatprep.subr.bf16.mxu1 %v1608_v33 }
 0x322   :  { %1460 = vmatmul.mubr.msk.f32.gmra.mrb[10].mxu0 %vm136_vm1, %v718_v2  ;;  %v130_v2 = vld [vmem:[%s2160_s17 + $0x18] sm:$0xff] }
 0x323   :  { %1474 = vmatprep.mubr.msk.f32.mxu0 %vm849_vm4, %v847_v59  ;;  %v1636_v53 = vpack.c.bf16 %v130_v2, %v129_v1  ;;  %v1640_v59 = vpack.c.bf16 %v132_v5, %v131_v3 }
 0x324   :  { %1611 = vmatpush3.bf16.msra.mxu1 %v1608_v33 }
 0x325   :  { %1613 = vmatprep.subr.bf16.mxu1 %v1612_v51 }
 0x328   :  { %1615 = vmatpush3.bf16.msra.mxu1 %v1612_v51 }
 0x329   :  { %1617 = vmatprep.subr.bf16.mxu1 %v1616_v55 }
 0x32b   :  { %1494 = vmatmul.mubr.msk.f32.vlgmr.msra.gmra.mrb[8].mxu1 %vm136_vm1, %v1865_v35  ;;  %v115_v35 = vld [vmem:[%s2159_s14 + $0x28] sm:$0xff] }
 0x32c   :  { %1619 = vmatpush3.bf16.msra.mxu1 %v1616_v55  ;;  %v1624_v60 = vpack.c.bf16 %v115_v35, %v114_v58 }
 0x32d   :  { %1621 = vmatprep.subr.bf16.mxu1 %v1620_v57 }
 0x330   :  { %1623 = vmatpush3.bf16.msra.mxu1 %v1620_v57 }
 0x331   :  { %1625 = vmatprep.subr.bf16.mxu1 %v1624_v60 }
 0x334   :  { %1627 = vmatpush3.bf16.msra.mxu1 %v1624_v60 }
 0x335   :  { %1629 = vmatprep.subr.bf16.mxu1 %v1628_v62 }
 0x338   :  { %1631 = vmatpush3.bf16.msra.mxu1 %v1628_v62 }
 0x3ea   :  { %v1455_v7 = vpop.f32.mrb[6].mxu0 }
 0x3eb   :  { %v815_v8 = vadd.f32 %v1455_v7, %v1255_v6  ;;  %v809_v9 = vpop.f32.mrb[7].mxu0 }
 0x3ec   :  { %v810_v44 = vadd.f32 %v1255_v6, %v809_v9 }
 0x3ee   :  { %v1588_v10 = vpack.c.bf16 %v815_v8, %v810_v44 }
 0x3f0   :  { %1589 = vmatprep.subr.bf16.mxu0 %v1588_v10 }
 0x3f1   :  { %v1458_v11 = vpop.f32.mrb[8].mxu0  ;;  %1591 = vmatpush3.bf16.msra.mxu0 %v1588_v10 }
 0x3f2   :  { %v825_v12 = vadd.f32 %v1458_v11, %v1255_v6  ;;  %v819_v13 = vpop.f32.mrb[9].mxu0 }
 0x3f3   :  { %v820_v14 = vadd.f32 %v1255_v6, %v819_v13 }
 0x3f5   :  { %v1592_v15 = vpack.c.bf16 %v825_v12, %v820_v14  ;;  %v1461_v16 = vpop.f32.mrb[10].mxu0  ;;  %v1265_v12 = vld [vmem:[%s2161_s12] ss:$0 sm:$0xff] }
 0x3f6   :  { %v835_v17 = vadd.f32 %v1461_v16, %v1255_v6  ;;  %v829_v18 = vpop.f32.mrb[11].mxu0  ;;  %v1266_v16 = vld [vmem:[%s2162_s13] ss:$0 sm:$0xff] }
 0x3f7   :  { %v830_v19 = vadd.f32 %v1255_v6, %v829_v18  ;;  %1593 = vmatprep.subr.bf16.mxu0 %v1592_v15 }
 0x3f8   :  { %1595 = vmatpush3.bf16.msra.mxu0 %v1592_v15 }
 0x3f9   :  { %v1596_v20 = vpack.c.bf16 %v835_v17, %v830_v19 }
 0x3fb   :  { %1597 = vmatprep.subr.bf16.mxu0 %v1596_v20 }
 0x3fc   :  { %1599 = vmatpush3.bf16.msra.mxu0 %v1596_v20 }
 0x3fd   :  { %1633 = vmatprep.subr.bf16.mxu0 %v1632_v52 }
 0x3ff   :  { %1475 = vmatmul.mubr.msk.f32.vlgmr.msra.gmra.mrb[12].mxu0 %vm849_vm4, %v848_v22  ;;  %v133_v22 = vld [vmem:[%s2160_s17 + $0x30] sm:$0xff] }
 0x400   :  { %1635 = vmatpush3.bf16.msra.mxu0 %v1632_v52 }
 0x401   :  { %1637 = vmatprep.subr.bf16.mxu0 %v1636_v53 }
 0x404   :  { %1639 = vmatpush3.bf16.msra.mxu0 %v1636_v53 }
 0x405   :  { %1641 = vmatprep.subr.bf16.mxu0 %v1640_v59 }
 0x408   :  { %1643 = vmatpush3.bf16.msra.mxu0 %v1640_v59 }
 0x4d2   :  { %v1476_v23 = vpop.f32.mrb[12].mxu0 }
 0x4d3   :  { %v922_v24 = vpop.f32.mrb[13].mxu0  ;;  %v935_v25 = vsel %vm934_vm7, %v1476_v23, 0.0 }
 0x4d4   :  { %936 = vadd.xlane.f32.xlu0 %v935_v25  ;;  %v931_v26 = vsel %vm136_vm1, %v922_v24, 0.0  ;;  %v1271_v25 = vld [vmem:[%s2163_s16] ss:$0 sm:$0xff] }
 0x4d5   :  { %932 = vadd.xlane.f32.xlu1 %v931_v26 }
 0x561   :  { %v937_v34 = vpop.xlane.xlu0 %936 }
 0x562   :  { %v939_v36 = vmul.f32 0.015625, %v937_v34  ;;  %v933_v39 = vpop.xlane.xlu1 %932 }
 0x563   :  { %v938_v40 = vmul.f32 0.015625, %v933_v39 }
 0x564   :  { %v2054_v41 = vsub.f32 %v1476_v23, %v939_v36  ;;  %v134_v23 = vld [vmem:[%s2160_s17 + $0x38] sm:$0xff] }
 0x565   :  { %v2056_v42 = vsub.f32 %v922_v24, %v938_v40  ;;  %v1644_v24 = vpack.c.bf16 %v134_v23, %v133_v22 }
 0x566   :  { %v943_v43 = vmul.f32 %v2054_v41, %v2054_v41 }
 0x567   :  { %v942_v46 = vmul.f32 %v2056_v42, %v2056_v42  ;;  %1645 = vmatprep.subr.bf16.mxu0 %v1644_v24 }
 0x568   :  { %v947_v47 = vsel %vm934_vm7, %v943_v43, 0.0  ;;  %1647 = vmatpush3.bf16.msra.mxu0 %v1644_v24 }
 0x569   :  { %948 = vadd.xlane.f32.xlu0 %v947_v47  ;;  %v944_v48 = vsel %vm136_vm1, %v942_v46, 0.0 }
 0x56a   :  { %945 = vadd.xlane.f32.xlu1 %v944_v48 }
 0x5f6   :  { %v949_v6 = vpop.xlane.xlu0 %948 }
 0x5f7   :  { %v951_v7 = vmul.f32 0.015625, %v949_v6  ;;  %v946_v8 = vpop.xlane.xlu1 %945 }
 0x5f8   :  { %v950_v9 = vmul.f32 0.015625, %v946_v8 }
 0x5f9   :  { %v953_v44 = vadd.f32 1e-05, %v951_v7 }
 0x5fa   :  { %v952_v10 = vadd.f32 1e-05, %v950_v9 }
 0x5fb   :  { %1675 = vrsqrt.f32 %v953_v44 }
 0x5fc   :  { %1677 = vrsqrt.f32 %v952_v10 }
 0x605   :  { %v1676_v11 = vpop.eup %1675 }
 0x606   :  { %v1678_v13 = vpop.eup %1677  ;;  %v957_v14 = vmul.f32 %v1676_v11, %v2054_v41 }
 0x607   :  { %v956_v15 = vmul.f32 %v1678_v13, %v2056_v42 }
 0x608   :  { %v965_v17 = vmul.f32 %v1265_v12, %v957_v14 }
 0x609   :  { %v964_v18 = vmul.f32 %v1265_v12, %v956_v15 }
 0x60a   :  { %v973_v20 = vadd.f32 %v1266_v16, %v965_v17 }
 0x60b   :  { %v972_v19 = vadd.f32 %v1266_v16, %v964_v18 }
 0x60d   :  { %1512 = vmatprep.mubr.msk.f32.mxu1 %vm136_vm1, %v972_v19 }
 0x60e   :  { %1513 = vmatmul.mubr.msk.f32.vlgmr.msra.gmra.mrb[8].mxu1 %vm136_vm1, %v973_v20 }
 0x6e1   :  { %v1514_v26 = vpop.f32.mrb[8].mxu1 }
 0x6e2   :  { %v1137_v27 = vadd.f32 %v1514_v26, %v1271_v25  ;;  %v1121_v28 = vpop.f32.mrb[9].mxu1 }
 0x6e3   :  { %v1136_v4 = vadd.f32 %v1271_v25, %v1121_v28 }
 0x6e4   :  { %v1139_v30 = vmax.f32 %v1137_v27, 0.0 }
 0x6e5   :  { %v1138_v29 = vmax.f32 %v1136_v4, 0.0 }
 0x6e7   :  { %1531 = vmatprep.mubr.msk.f32.mxu0 %vm136_vm1, %v1138_v29 }
 0x6e8   :  { %1532 = vmatmul.mubr.msk.f32.vlgmr.msra.gmra.mrb[14].mxu0 %vm136_vm1, %v1139_v30 }
 0x7bb   :  { %v1533_v21 = vpop.f32.mrb[14].mxu0 }
 0x7bc   :  { %v1224_v32 = vadd.f32 %v1533_v21, %v1272_v31  ;;  %v1218_v33 = vpop.f32.mrb[15].mxu0 }
 0x7bd   :  { %v1219_v34 = vadd.f32 %v1272_v31, %v1218_v33 }
 0x7be   :  { %1228 = vst.msk [vmem:[%s2165_s19 + $0x8] sm:$0xf] %vm934_vm7, %v1224_v32 }
 0x7bf   :  { %1227 = vst.msk [vmem:[%s2165_s19] sm:$0xff] %vm136_vm1, %v1219_v34 }

// kernel: gnn_policy_constraint_forward.9
= control target key start
LH: loop header
LB: loop body
LE: loop exit
PB: predicated region body
PF: predicated region fallthrough
CT: control target
= control target key end

     0   :  { %v1746_v0 = vmov 0.0|0.0   ;;  %vm1747_vm0 = vmmov 0   ;;  %v1748_v4 = vmov 0.0   ;;  %v1749_v9 = vmov 0   ;;  %s2275_s7 = inlined_call_operand.vmem [shape: f32[64,64], index: 7, kind: input, shape index: {}]   ;;  %s2276_s5 = inlined_call_operand.vmem [shape: f32[64,64], index: 5, kind: input, shape index: {}]   ;;  %s2277_s0 = inlined_call_operand.vmem [shape: f32[12,64], index: 0, kind: input, shape index: {}]   ;;  %s2278_s2 = inlined_call_operand.vmem [shape: s32[48,1], index: 2, kind: input, shape index: {}]   ;;  %s2279_s1 = inlined_call_operand.vmem [shape: f32[20,64], index: 1, kind: input, shape index: {}]   ;;  %s2280_s3 = inlined_call_operand.vmem [shape: s32[48,1], index: 3, kind: input, shape index: {}]   ;;  %s2281_s6 = inlined_call_operand.vmem [shape: f32[1,64], index: 6, kind: input, shape index: {}]   ;;  %s2282_s10 = inlined_call_operand.vmem [shape: f32[64,64], index: 10, kind: input, shape index: {}]   ;;  %s2283_s8 = inlined_call_operand.vmem [shape: f32[1,64], index: 8, kind: input, shape index: {}, may-alias: {8,12}]   ;;  %s2284_s9 = inlined_call_operand.vmem [shape: f32[1,64], index: 9, kind: input, shape index: {}, may-alias: {9,13}]   ;;  %s2285_s11 = inlined_call_operand.vmem [shape: f32[1,64], index: 11, kind: input, shape index: {}]   ;;  %s2286_s4 = inlined_call_operand.vmem [shape: s32[1,48], index: 4, kind: input, shape index: {}]   ;;  %s2287_s15 = inlined_call_operand.vmem [shape: f32[64,64], index: 15, kind: input, shape index: {}]   ;;  %s2288_s14 = inlined_call_operand.vmem [shape: f32[64,64], index: 14, kind: input, shape index: {}]   ;;  %s2289_s17 = inlined_call_operand.vmem [shape: f32[64,64], index: 17, kind: input, shape index: {}]   ;;  %s2290_s12 = inlined_call_operand.vmem [shape: f32[1,64], index: 12, kind: input, shape index: {}, may-alias: {8,12}]   ;;  %s2291_s13 = inlined_call_operand.vmem [shape: f32[1,64], index: 13, kind: input, shape index: {}, may-alias: {9,13}]   ;;  %s2292_s16 = inlined_call_operand.vmem [shape: f32[1,64], index: 16, kind: input, shape index: {}]   ;;  %s2293_s18 = inlined_call_operand.vmem [shape: f32[1,64], index: 18, kind: input, shape index: {}]   ;;  %s2294_s19 = inlined_call_operand.vmem [shape: f32[20,64], index: 19, kind: output, shape index: {}]  }
   0x1   :  { %2299 = sst [smem:[#allocation2_spill]] %s2275_s7  ;;  %1632 = vmatprep.subr.bf16.mxu1 %v1746_v0  ;;  %1458 = vmatprep.mubr.msk.f32.mxu1 %vm1747_vm0, %v1748_v4  ;;  %vm136_vm1 = vcmask 523264   ;;  %v1933_v35 = vld [vmem:[%s2279_s1] sm:$0xff]  ;;  %v74_v37 = vld [vmem:[%s2280_s3 + $0x8] sm:$0xff]  ;;  %v75_v39 = vld [vmem:[%s2280_s3 + $0x10] sm:$0xff]  ;;  %v313_v44 = vlaneseq  ;;  %vm375_vm2 = vcmask 97280  }
   0x2   :  { %2300 = sst [smem:[#allocation3_spill]] %s2276_s5  ;;  %s2303_s20 = sld [smem:[#allocation2_spill]]  ;;  %1726 = vset.pattern.permute.xlu0 %v1749_v9  ;;  %1727 = vset.pattern.permute.xlu1 %v1749_v9  ;;  %v73_v36 = vld [vmem:[%s2280_s3] sm:$0xff]  ;;  %v1949_v38 = vld [vmem:[%s2279_s1 + $0x8] sm:$0xff]  ;;  %v76_v40 = vld [vmem:[%s2280_s3 + $0x18] sm:$0xff]  ;;  %vm394_vm4 = vcmask 1043456  }
   0x3   :  { %2301 = sst [smem:[#allocation4_spill]] %s2277_s0  ;;  %s2304_s23 = sld [smem:[#allocation3_spill]]  ;;  %v1964_v41 = vld [vmem:[%s2279_s1 + $0x10] sm:$0xf]  ;;  %v77_v42 = vld [vmem:[%s2280_s3 + $0x20] sm:$0xff]  ;;  %v78_v43 = vld [vmem:[%s2280_s3 + $0x28] sm:$0xff] }
   0x4   :  { %2302 = sst [smem:[#allocation5_spill]] %s2278_s2  ;;  %s2305_s7 = sld [smem:[#allocation4_spill]]  ;;  %v1975_v45 = vand.u32 127, %v313_v44  ;;  %v1285_v52 = vld [vmem:[%s2281_s6] ss:$0 sm:$0xff]  ;;  %vm1750_vm5 = vmmov 1  }
   0x5   :  { %s2306_s25 = sld [smem:[#allocation5_spill]]  ;;  %vm1645_vm6 = vmpackc.low %vm394_vm4, %vm1750_vm5  ;;  %vm493_vm13 = vcmask 162816  }
   0x8   :  { %v89_v1 = vld [vmem:[%s2303_s20] sm:$0xff]  ;;  %v90_v2 = vld [vmem:[%s2303_s20 + $0x8] sm:$0xff]  ;;  %v91_v7 = vld [vmem:[%s2303_s20 + $0x10] sm:$0xff] }
   0x9   :  { %v80_v3 = vld [vmem:[%s2304_s23] sm:$0xff]  ;;  %v1616_v5 = vpack.c.bf16 %v90_v2, %v89_v1  ;;  %v81_v6 = vld [vmem:[%s2304_s23 + $0x8] sm:$0xff]  ;;  %v92_v8 = vld [vmem:[%s2303_s20 + $0x18] sm:$0xff] }
   0xa   :  { %v1633_v10 = vpack.c.bf16 %v81_v6, %v80_v3  ;;  %v1620_v11 = vpack.c.bf16 %v92_v8, %v91_v7  ;;  %v82_v12 = vld [vmem:[%s2304_s23 + $0x10] sm:$0xff]  ;;  %v83_v13 = vld [vmem:[%s2304_s23 + $0x18] sm:$0xff]  ;;  %v93_v14 = vld [vmem:[%s2303_s20 + $0x20] sm:$0xff] }
   0xb   :  { %1617 = vmatprep.subr.bf16.mxu0 %v1616_v5  ;;  %v94_v15 = vld [vmem:[%s2303_s20 + $0x28] sm:$0xff]  ;;  %v1636_v16 = vpack.c.bf16 %v83_v13, %v82_v12  ;;  %v84_v18 = vld [vmem:[%s2304_s23 + $0x20] sm:$0xff]  ;;  %v95_v21 = vld [vmem:[%s2303_s20 + $0x30] sm:$0xff] }
   0xc   :  { %1634 = vmatpush3.bf16.msra.mxu1 %v1633_v10  ;;  %1619 = vmatpush3.bf16.msra.mxu0 %v1616_v5  ;;  %v1624_v17 = vpack.c.bf16 %v94_v15, %v93_v14  ;;  %v85_v19 = vld [vmem:[%s2304_s23 + $0x28] sm:$0xff]  ;;  %v62_v20 = vld [vmem:[%s2305_s7] sm:$0xff]  ;;  %v96_v22 = vld [vmem:[%s2303_s20 + $0x38] sm:$0xff] }
   0xd   :  { %1635 = vmatprep.subr.bf16.mxu1 %v1746_v0  ;;  %1621 = vmatprep.subr.bf16.mxu0 %v1620_v11  ;;  %v67_v23 = vld [vmem:[%s2306_s25] sm:$0xff]  ;;  %v69_v24 = vld [vmem:[%s2306_s25 + $0x10] sm:$0xff]  ;;  %v1639_v25 = vpack.c.bf16 %v85_v19, %v84_v18  ;;  %v1628_v26 = vpack.c.bf16 %v96_v22, %v95_v21  ;;  %v87_v28 = vld [vmem:[%s2304_s23 + $0x38] sm:$0xff] }
   0xe   :  { %1439 = vmatprep.mubr.msk.f32.mxu0 %vm136_vm1, %v62_v20  ;;  %v86_v27 = vld [vmem:[%s2304_s23 + $0x30] sm:$0xff]  ;;  %316 = vperm.xlu0 %1726, %v67_v23   ;;  %v68_v29 = vld [vmem:[%s2306_s25 + $0x8] sm:$0xff]  ;;  %v70_v30 = vld [vmem:[%s2306_s25 + $0x18] sm:$0xff] }
   0xf   :  { %322 = vperm.xlu1 %1727, %v69_v24   ;;  %v1642_v31 = vpack.c.bf16 %v87_v28, %v86_v27  ;;  %v71_v32 = vld [vmem:[%s2306_s25 + $0x20] sm:$0xff]  ;;  %v72_v33 = vld [vmem:[%s2306_s25 + $0x28] sm:$0xff] }
  0x10   :  { %1637 = vmatpush3.bf16.msra.mxu1 %v1636_v16  ;;  %1623 = vmatpush3.bf16.msra.mxu0 %v1620_v11  ;;  %v63_v34 = vld [vmem:[%s2305_s7 + $0x8] sm:$0xf] }
  0x11   :  { %1638 = vmatprep.subr.bf16.mxu1 %v1746_v0  ;;  %1625 = vmatprep.subr.bf16.mxu0 %v1624_v17 }
  0x12   :  { %319 = vperm.xlu0 %1726, %v68_v29  }
  0x13   :  { %325 = vperm.xlu1 %1727, %v70_v30  }
  0x14   :  { %1640 = vmatpush3.bf16.msra.mxu1 %v1639_v25  ;;  %1627 = vmatpush3.bf16.msra.mxu0 %v1624_v17 }
  0x15   :  { %1641 = vmatprep.subr.bf16.mxu1 %v1746_v0  ;;  %1629 = vmatprep.subr.bf16.mxu0 %v1628_v26 }
  0x16   :  { %328 = vperm.xlu0 %1726, %v71_v32  }
  0x17   :  { %331 = vperm.xlu1 %1727, %v72_v33  }
  0x18   :  { %1643 = vmatpush3.bf16.msra.mxu1 %v1642_v31  ;;  %1631 = vmatpush3.bf16.msra.mxu0 %v1628_v26 }
  0x1a   :  { %346 = vperm.xlu0 %1726, %v73_v36  }
  0x1b   :  { %1459 = vmatmul.mubr.msk.f32.vlgmr.msra.gmra.mrb[0].mxu1 %vm136_vm1, %v1933_v35  ;;  %1440 = vmatmul.mubr.msk.f32.vlgmr.msra.gmra.mrb[0].mxu0 %vm136_vm1, %v63_v34 }
  0x1c   :  { %1461 = vmatprep.mubr.msk.f32.mxu1 %vm1747_vm0, %v1748_v4  ;;  %349 = vperm.xlu1 %1727, %v74_v37  }
  0x1e   :  { %352 = vperm.xlu0 %1726, %v75_v39  }
  0x1f   :  { %1462 = vmatmul.mubr.msk.f32.gmra.mrb[2].mxu1 %vm136_vm1, %v1949_v38 }
  0x20   :  { %1464 = vmatprep.mubr.msk.f32.mxu1 %vm1747_vm0, %v1748_v4  ;;  %355 = vperm.xlu1 %1727, %v76_v40  }
  0x22   :  { %358 = vperm.xlu0 %1726, %v77_v42  }
  0x23   :  { %1465 = vmatmul.mubr.msk.f32.gmra.mrb[4].mxu1 %vm136_vm1, %v1964_v41 }
  0x24   :  { %361 = vperm.xlu1 %1727, %v78_v43  }
  0x8d   :  { %v317_v46 = vpop.permute.xlu0 %316 }
  0x8e   :  { %vm333_vm3 = vcmp.eq.s32.totalorder %v317_v46, %v1975_v45  ;;  %v323_v48 = vpop.permute.xlu1 %322 }
  0x8f   :  { %v339_v47 = vsel %vm333_vm3, 1.0, %v1748_v4  ;;  %vm335_vm7 = vcmp.eq.s32.totalorder %v323_v48, %v1975_v45 }
  0x90   :  { %1471 = vmatprep.mubr.msk.f32.mxu0 %vm375_vm2, %v339_v47  ;;  %v341_v63 = vsel %vm335_vm7, 1.0, %v1748_v4 }
  0x91   :  { %v320_v49 = vpop.permute.xlu0 %319 }
  0x92   :  { %v326_v50 = vpop.permute.xlu1 %325  ;;  %vm334_vm8 = vcmp.eq.s32.totalorder %v320_v49, %v1975_v45 }
  0x93   :  { %v340_v2 = vsel %vm334_vm8, 1.0, %v1748_v4  ;;  %vm336_vm9 = vcmp.eq.s32.totalorder %v326_v50, %v1975_v45 }
  0x94   :  { %v342_v9 = vsel %vm336_vm9, 1.0, %v1748_v4  ;;  %vm948_vm9 = vcmask 519168  }
  0x95   :  { %v329_v51 = vpop.permute.xlu0 %328 }
  0x96   :  { %v332_v58 = vpop.permute.xlu1 %331  ;;  %vm337_vm10 = vcmp.eq.s32.totalorder %v329_v51, %v1975_v45 }
  0x97   :  { %v343_v10 = vsel %vm337_vm10, 1.0, %v1748_v4  ;;  %vm338_vm11 = vcmp.eq.s32.totalorder %v332_v58, %v1975_v45 }
  0x98   :  { %v344_v12 = vsel %vm338_vm11, 1.0, %v1748_v4 }
  0x99   :  { %v347_v1 = vpop.permute.xlu0 %346 }
  0x9a   :  { %vm363_vm12 = vcmp.eq.s32.totalorder %v347_v1, %v1975_v45 }
  0x9b   :  { %v350_v6 = vpop.permute.xlu1 %349  ;;  %v369_v14 = vsel %vm363_vm12, 1.0, %v1748_v4 }
  0x9c   :  { %vm364_vm14 = vcmp.eq.s32.totalorder %v350_v6, %v1975_v45  ;;  %v99_v6 = vld [vmem:[%s2282_s10] sm:$0xff] }
  0x9d   :  { %v353_v11 = vpop.permute.xlu0 %352  ;;  %v370_v16 = vsel %vm364_vm14, 1.0, %v1748_v4 }
  0x9e   :  { %vm365_vm15 = vcmp.eq.s32.totalorder %v353_v11, %v1975_v45 }
  0x9f   :  { %v356_v13 = vpop.permute.xlu1 %355  ;;  %v371_v17 = vsel %vm365_vm15, 1.0, %v1748_v4 }
  0xa0   :  { %vm366_vm3 = vcmp.eq.s32.totalorder %v356_v13, %v1975_v45  ;;  %v104_v13 = vld [vmem:[%s2282_s10 + $0x28] sm:$0xff] }
  0xa1   :  { %v359_v15 = vpop.permute.xlu0 %358  ;;  %v372_v19 = vsel %vm366_vm3, 1.0, %v1748_v4 }
  0xa3   :  { %v362_v18 = vpop.permute.xlu1 %361 }
  0xee   :  { %v299_v53 = vpop.f32.mrb[0].mxu1  ;;  %v1441_v54 = vpop.f32.mrb[0].mxu0 }
  0xef   :  { %v1460_v55 = vpop.f32.mrb[1].mxu1  ;;  %v209_v56 = vpop.f32.mrb[1].mxu0  ;;  %v300_v59 = vadd.f32 %v1285_v52, %v299_v53 }
  0xf0   :  { %v1644_v57 = vpack.c.bf16 %v1441_v54, %v209_v56 }
  0xf2   :  { %v304_v60 = vpop.f32.mrb[2].mxu1  ;;  %1646 = vmatprep.subr.msk.bf16.mxu0 %vm1645_vm6, %v1644_v57 }
  0xf3   :  { %v305_v61 = vadd.f32 %v1285_v52, %v304_v60  ;;  %v1463_v62 = vpop.f32.mrb[3].mxu1  ;;  %1649 = vmatpush3.bf16.msk.msra.mxu0 %vm1645_vm6, %v1644_v57  ;;  %vm852_vm6 = vcmask 392192  }
  0xf5   :  { %v1650_v3 = vpack.c.bf16 %v305_v61, %v300_v59 }
  0xf6   :  { %1472 = vmatmul.mubr.msk.f32.vlgmr.msra.gmra.mrb[2].mxu0 %vm375_vm2, %v340_v2  ;;  %v309_v5 = vpop.f32.mrb[4].mxu1 }
  0xf7   :  { %1651 = vmatprep.subr.bf16.mxu0 %v1650_v3  ;;  %1474 = vmatprep.mubr.msk.f32.mxu0 %vm375_vm2, %v341_v63  ;;  %v310_v7 = vadd.f32 %v1285_v52, %v309_v5  ;;  %v1466_v8 = vpop.f32.mrb[5].mxu1 }
  0xf8   :  { %1653 = vmatpush3.bf16.msra.mxu0 %v1650_v3 }
  0xf9   :  { %1484 = vmatprep.subr.msk.mxu0 %vm394_vm4, %v310_v7 }
  0xfa   :  { %1475 = vmatmul.mubr.msk.f32.gmra.mrb[4].mxu0 %vm375_vm2, %v342_v9  ;;  %v101_v9 = vld [vmem:[%s2282_s10 + $0x10] sm:$0xff] }
  0xfb   :  { %1477 = vmatprep.mubr.msk.f32.mxu0 %vm375_vm2, %v343_v10  ;;  %v102_v10 = vld [vmem:[%s2282_s10 + $0x18] sm:$0xff] }
  0xfc   :  { %1485 = vmatpush3.msk.msra.mxu0 %vm394_vm4, %v310_v7  ;;  %vm367_vm4 = vcmp.eq.s32.totalorder %v359_v15, %v1975_v45  ;;  %v100_v7 = vld [vmem:[%s2282_s10 + $0x8] sm:$0xff]  ;;  %v1658_v11 = vpack.c.bf16 %v102_v10, %v101_v9  ;;  %v105_v15 = vld [vmem:[%s2282_s10 + $0x30] sm:$0xff] }
  0xfd   :  { %1670 = vmatprep.subr.bf16.mxu0 %v1746_v0  ;;  %v373_v20 = vsel %vm367_vm4, 1.0, %v1748_v4  ;;  %v1654_v8 = vpack.c.bf16 %v100_v7, %v99_v6 }
  0xfe   :  { %1478 = vmatmul.mubr.msk.f32.gmra.mrb[6].mxu0 %vm375_vm2, %v344_v12  ;;  %vm368_vm2 = vcmp.eq.s32.totalorder %v362_v18, %v1975_v45  ;;  %v103_v12 = vld [vmem:[%s2282_s10 + $0x20] sm:$0xff] }
  0xff   :  { %1486 = vmatprep.mubr.msk.f32.mxu0 %vm493_vm13, %v369_v14  ;;  %v374_v21 = vsel %vm368_vm2, 1.0, %v1748_v4  ;;  %1655 = vmatprep.subr.bf16.mxu1 %v1654_v8  ;;  %v1662_v14 = vpack.c.bf16 %v104_v13, %v103_v12 }
 0x100   :  { %1657 = vmatpush3.bf16.msra.mxu1 %v1654_v8 }
 0x101   :  { %1659 = vmatprep.subr.bf16.mxu1 %v1658_v11 }
 0x102   :  { %1487 = vmatmul.mubr.msk.f32.vlgmr.msra.gmra.mrb[2].mxu0 %vm493_vm13, %v370_v16  ;;  %v106_v16 = vld [vmem:[%s2282_s10 + $0x38] sm:$0xff] }
 0x103   :  { %1489 = vmatprep.mubr.msk.f32.mxu0 %vm493_vm13, %v371_v17  ;;  %v1666_v17 = vpack.c.bf16 %v106_v16, %v105_v15 }
 0x104   :  { %1661 = vmatpush3.bf16.msra.mxu1 %v1658_v11 }
 0x105   :  { %1663 = vmatprep.subr.bf16.mxu1 %v1662_v14 }
 0x106   :  { %1490 = vmatmul.mubr.msk.f32.gmra.mrb[4].mxu0 %vm493_vm13, %v372_v19 }
 0x107   :  { %1492 = vmatprep.mubr.msk.f32.mxu0 %vm493_vm13, %v373_v20 }
 0x108   :  { %1665 = vmatpush3.bf16.msra.mxu1 %v1662_v14 }
 0x109   :  { %1667 = vmatprep.subr.bf16.mxu1 %v1666_v17 }
 0x10a   :  { %1493 = vmatmul.mubr.msk.f32.gmra.mrb[6].mxu0 %vm493_vm13, %v374_v21 }
 0x10b   :  { %1532 = vmatprep.mubr.msk.f32.mxu0 %vm1747_vm0, %v1748_v4 }
 0x10c   :  { %1669 = vmatpush3.bf16.msra.mxu1 %v1666_v17 }
 0x10d   :  { %1679 = vmatprep.subr.bf16.mxu1 %v1746_v0 }
 0x1d5   :  { %v1488_v22 = vpop.f32.mrb[2].mxu0 }
 0x1d6   :  { %v581_v23 = vpop.f32.mrb[3].mxu0  ;;  %v613_v24 = vsel %vm136_vm1, %v1488_v22, 0.0 }
 0x1d7   :  { %614 = vadd.xlane.f32.xlu1 %v613_v24  ;;  %v610_v25 = vsel %vm136_vm1, %v581_v23, 0.0 }
 0x1d8   :  { %611 = vadd.xlane.f32.xlu0 %v610_v25 }
 0x1d9   :  { %v1491_v26 = vpop.f32.mrb[4].mxu0 }
 0x1da   :  { %v591_v27 = vpop.f32.mrb[5].mxu0  ;;  %v619_v31 = vsel %vm136_vm1, %v1491_v26, 0.0 }
 0x1db   :  { %v616_v28 = vsel %vm136_vm1, %v591_v27, 0.0 }
 0x1dc   :  { %617 = vadd.xlane.f32.xlu0 %v616_v28 }
 0x1dd   :  { %v1494_v29 = vpop.f32.mrb[6].mxu0 }
 0x1de   :  { %v601_v30 = vpop.f32.mrb[7].mxu0  ;;  %v625_v33 = vsel %vm136_vm1, %v1494_v29, 0.0 }
 0x1df   :  { %v622_v32 = vsel %vm136_vm1, %v601_v30, 0.0 }
 0x1e0   :  { %620 = vadd.xlane.f32.xlu0 %v619_v31  ;;  %623 = vadd.xlane.f32.xlu1 %v622_v32 }
 0x1e4   :  { %626 = vadd.xlane.f32.xlu0 %v625_v33 }
 0x264   :  { %v615_v34 = vpop.xlane.xlu1 %614 }
 0x265   :  { %v630_v36 = vmul.f32 0.015625, %v615_v34  ;;  %v612_v37 = vpop.xlane.xlu0 %611 }
 0x266   :  { %v629_v39 = vmul.f32 0.015625, %v612_v37  ;;  %v1303_v37 = vld [vmem:[%s2283_s8] ss:$0 sm:$0xff] }
 0x267   :  { %v2028_v40 = vsub.f32 %v1488_v22, %v630_v36 }
 0x268   :  { %v2030_v42 = vsub.f32 %v581_v23, %v629_v39 }
 0x269   :  { %v618_v43 = vpop.xlane.xlu0 %617  ;;  %v642_v45 = vmul.f32 %v2028_v40, %v2028_v40 }
 0x26a   :  { %v631_v46 = vmul.f32 0.015625, %v618_v43  ;;  %v641_v47 = vmul.f32 %v2030_v42, %v2030_v42 }
 0x26b   :  { %v650_v48 = vsel %vm136_vm1, %v642_v45, 0.0 }
 0x26c   :  { %v2037_v49 = vsub.f32 %v591_v27, %v631_v46  ;;  %651 = vadd.xlane.f32.xlu0 %v650_v48  ;;  %v647_v50 = vsel %vm136_vm1, %v641_v47, 0.0  ;;  %v1304_v46 = vld [vmem:[%s2284_s9] ss:$0 sm:$0xff] }
 0x26d   :  { %v621_v51 = vpop.xlane.xlu0 %620  ;;  %648 = vadd.xlane.f32.xlu1 %v647_v50  ;;  %v624_v52 = vpop.xlane.xlu1 %623 }
 0x26e   :  { %v632_v53 = vmul.f32 0.015625, %v621_v51  ;;  %v633_v54 = vmul.f32 0.015625, %v624_v52  ;;  %v643_v55 = vmul.f32 %v2037_v49, %v2037_v49 }
 0x270   :  { %v2042_v56 = vsub.f32 %v1491_v26, %v632_v53  ;;  %v2044_v57 = vsub.f32 %v601_v30, %v633_v54  ;;  %v653_v58 = vsel %vm136_vm1, %v643_v55, 0.0 }
 0x271   :  { %v627_v59 = vpop.xlane.xlu0 %626  ;;  %654 = vadd.xlane.f32.xlu1 %v653_v58 }
 0x272   :  { %v634_v60 = vmul.f32 0.015625, %v627_v59  ;;  %v644_v61 = vmul.f32 %v2042_v56, %v2042_v56  ;;  %v645_v62 = vmul.f32 %v2044_v57, %v2044_v57 }
 0x274   :  { %v2051_v63 = vsub.f32 %v1494_v29, %v634_v60  ;;  %v656_v1 = vsel %vm136_vm1, %v644_v61, 0.0  ;;  %v659_v2 = vsel %vm136_vm1, %v645_v62, 0.0 }
 0x275   :  { %657 = vadd.xlane.f32.xlu0 %v656_v1  ;;  %660 = vadd.xlane.f32.xlu1 %v659_v2 }
 0x276   :  { %v646_v3 = vmul.f32 %v2051_v63, %v2051_v63 }
 0x278   :  { %v662_v5 = vsel %vm136_vm1, %v646_v3, 0.0 }
 0x279   :  { %663 = vadd.xlane.f32.xlu0 %v662_v5 }
 0x2f9   :  { %v652_v18 = vpop.xlane.xlu0 %651 }
 0x2fa   :  { %v666_v19 = vmul.f32 0.015625, %v652_v18  ;;  %v649_v20 = vpop.xlane.xlu1 %648 }
 0x2fb   :  { %v665_v21 = vmul.f32 0.015625, %v649_v20  ;;  %v839_v20 = vshrl.u32 %v313_v44, 7 }
 0x2fc   :  { %v672_v22 = vadd.f32 1e-05, %v666_v19 }
 0x2fd   :  { %v671_v23 = vadd.f32 1e-05, %v665_v21  ;;  %v841_v44 = vadd.s32 16, %v839_v20 }
 0x2fe   :  { %1728 = vrsqrt.f32 %v672_v22  ;;  %v655_v24 = vpop.xlane.xlu1 %654 }
 0x2ff   :  { %1730 = vrsqrt.f32 %v671_v23  ;;  %v667_v25 = vmul.f32 0.015625, %v655_v24  ;;  %v1312_v23 = vld [vmem:[%s2286_s4] ss:$0 sm:$0xff] }
 0x300   :  { %vm846_vm5 = vcmp.eq.s32.totalorder %v1312_v23, %v839_v20  ;;  %vm848_vm8 = vcmp.eq.s32.totalorder %v1312_v23, %v841_v44 }
 0x301   :  { %v673_v26 = vadd.f32 1e-05, %v667_v25 }
 0x302   :  { %v658_v27 = vpop.xlane.xlu0 %657  ;;  %v661_v28 = vpop.xlane.xlu1 %660 }
 0x303   :  { %1732 = vrsqrt.f32 %v673_v26  ;;  %v668_v29 = vmul.f32 0.015625, %v658_v27  ;;  %v669_v30 = vmul.f32 0.015625, %v661_v28  ;;  %v840_v27 = vadd.s32 8, %v839_v20  ;;  %v117_v20 = vld [vmem:[%s2288_s14 + $0x38] sm:$0xff] }
 0x305   :  { %v674_v31 = vadd.f32 1e-05, %v668_v29  ;;  %v675_v32 = vadd.f32 1e-05, %v669_v30  ;;  %v849_v29 = vsel %vm846_vm5, 1.0, %v1748_v4  ;;  %vm847_vm7 = vcmp.eq.s32.totalorder %v1312_v23, %v840_v27  ;;  %v129_v23 = vld [vmem:[%s2289_s17 + $0x10] sm:$0xff] }
 0x306   :  { %v664_v33 = vpop.xlane.xlu0 %663  ;;  %v850_v30 = vsel %vm847_vm7, 1.0, %v1748_v4 }
 0x307   :  { %1734 = vrsqrt.f32 %v674_v31  ;;  %v670_v34 = vmul.f32 0.015625, %v664_v33  ;;  %v851_v31 = vsel %vm848_vm8, 1.0, %v1748_v4 }
 0x308   :  { %v1729_v36 = vpop.eup %1728  ;;  %1736 = vrsqrt.f32 %v675_v32 }
 0x309   :  { %v1731_v39 = vpop.eup %1730  ;;  %v684_v43 = vmul.f32 %v1729_v36, %v2028_v40  ;;  %v676_v45 = vadd.f32 1e-05, %v670_v34 }
 0x30a   :  { %v683_v47 = vmul.f32 %v1731_v39, %v2030_v42 }
 0x30b   :  { %v696_v48 = vmul.f32 %v1303_v37, %v684_v43  ;;  %1738 = vrsqrt.f32 %v676_v45 }
 0x30c   :  { %v695_v50 = vmul.f32 %v1303_v37, %v683_v47 }
 0x30d   :  { %v1733_v51 = vpop.eup %1732  ;;  %v708_v52 = vadd.f32 %v1304_v46, %v696_v48 }
 0x30e   :  { %v707_v53 = vadd.f32 %v1304_v46, %v695_v50  ;;  %v685_v54 = vmul.f32 %v1733_v51, %v2037_v49 }
 0x30f   :  { %v714_v60 = vmax.f32 %v708_v52, 0.0 }
 0x310   :  { %v713_v55 = vmax.f32 %v707_v53, 0.0  ;;  %v697_v58 = vmul.f32 %v1303_v37, %v685_v54 }
 0x311   :  { %v1735_v59 = vpop.eup %1734 }
 0x312   :  { %v1737_v40 = vpop.eup %1736  ;;  %1511 = vmatprep.mubr.msk.f32.mxu1 %vm136_vm1, %v713_v55  ;;  %v709_v61 = vadd.f32 %v1304_v46, %v697_v58  ;;  %v686_v62 = vmul.f32 %v1735_v59, %v2042_v56 }
 0x313   :  { %1512 = vmatmul.mubr.msk.f32.vlgmr.msra.gmra.mrb[6].mxu1 %vm136_vm1, %v714_v60  ;;  %v687_v42 = vmul.f32 %v1737_v40, %v2044_v57  ;;  %v1305_v57 = vld [vmem:[%s2285_s11] ss:$0 sm:$0xff] }
 0x314   :  { %v715_v1 = vmax.f32 %v709_v61, 0.0  ;;  %v698_v2 = vmul.f32 %v1303_v37, %v686_v62 }
 0x315   :  { %v1739_v3 = vpop.eup %1738  ;;  %v699_v5 = vmul.f32 %v1303_v37, %v687_v42 }
 0x316   :  { %1514 = vmatprep.mubr.msk.f32.mxu1 %vm136_vm1, %v715_v1  ;;  %v710_v49 = vadd.f32 %v1304_v46, %v698_v2  ;;  %v688_v6 = vmul.f32 %v1739_v3, %v2051_v63  ;;  %v118_v1 = vld [vmem:[%s2287_s15] sm:$0xff]  ;;  %v119_v2 = vld [vmem:[%s2287_s15 + $0x8] sm:$0xff] }
 0x317   :  { %v711_v7 = vadd.f32 %v1304_v46, %v699_v5  ;;  %v1680_v3 = vpack.c.bf16 %v119_v2, %v118_v1  ;;  %v110_v5 = vld [vmem:[%s2288_s14] sm:$0xff] }
 0x318   :  { %v716_v8 = vmax.f32 %v710_v49, 0.0  ;;  %v700_v9 = vmul.f32 %v1303_v37, %v688_v6  ;;  %v111_v49 = vld [vmem:[%s2288_s14 + $0x8] sm:$0xff] }
 0x319   :  { %v717_v10 = vmax.f32 %v711_v7, 0.0  ;;  %v1692_v6 = vpack.c.bf16 %v111_v49, %v110_v5  ;;  %1681 = vmatpush3.bf16.msra.mxu1 %v1680_v3  ;;  %v120_v7 = vld [vmem:[%s2287_s15 + $0x10] sm:$0xff]  ;;  %v1324_v5 = vld [vmem:[%s2292_s16] ss:$0 sm:$0xff] }
 0x31a   :  { %1515 = vmatmul.mubr.msk.f32.gmra.mrb[8].mxu1 %vm136_vm1, %v716_v8  ;;  %v712_v56 = vadd.f32 %v1304_v46, %v700_v9  ;;  %1682 = vmatprep.subr.bf16.mxu1 %v1746_v0  ;;  %v121_v8 = vld [vmem:[%s2287_s15 + $0x18] sm:$0xff] }
 0x31b   :  { %1517 = vmatprep.mubr.msk.f32.mxu1 %vm136_vm1, %v717_v10  ;;  %v1683_v9 = vpack.c.bf16 %v121_v8, %v120_v7  ;;  %v112_v10 = vld [vmem:[%s2288_s14 + $0x10] sm:$0xff] }
 0x31c   :  { %v718_v11 = vmax.f32 %v712_v56, 0.0  ;;  %v113_v56 = vld [vmem:[%s2288_s14 + $0x18] sm:$0xff] }
 0x31d   :  { %1684 = vmatpush3.bf16.msra.mxu1 %v1683_v9 }
 0x31e   :  { %1518 = vmatmul.mubr.msk.f32.gmra.mrb[10].mxu1 %vm136_vm1, %v718_v11  ;;  %v1695_v11 = vpack.c.bf16 %v113_v56, %v112_v10  ;;  %1685 = vmatprep.subr.bf16.mxu1 %v1746_v0 }
 0x31f   :  { %1557 = vmatprep.mubr.msk.f32.mxu1 %vm1747_vm0, %v1748_v4 }
 0x3e6   :  { %v1513_v63 = vpop.f32.mrb[6].mxu1 }
 0x3e7   :  { %v815_v12 = vadd.f32 %v1513_v63, %v1305_v57  ;;  %v809_v13 = vpop.f32.mrb[7].mxu1  ;;  %v123_v63 = vld [vmem:[%s2287_s15 + $0x28] sm:$0xff] }
 0x3e8   :  { %v810_v14 = vadd.f32 %v1305_v57, %v809_v13  ;;  %v114_v13 = vld [vmem:[%s2288_s14 + $0x20] sm:$0xff] }
 0x3ea   :  { %v1671_v15 = vpack.c.bf16 %v815_v12, %v810_v14  ;;  %v115_v14 = vld [vmem:[%s2288_s14 + $0x28] sm:$0xff] }
 0x3ec   :  { %1672 = vmatpush3.bf16.msra.mxu0 %v1671_v15  ;;  %v1698_v15 = vpack.c.bf16 %v115_v14, %v114_v13 }
 0x3ed   :  { %v1516_v16 = vpop.f32.mrb[8].mxu1  ;;  %1673 = vmatprep.subr.bf16.mxu0 %v1746_v0 }
 0x3ee   :  { %v825_v17 = vadd.f32 %v1516_v16, %v1305_v57  ;;  %v819_v18 = vpop.f32.mrb[9].mxu1  ;;  %v124_v16 = vld [vmem:[%s2287_s15 + $0x30] sm:$0xff] }
 0x3ef   :  { %v820_v19 = vadd.f32 %v1305_v57, %v819_v18 }
 0x3f1   :  { %v1674_v21 = vpack.c.bf16 %v825_v17, %v820_v19  ;;  %v1519_v22 = vpop.f32.mrb[10].mxu1  ;;  %v125_v17 = vld [vmem:[%s2287_s15 + $0x38] sm:$0xff]  ;;  %v116_v19 = vld [vmem:[%s2288_s14 + $0x30] sm:$0xff] }
 0x3f2   :  { %v835_v24 = vadd.f32 %v1519_v22, %v1305_v57  ;;  %v829_v25 = vpop.f32.mrb[11].mxu1  ;;  %v1689_v18 = vpack.c.bf16 %v125_v17, %v124_v16  ;;  %v127_v22 = vld [vmem:[%s2289_s17] sm:$0xff] }
 0x3f3   :  { %v830_v26 = vadd.f32 %v1305_v57, %v829_v25  ;;  %1675 = vmatpush3.bf16.msra.mxu0 %v1674_v21  ;;  %v122_v57 = vld [vmem:[%s2287_s15 + $0x20] sm:$0xff]  ;;  %v1701_v21 = vpack.c.bf16 %v117_v20, %v116_v19 }
 0x3f4   :  { %1676 = vmatprep.subr.bf16.mxu0 %v1746_v0  ;;  %v1686_v12 = vpack.c.bf16 %v123_v63, %v122_v57  ;;  %v1325_v16 = vld [vmem:[%s2293_s18] ss:$0 sm:$0xff] }
 0x3f5   :  { %v1677_v28 = vpack.c.bf16 %v835_v24, %v830_v26 }
 0x3f6   :  { %1687 = vmatpush3.bf16.msra.mxu1 %v1686_v12 }
 0x3f7   :  { %1678 = vmatpush3.bf16.msra.mxu0 %v1677_v28  ;;  %1688 = vmatprep.subr.bf16.mxu1 %v1746_v0 }
 0x3f8   :  { %1691 = vmatprep.subr.bf16.mxu0 %v1746_v0 }
 0x3fa   :  { %1533 = vmatmul.mubr.msk.f32.vlgmr.msra.gmra.mrb[8].mxu0 %vm852_vm6, %v849_v29  ;;  %1690 = vmatpush3.bf16.msra.mxu1 %v1689_v18 }
 0x3fb   :  { %1535 = vmatprep.mubr.msk.f32.mxu0 %vm1747_vm0, %v1748_v4  ;;  %1693 = vmatpush3.bf16.msra.mxu0 %v1692_v6 }
 0x3fc   :  { %1694 = vmatprep.subr.bf16.mxu0 %v1746_v0  ;;  %1703 = vmatprep.subr.bf16.mxu1 %v1746_v0 }
 0x3fd   :  { %1558 = vmatmul.mubr.msk.f32.vlgmr.msra.gmra.mrb[12].mxu1 %vm136_vm1, %v1933_v35  ;;  %v128_v35 = vld [vmem:[%s2289_s17 + $0x8] sm:$0xff] }
 0x3fe   :  { %1536 = vmatmul.mubr.msk.f32.gmra.mrb[10].mxu0 %vm852_vm6, %v850_v30  ;;  %1560 = vmatprep.mubr.msk.f32.mxu1 %vm1747_vm0, %v1748_v4 }
 0x3ff   :  { %1538 = vmatprep.mubr.msk.f32.mxu0 %vm1747_vm0, %v1748_v4  ;;  %1696 = vmatpush3.bf16.msra.mxu0 %v1695_v11 }
 0x400   :  { %1697 = vmatprep.subr.bf16.mxu0 %v1746_v0 }
 0x401   :  { %1561 = vmatmul.mubr.msk.f32.gmra.mrb[14].mxu1 %vm136_vm1, %v1949_v38  ;;  %v1704_v38 = vpack.c.bf16 %v128_v35, %v127_v22 }
 0x402   :  { %1539 = vmatmul.mubr.msk.f32.gmra.mrb[12].mxu0 %vm852_vm6, %v851_v31  ;;  %1563 = vmatprep.mubr.msk.f32.mxu1 %vm1747_vm0, %v1748_v4 }
 0x403   :  { %1582 = vmatprep.mubr.msk.f32.mxu0 %vm1747_vm0, %v1748_v4  ;;  %1699 = vmatpush3.bf16.msra.mxu0 %v1698_v15 }
 0x404   :  { %1700 = vmatprep.subr.bf16.mxu0 %v1746_v0  ;;  %1705 = vmatpush3.bf16.msra.mxu1 %v1704_v38 }
 0x405   :  { %1564 = vmatmul.mubr.msk.f32.gmra.mrb[16].mxu1 %vm136_vm1, %v1964_v41  ;;  %v130_v41 = vld [vmem:[%s2289_s17 + $0x18] sm:$0xff]  ;;  %1706 = vmatprep.subr.bf16.mxu1 %v1746_v0 }
 0x406   :  { %1607 = vmatprep.mubr.msk.f32.mxu1 %vm1747_vm0, %v1748_v4  ;;  %v1707_v24 = vpack.c.bf16 %v130_v41, %v129_v23 }
 0x407   :  { %1702 = vmatpush3.bf16.msra.mxu0 %v1701_v21 }
 0x408   :  { %1708 = vmatpush3.bf16.msra.mxu1 %v1707_v24 }
 0x409   :  { %1709 = vmatprep.subr.bf16.mxu1 %v1746_v0 }
 0x4cd   :  { %v928_v32 = vpop.f32.mrb[8].mxu0 }
 0x4ce   :  { %v1534_v33 = vpop.f32.mrb[9].mxu0  ;;  %v942_v34 = vsel %vm136_vm1, %v928_v32, 0.0 }
 0x4cf   :  { %943 = vadd.xlane.f32.xlu1 %v942_v34  ;;  %v1316_v34 = vld [vmem:[%s2290_s12] ss:$0 sm:$0xff] }
 0x4d1   :  { %v933_v36 = vpop.f32.mrb[10].mxu0 }
 0x4d2   :  { %v1537_v37 = vpop.f32.mrb[11].mxu0  ;;  %v945_v39 = vsel %vm136_vm1, %v933_v36, 0.0 }
 0x4d3   :  { %946 = vadd.xlane.f32.xlu0 %v945_v39  ;;  %v1317_v37 = vld [vmem:[%s2291_s13] ss:$0 sm:$0xff] }
 0x4d5   :  { %v938_v43 = vpop.f32.mrb[12].mxu0 }
 0x4d6   :  { %v1540_v45 = vpop.f32.mrb[13].mxu0  ;;  %v949_v46 = vsel %vm948_vm9, %v938_v43, 0.0 }
 0x4d7   :  { %950 = vadd.xlane.f32.xlu1 %v949_v46 }
 0x55c   :  { %v944_v47 = vpop.xlane.xlu1 %943 }
 0x55d   :  { %v952_v48 = vmul.f32 0.015625, %v944_v47 }
 0x55f   :  { %v2125_v50 = vsub.f32 %v928_v32, %v952_v48 }
 0x560   :  { %v947_v51 = vpop.xlane.xlu0 %946 }
 0x561   :  { %v953_v52 = vmul.f32 0.015625, %v947_v51  ;;  %v958_v53 = vmul.f32 %v2125_v50, %v2125_v50 }
 0x563   :  { %v2129_v54 = vsub.f32 %v933_v36, %v953_v52  ;;  %v961_v55 = vsel %vm136_vm1, %v958_v53, 0.0 }
 0x564   :  { %962 = vadd.xlane.f32.xlu0 %v961_v55  ;;  %v951_v58 = vpop.xlane.xlu1 %950  ;;  %v132_v55 = vld [vmem:[%s2289_s17 + $0x28] sm:$0xff] }
 0x565   :  { %v954_v59 = vmul.f32 0.015625, %v951_v58  ;;  %v959_v60 = vmul.f32 %v2129_v54, %v2129_v54 }
 0x567   :  { %v2134_v40 = vsub.f32 %v938_v43, %v954_v59  ;;  %v964_v61 = vsel %vm136_vm1, %v959_v60, 0.0  ;;  %v1066_v59 = vpop.f32.mrb[12].mxu1 }
 0x568   :  { %965 = vadd.xlane.f32.xlu1 %v964_v61  ;;  %v1559_v60 = vpop.f32.mrb[13].mxu1  ;;  %v134_v61 = vld [vmem:[%s2289_s17 + $0x38] sm:$0xff] }
 0x569   :  { %v960_v62 = vmul.f32 %v2134_v40, %v2134_v40 }
 0x56b   :  { %v967_v42 = vsel %vm948_vm9, %v960_v62, 0.0 }
 0x56c   :  { %968 = vadd.xlane.f32.xlu0 %v967_v42  ;;  %v1071_v42 = vpop.f32.mrb[14].mxu1 }
 0x56d   :  { %v1562_v1 = vpop.f32.mrb[15].mxu1 }
 0x56e   :  { %v1076_v2 = vpop.f32.mrb[16].mxu1 }
 0x56f   :  { %v1565_v3 = vpop.f32.mrb[17].mxu1 }
 0x5f1   :  { %v963_v25 = vpop.xlane.xlu0 %962 }
 0x5f2   :  { %v970_v26 = vmul.f32 0.015625, %v963_v25 }
 0x5f4   :  { %v973_v27 = vadd.f32 1e-05, %v970_v26 }
 0x5f5   :  { %v966_v28 = vpop.xlane.xlu1 %965 }
 0x5f6   :  { %1740 = vrsqrt.f32 %v973_v27  ;;  %v971_v29 = vmul.f32 0.015625, %v966_v28 }
 0x5f8   :  { %v974_v44 = vadd.f32 1e-05, %v971_v29 }
 0x5f9   :  { %v969_v30 = vpop.xlane.xlu0 %968 }
 0x5fa   :  { %1742 = vrsqrt.f32 %v974_v44  ;;  %v972_v31 = vmul.f32 0.015625, %v969_v30 }
 0x5fc   :  { %v975_v32 = vadd.f32 1e-05, %v972_v31 }
 0x5fe   :  { %1744 = vrsqrt.f32 %v975_v32 }
 0x600   :  { %v1741_v33 = vpop.eup %1740 }
 0x601   :  { %v979_v36 = vmul.f32 %v1741_v33, %v2125_v50 }
 0x603   :  { %v988_v39 = vmul.f32 %v1316_v34, %v979_v36 }
 0x604   :  { %v1743_v43 = vpop.eup %1742 }
 0x605   :  { %v997_v45 = vadd.f32 %v1317_v37, %v988_v39  ;;  %v980_v46 = vmul.f32 %v1743_v43, %v2129_v54  ;;  %v131_v54 = vld [vmem:[%s2289_s17 + $0x20] sm:$0xff] }
 0x606   :  { %v1710_v58 = vpack.c.bf16 %v132_v55, %v131_v54 }
 0x607   :  { %1583 = vmatmul.mubr.msk.f32.vlgmr.msra.gmra.mrb[14].mxu0 %vm136_vm1, %v997_v45  ;;  %v989_v47 = vmul.f32 %v1316_v34, %v980_v46 }
 0x608   :  { %v1745_v48 = vpop.eup %1744  ;;  %1585 = vmatprep.mubr.msk.f32.mxu0 %vm1747_vm0, %v1748_v4  ;;  %1711 = vmatpush3.bf16.msra.mxu1 %v1710_v58 }
 0x609   :  { %v998_v51 = vadd.f32 %v1317_v37, %v989_v47  ;;  %v981_v52 = vmul.f32 %v1745_v48, %v2134_v40  ;;  %1712 = vmatprep.subr.bf16.mxu1 %v1746_v0  ;;  %v133_v40 = vld [vmem:[%s2289_s17 + $0x30] sm:$0xff] }
 0x60a   :  { %v1713_v62 = vpack.c.bf16 %v134_v61, %v133_v40 }
 0x60b   :  { %1586 = vmatmul.mubr.msk.f32.gmra.mrb[16].mxu0 %vm136_vm1, %v998_v51  ;;  %v990_v50 = vmul.f32 %v1316_v34, %v981_v52 }
 0x60c   :  { %1588 = vmatprep.mubr.msk.f32.mxu0 %vm1747_vm0, %v1748_v4  ;;  %1714 = vmatpush3.bf16.msra.mxu1 %v1713_v62 }
 0x60d   :  { %v999_v53 = vadd.f32 %v1317_v37, %v990_v50 }
 0x60f   :  { %1589 = vmatmul.mubr.msk.f32.gmra.mrb[18].mxu0 %vm136_vm1, %v999_v53 }
 0x6da   :  { %v1155_v49 = vpop.f32.mrb[14].mxu0 }
 0x6db   :  { %v1156_v0 = vadd.f32 %v1155_v49, %v1066_v59  ;;  %v1584_v6 = vpop.f32.mrb[15].mxu0 }
 0x6dd   :  { %v1175_v7 = vadd.f32 %v1324_v5, %v1156_v0 }
 0x6de   :  { %v1160_v8 = vpop.f32.mrb[16].mxu0 }
 0x6df   :  { %v1178_v9 = vmax.f32 %v1175_v7, 0.0  ;;  %v1161_v10 = vadd.f32 %v1160_v8, %v1071_v42  ;;  %v1587_v56 = vpop.f32.mrb[17].mxu0 }
 0x6e1   :  { %v1176_v11 = vadd.f32 %v1324_v5, %v1161_v10  ;;  %1608 = vmatmul.mubr.msk.f32.vlgmr.msra.gmra.mrb[18].mxu1 %vm136_vm1, %v1178_v9 }
 0x6e2   :  { %v1165_v57 = vpop.f32.mrb[18].mxu0  ;;  %1610 = vmatprep.mubr.msk.f32.mxu1 %vm1747_vm0, %v1748_v4 }
 0x6e3   :  { %v1179_v63 = vmax.f32 %v1176_v11, 0.0  ;;  %v1166_v12 = vadd.f32 %v1165_v57, %v1076_v2  ;;  %v1590_v13 = vpop.f32.mrb[19].mxu0 }
 0x6e5   :  { %v1177_v14 = vadd.f32 %v1324_v5, %v1166_v12  ;;  %1611 = vmatmul.mubr.msk.f32.gmra.mrb[20].mxu1 %vm136_vm1, %v1179_v63 }
 0x6e6   :  { %1613 = vmatprep.mubr.msk.f32.mxu1 %vm1747_vm0, %v1748_v4 }
 0x6e7   :  { %v1180_v15 = vmax.f32 %v1177_v14, 0.0 }
 0x6e9   :  { %1614 = vmatmul.mubr.msk.f32.gmra.mrb[22].mxu1 %vm136_vm1, %v1180_v15 }
 0x7b4   :  { %v1262_v17 = vpop.f32.mrb[18].mxu1 }
 0x7b5   :  { %v1263_v18 = vadd.f32 %v1325_v16, %v1262_v17  ;;  %v1609_v19 = vpop.f32.mrb[19].mxu1 }
 0x7b7   :  { %1276 = vst.msk [vmem:[%s2294_s19] sm:$0xff] %vm136_vm1, %v1263_v18 }
 0x7b8   :  { %v1267_v20 = vpop.f32.mrb[20].mxu1 }
 0x7b9   :  { %v1268_v21 = vadd.f32 %v1325_v16, %v1267_v20  ;;  %v1612_v22 = vpop.f32.mrb[21].mxu1 }
 0x7bb   :  { %1277 = vst.msk [vmem:[%s2294_s19 + $0x8] sm:$0xff] %vm136_vm1, %v1268_v21 }
 0x7bc   :  { %v1272_v4 = vpop.f32.mrb[22].mxu1 }
 0x7bd   :  { %v1273_v35 = vadd.f32 %v1325_v16, %v1272_v4  ;;  %v1615_v23 = vpop.f32.mrb[23].mxu1 }
 0x7bf   :  { %1278 = vst.msk [vmem:[%s2294_s19 + $0x10] sm:$0xf] %vm948_vm9, %v1273_v35 }

// kernel: gnn_policy_constraint_forward.12
= control target key start
LH: loop header
LB: loop body
LE: loop exit
PB: predicated region body
PF: predicated region fallthrough
CT: control target
= control target key end

     0   :  { %v1885_v0 = vmov 0.0|0.0   ;;  %vm1886_vm0 = vmmov 0   ;;  %v1887_v4 = vmov 0.0   ;;  %v1888_v9 = vmov 0   ;;  %s2412_s7 = inlined_call_operand.vmem [shape: f32[64,64], index: 7, kind: input, shape index: {}]   ;;  %s2413_s5 = inlined_call_operand.vmem [shape: f32[64,64], index: 5, kind: input, shape index: {}]   ;;  %s2414_s1 = inlined_call_operand.vmem [shape: f32[12,64], index: 1, kind: input, shape index: {}]   ;;  %s2415_s2 = inlined_call_operand.vmem [shape: s32[48,1], index: 2, kind: input, shape index: {}]   ;;  %s2416_s0 = inlined_call_operand.vmem [shape: f32[20,64], index: 0, kind: input, shape index: {}]   ;;  %s2417_s3 = inlined_call_operand.vmem [shape: s32[48,1], index: 3, kind: input, shape index: {}]   ;;  %s2418_s6 = inlined_call_operand.vmem [shape: f32[1,64], index: 6, kind: input, shape index: {}]   ;;  %s2419_s10 = inlined_call_operand.vmem [shape: f32[64,64], index: 10, kind: input, shape index: {}]   ;;  %s2420_s8 = inlined_call_operand.vmem [shape: f32[1,64], index: 8, kind: input, shape index: {}, may-alias: {8,12}]   ;;  %s2421_s9 = inlined_call_operand.vmem [shape: f32[1,64], index: 9, kind: input, shape index: {}, may-alias: {9,13}]   ;;  %s2422_s4 = inlined_call_operand.vmem [shape: s32[1,48], index: 4, kind: input, shape index: {}]   ;;  %s2423_s11 = inlined_call_operand.vmem [shape: f32[1,64], index: 11, kind: input, shape index: {}]   ;;  %s2424_s15 = inlined_call_operand.vmem [shape: f32[64,64], index: 15, kind: input, shape index: {}]   ;;  %s2425_s14 = inlined_call_operand.vmem [shape: f32[64,64], index: 14, kind: input, shape index: {}]   ;;  %s2426_s17 = inlined_call_operand.vmem [shape: f32[64,64], index: 17, kind: input, shape index: {}]   ;;  %s2427_s12 = inlined_call_operand.vmem [shape: f32[1,64], index: 12, kind: input, shape index: {}, may-alias: {8,12}]   ;;  %s2428_s13 = inlined_call_operand.vmem [shape: f32[1,64], index: 13, kind: input, shape index: {}, may-alias: {9,13}]   ;;  %s2429_s19 = inlined_call_operand.vmem [shape: f32[64,64], index: 19, kind: input, shape index: {}]   ;;  %s2430_s16 = inlined_call_operand.vmem [shape: f32[1,64], index: 16, kind: input, shape index: {}]   ;;  %s2431_s18 = inlined_call_operand.vmem [shape: f32[1,64], index: 18, kind: input, shape index: {}]   ;;  %s2432_s22 = inlined_call_operand.vmem [shape: f32[12,64], index: 22, kind: output, shape index: {0}]   ;;  %s2433_s20 = inlined_call_operand.vmem [shape: f32[1,64], index: 20, kind: input, shape index: {}]   ;;  %s2434_s21 = inlined_call_operand.vmem [shape: f32[1,64], index: 21, kind: input, shape index: {}]   ;;  %s2435_s23 = inlined_call_operand.vmem [shape: f32[12,1], index: 23, kind: output, shape index: {1}]  }
   0x1   :  { %2443 = sst [smem:[#allocation2_spill]] %s2412_s7  ;;  %1716 = vmatprep.subr.bf16.mxu0 %v1885_v0  ;;  %1544 = vmatprep.mubr.msk.f32.mxu0 %vm1886_vm0, %v1887_v4  ;;  %vm147_vm1 = vcmask 523264   ;;  %v324_v44 = vlaneseq  ;;  %vm386_vm2 = vcmask 162816   ;;  %vm405_vm4 = vcmask 1043456  }
   0x2   :  { %2444 = sst [smem:[#allocation3_spill]] %s2413_s5  ;;  %s2451_s24 = sld [smem:[#allocation2_spill]]  ;;  %1859 = vset.pattern.permute.xlu0 %v1888_v9  ;;  %1860 = vset.pattern.permute.xlu1 %v1888_v9  ;;  %vm1889_vm7 = vmmov 1   ;;  %vm504_vm13 = vcmask 97280  }
   0x3   :  { %2445 = sst [smem:[#allocation4_spill]] %s2414_s1  ;;  %s2452_s28 = sld [smem:[#allocation3_spill]]  ;;  %v2127_v45 = vand.u32 127, %v324_v44  ;;  %vm1749_vm8 = vmpackc.low %vm405_vm4, %vm1889_vm7  ;;  %vm945_vm7 = vcmask 519168  }
   0x4   :  { %2446 = sst [smem:[#allocation5_spill]] %s2415_s2  ;;  %s2453_s25 = sld [smem:[#allocation4_spill]] }
   0x5   :  { %2447 = sst [smem:[#allocation6_spill]] %s2416_s0 }
   0x6   :  { %2448 = sst [smem:[#allocation7_spill]] %s2417_s3  ;;  %s2455_s2 = sld [smem:[#allocation6_spill]] }
   0x7   :  { %2449 = sst [smem:[#allocation8_spill]] %s2418_s6  ;;  %s2454_s6 = sld [smem:[#allocation5_spill]] }
   0x8   :  { %2450 = sst [smem:[#allocation9_spill]] %s2419_s10  ;;  %v100_v1 = vld [vmem:[%s2451_s24] sm:$0xff]  ;;  %v101_v2 = vld [vmem:[%s2451_s24 + $0x8] sm:$0xff]  ;;  %v102_v3 = vld [vmem:[%s2451_s24 + $0x10] sm:$0xff]  ;;  %s2456_s3 = sld [smem:[#allocation7_spill]] }
   0x9   :  { %v1717_v5 = vpack.c.bf16 %v101_v2, %v100_v1  ;;  %v103_v6 = vld [vmem:[%s2451_s24 + $0x18] sm:$0xff]  ;;  %v91_v7 = vld [vmem:[%s2452_s28] sm:$0xff]  ;;  %v92_v8 = vld [vmem:[%s2452_s28 + $0x8] sm:$0xff] }
   0xa   :  { %v1728_v10 = vpack.c.bf16 %v92_v8, %v91_v7  ;;  %v93_v11 = vld [vmem:[%s2452_s28 + $0x10] sm:$0xff]  ;;  %v1720_v12 = vpack.c.bf16 %v103_v6, %v102_v3  ;;  %v104_v13 = vld [vmem:[%s2451_s24 + $0x20] sm:$0xff]  ;;  %v94_v14 = vld [vmem:[%s2452_s28 + $0x18] sm:$0xff] }
   0xb   :  { %1718 = vmatpush3.bf16.msra.mxu0 %v1717_v5  ;;  %v105_v15 = vld [vmem:[%s2451_s24 + $0x28] sm:$0xff]  ;;  %v1732_v16 = vpack.c.bf16 %v94_v14, %v93_v11  ;;  %v95_v17 = vld [vmem:[%s2452_s28 + $0x20] sm:$0xff]  ;;  %v97_v20 = vld [vmem:[%s2452_s28 + $0x30] sm:$0xff] }
   0xc   :  { %1719 = vmatprep.subr.bf16.mxu0 %v1885_v0  ;;  %1729 = vmatprep.subr.bf16.mxu1 %v1728_v10  ;;  %v96_v18 = vld [vmem:[%s2452_s28 + $0x28] sm:$0xff]  ;;  %v2054_v21 = vld [vmem:[%s2453_s25] sm:$0xff]  ;;  %v1723_v22 = vpack.c.bf16 %v105_v15, %v104_v13  ;;  %v98_v23 = vld [vmem:[%s2452_s28 + $0x38] sm:$0xff] }
   0xd   :  { %1731 = vmatpush3.bf16.msra.mxu1 %v1728_v10  ;;  %v1736_v19 = vpack.c.bf16 %v96_v18, %v95_v17  ;;  %1569 = vmatprep.mubr.msk.f32.mxu1 %vm147_vm1, %v2054_v21  ;;  %v78_v24 = vld [vmem:[%s2454_s6] sm:$0xff]  ;;  %v80_v25 = vld [vmem:[%s2454_s6 + $0x10] sm:$0xff]  ;;  %v107_v27 = vld [vmem:[%s2451_s24 + $0x38] sm:$0xff]  ;;  %v1740_v29 = vpack.c.bf16 %v98_v23, %v97_v20 }
   0xe   :  { %1733 = vmatprep.subr.bf16.mxu1 %v1732_v16  ;;  %v106_v26 = vld [vmem:[%s2451_s24 + $0x30] sm:$0xff]  ;;  %327 = vperm.xlu0 %1859, %v78_v24   ;;  %v79_v28 = vld [vmem:[%s2454_s6 + $0x8] sm:$0xff]  ;;  %v81_v30 = vld [vmem:[%s2454_s6 + $0x18] sm:$0xff] }
   0xf   :  { %1721 = vmatpush3.bf16.msra.mxu0 %v1720_v12  ;;  %333 = vperm.xlu1 %1860, %v80_v25   ;;  %v1726_v31 = vpack.c.bf16 %v107_v27, %v106_v26  ;;  %v82_v32 = vld [vmem:[%s2454_s6 + $0x20] sm:$0xff]  ;;  %v83_v33 = vld [vmem:[%s2454_s6 + $0x28] sm:$0xff]  ;;  %v86_v39 = vld [vmem:[%s2456_s3 + $0x10] sm:$0xff] }
  0x10   :  { %1722 = vmatprep.subr.bf16.mxu0 %v1885_v0  ;;  %v73_v34 = vld [vmem:[%s2455_s2] sm:$0xff]  ;;  %v2091_v35 = vld [vmem:[%s2453_s25 + $0x8] sm:$0xf]  ;;  %v87_v40 = vld [vmem:[%s2456_s3 + $0x18] sm:$0xff]  ;;  %s2458_s25 = sld [smem:[#allocation9_spill]] }
  0x11   :  { %1735 = vmatpush3.bf16.msra.mxu1 %v1732_v16  ;;  %v84_v36 = vld [vmem:[%s2456_s3] sm:$0xff]  ;;  %v85_v37 = vld [vmem:[%s2456_s3 + $0x8] sm:$0xff]  ;;  %v75_v41 = vld [vmem:[%s2455_s2 + $0x10] sm:$0xf] }
  0x12   :  { %1737 = vmatprep.subr.bf16.mxu1 %v1736_v19  ;;  %330 = vperm.xlu0 %1859, %v79_v28   ;;  %v74_v38 = vld [vmem:[%s2455_s2 + $0x8] sm:$0xff]  ;;  %v88_v42 = vld [vmem:[%s2456_s3 + $0x20] sm:$0xff] }
  0x13   :  { %1724 = vmatpush3.bf16.msra.mxu0 %v1723_v22  ;;  %336 = vperm.xlu1 %1860, %v81_v30   ;;  %v89_v43 = vld [vmem:[%s2456_s3 + $0x28] sm:$0xff]  ;;  %s2457_s3 = sld [smem:[#allocation8_spill]] }
  0x14   :  { %1725 = vmatprep.subr.bf16.mxu0 %v1885_v0 }
  0x15   :  { %1739 = vmatpush3.bf16.msra.mxu1 %v1736_v19 }
  0x16   :  { %1741 = vmatprep.subr.bf16.mxu1 %v1740_v29  ;;  %339 = vperm.xlu0 %1859, %v82_v32  }
  0x17   :  { %1727 = vmatpush3.bf16.msra.mxu0 %v1726_v31  ;;  %342 = vperm.xlu1 %1860, %v83_v33  }
  0x19   :  { %1743 = vmatpush3.bf16.msra.mxu1 %v1740_v29  ;;  %v1383_v51 = vld [vmem:[%s2457_s3] ss:$0 sm:$0xff] }
  0x1a   :  { %1545 = vmatmul.mubr.msk.f32.vlgmr.msra.gmra.mrb[0].mxu0 %vm147_vm1, %v73_v34  ;;  %357 = vperm.xlu0 %1859, %v84_v36  }
  0x1b   :  { %1547 = vmatprep.mubr.msk.f32.mxu0 %vm1886_vm0, %v1887_v4  ;;  %360 = vperm.xlu1 %1860, %v85_v37  }
  0x1c   :  { %1570 = vmatmul.mubr.msk.f32.vlgmr.msra.gmra.mrb[0].mxu1 %vm147_vm1, %v2091_v35 }
  0x1e   :  { %1548 = vmatmul.mubr.msk.f32.gmra.mrb[2].mxu0 %vm147_vm1, %v74_v38  ;;  %363 = vperm.xlu0 %1859, %v86_v39  }
  0x1f   :  { %1550 = vmatprep.mubr.msk.f32.mxu0 %vm1886_vm0, %v1887_v4  ;;  %366 = vperm.xlu1 %1860, %v87_v40  }
  0x22   :  { %1551 = vmatmul.mubr.msk.f32.gmra.mrb[4].mxu0 %vm147_vm1, %v75_v41  ;;  %369 = vperm.xlu0 %1859, %v88_v42  }
  0x23   :  { %372 = vperm.xlu1 %1860, %v89_v43  }
  0x8d   :  { %v328_v46 = vpop.permute.xlu0 %327 }
  0x8e   :  { %vm344_vm3 = vcmp.eq.s32.totalorder %v328_v46, %v2127_v45  ;;  %v334_v48 = vpop.permute.xlu1 %333 }
  0x8f   :  { %v350_v47 = vsel %vm344_vm3, 1.0, %v1887_v4  ;;  %vm346_vm5 = vcmp.eq.s32.totalorder %v334_v48, %v2127_v45 }
  0x90   :  { %1578 = vmatprep.mubr.msk.f32.mxu1 %vm386_vm2, %v350_v47  ;;  %v352_v2 = vsel %vm346_vm5, 1.0, %v1887_v4 }
  0x91   :  { %v331_v49 = vpop.permute.xlu0 %330 }
  0x92   :  { %v337_v53 = vpop.permute.xlu1 %336  ;;  %vm345_vm6 = vcmp.eq.s32.totalorder %v331_v49, %v2127_v45 }
  0x93   :  { %v351_v5 = vsel %vm345_vm6, 1.0, %v1887_v4  ;;  %vm347_vm9 = vcmp.eq.s32.totalorder %v337_v53, %v2127_v45 }
  0x94   :  { %v353_v7 = vsel %vm347_vm9, 1.0, %v1887_v4  ;;  %vm1368_vm9 = vcmask 7168  }
  0x95   :  { %v340_v59 = vpop.permute.xlu0 %339 }
  0x96   :  { %v343_v63 = vpop.permute.xlu1 %342  ;;  %vm348_vm10 = vcmp.eq.s32.totalorder %v340_v59, %v2127_v45 }
  0x97   :  { %v354_v8 = vsel %vm348_vm10, 1.0, %v1887_v4  ;;  %vm349_vm11 = vcmp.eq.s32.totalorder %v343_v63, %v2127_v45 }
  0x98   :  { %v355_v10 = vsel %vm349_vm11, 1.0, %v1887_v4 }
  0x99   :  { %v358_v3 = vpop.permute.xlu0 %357 }
  0x9a   :  { %v361_v6 = vpop.permute.xlu1 %360  ;;  %vm374_vm12 = vcmp.eq.s32.totalorder %v358_v3, %v2127_v45  ;;  %v112_v3 = vld [vmem:[%s2458_s25 + $0x10] sm:$0xff] }
  0x9b   :  { %v380_v12 = vsel %vm374_vm12, 1.0, %v1887_v4  ;;  %vm375_vm14 = vcmp.eq.s32.totalorder %v361_v6, %v2127_v45 }
  0x9c   :  { %v381_v14 = vsel %vm375_vm14, 1.0, %v1887_v4 }
  0x9d   :  { %v364_v9 = vpop.permute.xlu0 %363 }
  0x9e   :  { %v367_v11 = vpop.permute.xlu1 %366  ;;  %vm376_vm15 = vcmp.eq.s32.totalorder %v364_v9, %v2127_v45 }
  0x9f   :  { %v382_v15 = vsel %vm376_vm15, 1.0, %v1887_v4  ;;  %vm377_vm0 = vcmp.eq.s32.totalorder %v367_v11, %v2127_v45  ;;  %v117_v11 = vld [vmem:[%s2458_s25 + $0x38] sm:$0xff] }
  0xa0   :  { %v383_v17 = vsel %vm377_vm0, 1.0, %v1887_v4 }
  0xa1   :  { %v370_v13 = vpop.permute.xlu0 %369 }
  0xa2   :  { %vm378_vm3 = vcmp.eq.s32.totalorder %v370_v13, %v2127_v45  ;;  %v373_v16 = vpop.permute.xlu1 %372 }
  0xa3   :  { %v384_v18 = vsel %vm378_vm3, 1.0, %v1887_v4 }
  0xed   :  { %v223_v50 = vpop.f32.mrb[0].mxu0 }
  0xee   :  { %v1546_v52 = vpop.f32.mrb[1].mxu0 }
  0xef   :  { %v1571_v54 = vpop.f32.mrb[0].mxu1 }
  0xf0   :  { %v321_v55 = vadd.f32 %v1571_v54, %v1383_v51  ;;  %v315_v56 = vpop.f32.mrb[1].mxu1 }
  0xf1   :  { %v228_v57 = vpop.f32.mrb[2].mxu0  ;;  %v316_v58 = vadd.f32 %v1383_v51, %v315_v56 }
  0xf2   :  { %v1744_v60 = vpack.c.bf16 %v228_v57, %v223_v50  ;;  %v1549_v61 = vpop.f32.mrb[3].mxu0 }
  0xf3   :  { %v1748_v62 = vpack.c.bf16 %v321_v55, %v316_v58 }
  0xf4   :  { %1745 = vmatprep.subr.bf16.mxu1 %v1744_v60 }
  0xf5   :  { %1747 = vmatpush3.bf16.msra.mxu1 %v1744_v60  ;;  %v233_v0 = vpop.f32.mrb[4].mxu0 }
  0xf6   :  { %v1552_v1 = vpop.f32.mrb[5].mxu0  ;;  %1576 = vmatprep.subr.msk.mxu1 %vm405_vm4, %v233_v0 }
  0xf7   :  { %v111_v1 = vld [vmem:[%s2458_s25 + $0x8] sm:$0xff] }
  0xf9   :  { %1577 = vmatpush3.msk.msra.mxu1 %vm405_vm4, %v233_v0  ;;  %v110_v0 = vld [vmem:[%s2458_s25] sm:$0xff]  ;;  %vm860_vm4 = vcmask 392192  }
  0xfa   :  { %1579 = vmatmul.mubr.msk.f32.vlgmr.msra.gmra.mrb[2].mxu1 %vm386_vm2, %v351_v5  ;;  %1750 = vmatprep.subr.msk.bf16.mxu1 %vm1749_vm8, %v1748_v62  ;;  %v113_v5 = vld [vmem:[%s2458_s25 + $0x18] sm:$0xff] }
  0xfb   :  { %1581 = vmatprep.mubr.msk.f32.mxu1 %vm386_vm2, %v352_v2  ;;  %1753 = vmatpush3.bf16.msk.msra.mxu1 %vm1749_vm8, %v1748_v62  ;;  %v1754_v2 = vpack.c.bf16 %v111_v1, %v110_v0  ;;  %v1758_v6 = vpack.c.bf16 %v113_v5, %v112_v3  ;;  %v1409_v3 = vld [vmem:[%s2422_s4] ss:$0 sm:$0xff]  ;;  %vm1370_vm8 = vcmask 3072  }
  0xfd   :  { %1755 = vmatprep.subr.bf16.mxu0 %v1754_v2 }
  0xfe   :  { %1582 = vmatmul.mubr.msk.f32.gmra.mrb[4].mxu1 %vm386_vm2, %v353_v7  ;;  %1757 = vmatpush3.bf16.msra.mxu0 %v1754_v2  ;;  %v114_v7 = vld [vmem:[%s2458_s25 + $0x20] sm:$0xff] }
  0xff   :  { %1584 = vmatprep.mubr.msk.f32.mxu1 %vm386_vm2, %v354_v8  ;;  %1759 = vmatprep.subr.bf16.mxu0 %v1758_v6  ;;  %v115_v8 = vld [vmem:[%s2458_s25 + $0x28] sm:$0xff] }
 0x100   :  { %v1762_v9 = vpack.c.bf16 %v115_v8, %v114_v7 }
 0x102   :  { %1585 = vmatmul.mubr.msk.f32.gmra.mrb[6].mxu1 %vm386_vm2, %v355_v10  ;;  %vm379_vm2 = vcmp.eq.s32.totalorder %v373_v16, %v2127_v45  ;;  %1761 = vmatpush3.bf16.msra.mxu0 %v1758_v6  ;;  %v116_v10 = vld [vmem:[%s2458_s25 + $0x30] sm:$0xff]  ;;  %v1402_v6 = vld [vmem:[%s2423_s11] ss:$0 sm:$0xff] }
 0x103   :  { %1591 = vmatprep.mubr.msk.f32.mxu1 %vm504_vm13, %v380_v12  ;;  %v385_v19 = vsel %vm379_vm2, 1.0, %v1887_v4  ;;  %1763 = vmatprep.subr.bf16.mxu0 %v1762_v9  ;;  %v1766_v12 = vpack.c.bf16 %v117_v11, %v116_v10 }
 0x106   :  { %1592 = vmatmul.mubr.msk.f32.vlgmr.msra.gmra.mrb[2].mxu1 %vm504_vm13, %v381_v14  ;;  %1765 = vmatpush3.bf16.msra.mxu0 %v1762_v9 }
 0x107   :  { %1594 = vmatprep.mubr.msk.f32.mxu1 %vm504_vm13, %v382_v15  ;;  %1767 = vmatprep.subr.bf16.mxu0 %v1766_v12 }
 0x10a   :  { %1595 = vmatmul.mubr.msk.f32.gmra.mrb[4].mxu1 %vm504_vm13, %v383_v17  ;;  %1769 = vmatpush3.bf16.msra.mxu0 %v1766_v12 }
 0x10b   :  { %1597 = vmatprep.mubr.msk.f32.mxu1 %vm504_vm13, %v384_v18 }
 0x10e   :  { %1598 = vmatmul.mubr.msk.f32.gmra.mrb[6].mxu1 %vm504_vm13, %v385_v19 }
 0x10f   :  { %1656 = vmatprep.mubr.msk.f32.mxu1 %vm147_vm1, %v2054_v21 }
 0x1d9   :  { %v1593_v20 = vpop.f32.mrb[2].mxu1 }
 0x1da   :  { %v592_v22 = vpop.f32.mrb[3].mxu1  ;;  %v624_v23 = vsel %vm147_vm1, %v1593_v20, 0.0 }
 0x1db   :  { %625 = vadd.xlane.f32.xlu1 %v624_v23  ;;  %v621_v24 = vsel %vm147_vm1, %v592_v22, 0.0 }
 0x1dc   :  { %622 = vadd.xlane.f32.xlu0 %v621_v24 }
 0x1dd   :  { %v1596_v25 = vpop.f32.mrb[4].mxu1 }
 0x1de   :  { %v602_v26 = vpop.f32.mrb[5].mxu1  ;;  %v630_v30 = vsel %vm147_vm1, %v1596_v25, 0.0 }
 0x1df   :  { %v627_v27 = vsel %vm147_vm1, %v602_v26, 0.0 }
 0x1e0   :  { %628 = vadd.xlane.f32.xlu0 %v627_v27 }
 0x1e1   :  { %v1599_v28 = vpop.f32.mrb[6].mxu1 }
 0x1e2   :  { %v612_v29 = vpop.f32.mrb[7].mxu1  ;;  %v636_v21 = vsel %vm147_vm1, %v1599_v28, 0.0 }
 0x1e3   :  { %v633_v31 = vsel %vm147_vm1, %v612_v29, 0.0 }
 0x1e4   :  { %631 = vadd.xlane.f32.xlu0 %v630_v30  ;;  %634 = vadd.xlane.f32.xlu1 %v633_v31 }
 0x1e8   :  { %637 = vadd.xlane.f32.xlu0 %v636_v21  ;;  %v1400_v21 = vld [vmem:[%s2420_s8] ss:$0 sm:$0xff] }
 0x268   :  { %v626_v32 = vpop.xlane.xlu1 %625 }
 0x269   :  { %v641_v33 = vmul.f32 0.015625, %v626_v32  ;;  %v623_v34 = vpop.xlane.xlu0 %622 }
 0x26a   :  { %v640_v36 = vmul.f32 0.015625, %v623_v34 }
 0x26b   :  { %v2176_v37 = vsub.f32 %v1593_v20, %v641_v33 }
 0x26c   :  { %v2178_v38 = vsub.f32 %v592_v22, %v640_v36  ;;  %v1401_v36 = vld [vmem:[%s2421_s9] ss:$0 sm:$0xff] }
 0x26d   :  { %v629_v39 = vpop.xlane.xlu0 %628  ;;  %v653_v40 = vmul.f32 %v2176_v37, %v2176_v37 }
 0x26e   :  { %v642_v41 = vmul.f32 0.015625, %v629_v39  ;;  %v652_v42 = vmul.f32 %v2178_v38, %v2178_v38 }
 0x26f   :  { %v661_v43 = vsel %vm147_vm1, %v653_v40, 0.0 }
 0x270   :  { %v2185_v45 = vsub.f32 %v602_v26, %v642_v41  ;;  %662 = vadd.xlane.f32.xlu0 %v661_v43  ;;  %v658_v46 = vsel %vm147_vm1, %v652_v42, 0.0 }
 0x271   :  { %v632_v47 = vpop.xlane.xlu0 %631  ;;  %659 = vadd.xlane.f32.xlu1 %v658_v46  ;;  %v635_v48 = vpop.xlane.xlu1 %634 }
 0x272   :  { %v643_v49 = vmul.f32 0.015625, %v632_v47  ;;  %v644_v50 = vmul.f32 0.015625, %v635_v48  ;;  %v654_v51 = vmul.f32 %v2185_v45, %v2185_v45 }
 0x274   :  { %v2190_v52 = vsub.f32 %v1596_v25, %v643_v49  ;;  %v2192_v53 = vsub.f32 %v612_v29, %v644_v50  ;;  %v664_v54 = vsel %vm147_vm1, %v654_v51, 0.0 }
 0x275   :  { %v638_v55 = vpop.xlane.xlu0 %637  ;;  %665 = vadd.xlane.f32.xlu1 %v664_v54 }
 0x276   :  { %v645_v56 = vmul.f32 0.015625, %v638_v55  ;;  %v655_v57 = vmul.f32 %v2190_v52, %v2190_v52  ;;  %v656_v58 = vmul.f32 %v2192_v53, %v2192_v53 }
 0x278   :  { %v2199_v59 = vsub.f32 %v1599_v28, %v645_v56  ;;  %v667_v60 = vsel %vm147_vm1, %v655_v57, 0.0  ;;  %v670_v61 = vsel %vm147_vm1, %v656_v58, 0.0 }
 0x279   :  { %668 = vadd.xlane.f32.xlu0 %v667_v60  ;;  %671 = vadd.xlane.f32.xlu1 %v670_v61 }
 0x27a   :  { %v657_v62 = vmul.f32 %v2199_v59, %v2199_v59 }
 0x27c   :  { %v673_v63 = vsel %vm147_vm1, %v657_v62, 0.0 }
 0x27d   :  { %674 = vadd.xlane.f32.xlu0 %v673_v63 }
 0x2fd   :  { %v663_v13 = vpop.xlane.xlu0 %662 }
 0x2fe   :  { %v677_v14 = vmul.f32 0.015625, %v663_v13  ;;  %v660_v15 = vpop.xlane.xlu1 %659 }
 0x2ff   :  { %v676_v16 = vmul.f32 0.015625, %v660_v15 }
 0x300   :  { %v683_v17 = vadd.f32 1e-05, %v677_v14 }
 0x301   :  { %v682_v18 = vadd.f32 1e-05, %v676_v16 }
 0x302   :  { %1861 = vrsqrt.f32 %v683_v17  ;;  %v666_v19 = vpop.xlane.xlu1 %665 }
 0x303   :  { %1863 = vrsqrt.f32 %v682_v18  ;;  %v678_v20 = vmul.f32 0.015625, %v666_v19 }
 0x305   :  { %v684_v22 = vadd.f32 1e-05, %v678_v20 }
 0x306   :  { %v669_v23 = vpop.xlane.xlu0 %668  ;;  %v672_v24 = vpop.xlane.xlu1 %671 }
 0x307   :  { %1865 = vrsqrt.f32 %v684_v22  ;;  %v679_v25 = vmul.f32 0.015625, %v669_v23  ;;  %v680_v26 = vmul.f32 0.015625, %v672_v24 }
 0x309   :  { %v685_v27 = vadd.f32 1e-05, %v679_v25  ;;  %v686_v28 = vadd.f32 1e-05, %v680_v26 }
 0x30a   :  { %v675_v29 = vpop.xlane.xlu0 %674 }
 0x30b   :  { %1867 = vrsqrt.f32 %v685_v27  ;;  %v681_v30 = vmul.f32 0.015625, %v675_v29  ;;  %v129_v27 = vld [vmem:[%s2424_s15] sm:$0xff] }
 0x30c   :  { %v1862_v31 = vpop.eup %1861  ;;  %1869 = vrsqrt.f32 %v686_v28  ;;  %v130_v28 = vld [vmem:[%s2424_s15 + $0x8] sm:$0xff] }
 0x30d   :  { %v1864_v32 = vpop.eup %1863  ;;  %v695_v33 = vmul.f32 %v1862_v31, %v2176_v37  ;;  %v687_v34 = vadd.f32 1e-05, %v681_v30  ;;  %v1782_v29 = vpack.c.bf16 %v130_v28, %v129_v27  ;;  %v132_v30 = vld [vmem:[%s2424_s15 + $0x18] sm:$0xff]  ;;  %v1418_v28 = vld [vmem:[%s2430_s16] ss:$0 sm:$0xff] }
 0x30e   :  { %v694_v39 = vmul.f32 %v1864_v32, %v2178_v38  ;;  %v134_v32 = vld [vmem:[%s2424_s15 + $0x28] sm:$0xff] }
 0x30f   :  { %v707_v40 = vmul.f32 %v1400_v21, %v695_v33  ;;  %1871 = vrsqrt.f32 %v687_v34  ;;  %1783 = vmatprep.subr.bf16.mxu1 %v1782_v29 }
 0x310   :  { %v706_v41 = vmul.f32 %v1400_v21, %v694_v39  ;;  %1785 = vmatpush3.bf16.msra.mxu1 %v1782_v29 }
 0x311   :  { %v1866_v42 = vpop.eup %1865  ;;  %v719_v43 = vadd.f32 %v1401_v36, %v707_v40 }
 0x312   :  { %v718_v46 = vadd.f32 %v1401_v36, %v706_v41  ;;  %v696_v47 = vmul.f32 %v1866_v42, %v2185_v45 }
 0x313   :  { %v725_v51 = vmax.f32 %v719_v43, 0.0 }
 0x314   :  { %v724_v48 = vmax.f32 %v718_v46, 0.0  ;;  %v708_v49 = vmul.f32 %v1400_v21, %v696_v47 }
 0x315   :  { %v1868_v50 = vpop.eup %1867 }
 0x316   :  { %v1870_v37 = vpop.eup %1869  ;;  %1616 = vmatprep.mubr.msk.f32.mxu0 %vm147_vm1, %v724_v48  ;;  %v720_v54 = vadd.f32 %v1401_v36, %v708_v49  ;;  %v697_v55 = vmul.f32 %v1868_v50, %v2190_v52  ;;  %v135_v49 = vld [vmem:[%s2424_s15 + $0x30] sm:$0xff]  ;;  %v136_v50 = vld [vmem:[%s2424_s15 + $0x38] sm:$0xff] }
 0x317   :  { %1617 = vmatmul.mubr.msk.f32.vlgmr.msra.gmra.mrb[6].mxu0 %vm147_vm1, %v725_v51  ;;  %v698_v38 = vmul.f32 %v1870_v37, %v2192_v53  ;;  %v850_v53 = vshrl.u32 %v324_v44, 7  ;;  %v1794_v51 = vpack.c.bf16 %v136_v50, %v135_v49  ;;  %v121_v37 = vld [vmem:[%s2425_s14] sm:$0xff] }
 0x318   :  { %v726_v56 = vmax.f32 %v720_v54, 0.0  ;;  %v709_v57 = vmul.f32 %v1400_v21, %v697_v55  ;;  %v122_v54 = vld [vmem:[%s2425_s14 + $0x8] sm:$0xff] }
 0x319   :  { %v1872_v58 = vpop.eup %1871  ;;  %v710_v60 = vmul.f32 %v1400_v21, %v698_v38  ;;  %v851_v5 = vadd.s32 8, %v850_v53  ;;  %vm856_vm5 = vcmp.eq.s32.totalorder %v1409_v3, %v850_v53  ;;  %v1798_v55 = vpack.c.bf16 %v122_v54, %v121_v37  ;;  %v123_v38 = vld [vmem:[%s2425_s14 + $0x10] sm:$0xff]  ;;  %v1422_v37 = vld [vmem:[%s2433_s20] ss:$0 sm:$0xff] }
 0x31a   :  { %1619 = vmatprep.mubr.msk.f32.mxu0 %vm147_vm1, %v726_v56  ;;  %v721_v45 = vadd.f32 %v1401_v36, %v709_v57  ;;  %v699_v61 = vmul.f32 %v1872_v58, %v2199_v59  ;;  %v858_v59 = vsel %vm856_vm5, 1.0, %v1887_v4  ;;  %v124_v56 = vld [vmem:[%s2425_s14 + $0x18] sm:$0xff]  ;;  %v125_v58 = vld [vmem:[%s2425_s14 + $0x20] sm:$0xff] }
 0x31b   :  { %v722_v62 = vadd.f32 %v1401_v36, %v710_v60  ;;  %vm857_vm6 = vcmp.eq.s32.totalorder %v1409_v3, %v851_v5  ;;  %v1802_v57 = vpack.c.bf16 %v124_v56, %v123_v38  ;;  %v142_v3 = vld [vmem:[%s2426_s17 + $0x20] sm:$0xff]  ;;  %v143_v5 = vld [vmem:[%s2426_s17 + $0x28] sm:$0xff] }
 0x31c   :  { %v727_v63 = vmax.f32 %v721_v45, 0.0  ;;  %v711_v0 = vmul.f32 %v1400_v21, %v699_v61  ;;  %v859_v22 = vsel %vm857_vm6, 1.0, %v1887_v4  ;;  %v131_v4 = vld [vmem:[%s2424_s15 + $0x10] sm:$0xff]  ;;  %v133_v21 = vld [vmem:[%s2424_s15 + $0x20] sm:$0xff]  ;;  %v128_v61 = vld [vmem:[%s2425_s14 + $0x38] sm:$0xff] }
 0x31d   :  { %v728_v1 = vmax.f32 %v722_v62, 0.0  ;;  %v1786_v31 = vpack.c.bf16 %v132_v30, %v131_v4  ;;  %v1790_v33 = vpack.c.bf16 %v134_v32, %v133_v21  ;;  %v127_v45 = vld [vmem:[%s2425_s14 + $0x30] sm:$0xff]  ;;  %v1243_v32 = vld [vmem:[%s2429_s19 + $0x18] sm:$0xff] }
 0x31e   :  { %1620 = vmatmul.mubr.msk.f32.gmra.mrb[8].mxu0 %vm147_vm1, %v727_v63  ;;  %v723_v52 = vadd.f32 %v1401_v36, %v711_v0  ;;  %v1810_v62 = vpack.c.bf16 %v128_v61, %v127_v45  ;;  %v138_v63 = vld [vmem:[%s2426_s17] sm:$0xff]  ;;  %v139_v0 = vld [vmem:[%s2426_s17 + $0x8] sm:$0xff]  ;;  %v1242_v21 = vld [vmem:[%s2429_s19 + $0x10] sm:$0xff] }
 0x31f   :  { %1622 = vmatprep.mubr.msk.f32.mxu0 %vm147_vm1, %v728_v1  ;;  %1787 = vmatprep.subr.bf16.mxu1 %v1786_v31  ;;  %v140_v1 = vld [vmem:[%s2426_s17 + $0x10] sm:$0xff] }
 0x320   :  { %v729_v2 = vmax.f32 %v723_v52, 0.0  ;;  %1789 = vmatpush3.bf16.msra.mxu1 %v1786_v31  ;;  %v1814_v52 = vpack.c.bf16 %v139_v0, %v138_v63 }
 0x321   :  { %1791 = vmatprep.subr.bf16.mxu1 %v1790_v33 }
 0x322   :  { %1623 = vmatmul.mubr.msk.f32.gmra.mrb[10].mxu0 %vm147_vm1, %v729_v2  ;;  %v141_v2 = vld [vmem:[%s2426_s17 + $0x18] sm:$0xff] }
 0x323   :  { %1637 = vmatprep.mubr.msk.f32.mxu0 %vm860_vm4, %v858_v59  ;;  %v1818_v53 = vpack.c.bf16 %v141_v2, %v140_v1  ;;  %v1822_v59 = vpack.c.bf16 %v143_v5, %v142_v3 }
 0x324   :  { %1793 = vmatpush3.bf16.msra.mxu1 %v1790_v33 }
 0x325   :  { %1795 = vmatprep.subr.bf16.mxu1 %v1794_v51 }
 0x328   :  { %1797 = vmatpush3.bf16.msra.mxu1 %v1794_v51 }
 0x329   :  { %1799 = vmatprep.subr.bf16.mxu1 %v1798_v55 }
 0x32b   :  { %1657 = vmatmul.mubr.msk.f32.vlgmr.msra.gmra.mrb[8].mxu1 %vm147_vm1, %v2091_v35  ;;  %v126_v35 = vld [vmem:[%s2425_s14 + $0x28] sm:$0xff] }
 0x32c   :  { %1801 = vmatpush3.bf16.msra.mxu1 %v1798_v55  ;;  %v1806_v60 = vpack.c.bf16 %v126_v35, %v125_v58 }
 0x32d   :  { %1803 = vmatprep.subr.bf16.mxu1 %v1802_v57 }
 0x330   :  { %1805 = vmatpush3.bf16.msra.mxu1 %v1802_v57  ;;  %v1425_v57 = vld [vmem:[%s2434_s21] ss:$0 sm:$0xff] }
 0x331   :  { %1807 = vmatprep.subr.bf16.mxu1 %v1806_v60 }
 0x334   :  { %1809 = vmatpush3.bf16.msra.mxu1 %v1806_v60 }
 0x335   :  { %1811 = vmatprep.subr.bf16.mxu1 %v1810_v62 }
 0x338   :  { %1813 = vmatpush3.bf16.msra.mxu1 %v1810_v62 }
 0x3ea   :  { %v1618_v7 = vpop.f32.mrb[6].mxu0 }
 0x3eb   :  { %v826_v8 = vadd.f32 %v1618_v7, %v1402_v6  ;;  %v820_v9 = vpop.f32.mrb[7].mxu0 }
 0x3ec   :  { %v821_v44 = vadd.f32 %v1402_v6, %v820_v9 }
 0x3ee   :  { %v1770_v10 = vpack.c.bf16 %v826_v8, %v821_v44 }
 0x3f0   :  { %1771 = vmatprep.subr.bf16.mxu0 %v1770_v10 }
 0x3f1   :  { %v1621_v11 = vpop.f32.mrb[8].mxu0  ;;  %1773 = vmatpush3.bf16.msra.mxu0 %v1770_v10 }
 0x3f2   :  { %v836_v12 = vadd.f32 %v1621_v11, %v1402_v6  ;;  %v830_v13 = vpop.f32.mrb[9].mxu0 }
 0x3f3   :  { %v831_v14 = vadd.f32 %v1402_v6, %v830_v13 }
 0x3f5   :  { %v1774_v15 = vpack.c.bf16 %v836_v12, %v831_v14  ;;  %v1624_v16 = vpop.f32.mrb[10].mxu0  ;;  %v1412_v12 = vld [vmem:[%s2427_s12] ss:$0 sm:$0xff] }
 0x3f6   :  { %v846_v17 = vadd.f32 %v1624_v16, %v1402_v6  ;;  %v840_v18 = vpop.f32.mrb[11].mxu0  ;;  %v1413_v16 = vld [vmem:[%s2428_s13] ss:$0 sm:$0xff] }
 0x3f7   :  { %v841_v19 = vadd.f32 %v1402_v6, %v840_v18  ;;  %1775 = vmatprep.subr.bf16.mxu0 %v1774_v15 }
 0x3f8   :  { %1777 = vmatpush3.bf16.msra.mxu0 %v1774_v15 }
 0x3f9   :  { %v1778_v20 = vpack.c.bf16 %v846_v17, %v841_v19 }
 0x3fb   :  { %1779 = vmatprep.subr.bf16.mxu0 %v1778_v20 }
 0x3fc   :  { %1781 = vmatpush3.bf16.msra.mxu0 %v1778_v20 }
 0x3fd   :  { %1815 = vmatprep.subr.bf16.mxu0 %v1814_v52 }
 0x3ff   :  { %1638 = vmatmul.mubr.msk.f32.vlgmr.msra.gmra.mrb[12].mxu0 %vm860_vm4, %v859_v22  ;;  %v144_v22 = vld [vmem:[%s2426_s17 + $0x30] sm:$0xff] }
 0x400   :  { %1817 = vmatpush3.bf16.msra.mxu0 %v1814_v52 }
 0x401   :  { %1819 = vmatprep.subr.bf16.mxu0 %v1818_v53 }
 0x404   :  { %1821 = vmatpush3.bf16.msra.mxu0 %v1818_v53 }
 0x405   :  { %1823 = vmatprep.subr.bf16.mxu0 %v1822_v59 }
 0x408   :  { %1825 = vmatpush3.bf16.msra.mxu0 %v1822_v59 }
 0x4d2   :  { %v1639_v23 = vpop.f32.mrb[12].mxu0 }
 0x4d3   :  { %v933_v24 = vpop.f32.mrb[13].mxu0  ;;  %v946_v25 = vsel %vm945_vm7, %v1639_v23, 0.0 }
 0x4d4   :  { %947 = vadd.xlane.f32.xlu0 %v946_v25  ;;  %v942_v26 = vsel %vm147_vm1, %v933_v24, 0.0  ;;  %v1240_v25 = vld [vmem:[%s2429_s19] sm:$0xff] }
 0x4d5   :  { %943 = vadd.xlane.f32.xlu1 %v942_v26  ;;  %v1241_v26 = vld [vmem:[%s2429_s19 + $0x8] sm:$0xff] }
 0x4d6   :  { %v1830_v27 = vpack.c.bf16 %v1241_v26, %v1240_v25 }
 0x561   :  { %v948_v34 = vpop.xlane.xlu0 %947 }
 0x562   :  { %v950_v36 = vmul.f32 0.015625, %v948_v34  ;;  %v944_v39 = vpop.xlane.xlu1 %943 }
 0x563   :  { %v949_v40 = vmul.f32 0.015625, %v944_v39  ;;  %v1244_v39 = vld [vmem:[%s2429_s19 + $0x20] sm:$0xff] }
 0x564   :  { %v2280_v41 = vsub.f32 %v1639_v23, %v950_v36  ;;  %v145_v23 = vld [vmem:[%s2426_s17 + $0x38] sm:$0xff]  ;;  %v1834_v36 = vpack.c.bf16 %v1243_v32, %v1242_v21 }
 0x565   :  { %v2282_v42 = vsub.f32 %v933_v24, %v949_v40  ;;  %v1826_v24 = vpack.c.bf16 %v145_v23, %v144_v22  ;;  %v1245_v40 = vld [vmem:[%s2429_s19 + $0x28] sm:$0xff] }
 0x566   :  { %v954_v43 = vmul.f32 %v2280_v41, %v2280_v41 }
 0x567   :  { %v953_v46 = vmul.f32 %v2282_v42, %v2282_v42  ;;  %1827 = vmatprep.subr.bf16.mxu0 %v1826_v24 }
 0x568   :  { %v958_v47 = vsel %vm945_vm7, %v954_v43, 0.0  ;;  %1829 = vmatpush3.bf16.msra.mxu0 %v1826_v24  ;;  %v1247_v43 = vld [vmem:[%s2429_s19 + $0x38] sm:$0xff] }
 0x569   :  { %959 = vadd.xlane.f32.xlu0 %v958_v47  ;;  %v955_v48 = vsel %vm147_vm1, %v953_v46, 0.0  ;;  %1831 = vmatprep.subr.bf16.mxu0 %v1830_v27  ;;  %v1419_v47 = vld [vmem:[%s2431_s18] ss:$0 sm:$0xff] }
 0x56a   :  { %956 = vadd.xlane.f32.xlu1 %v955_v48 }
 0x5f6   :  { %v960_v6 = vpop.xlane.xlu0 %959 }
 0x5f7   :  { %v962_v7 = vmul.f32 0.015625, %v960_v6  ;;  %v957_v8 = vpop.xlane.xlu1 %956 }
 0x5f8   :  { %v961_v9 = vmul.f32 0.015625, %v957_v8 }
 0x5f9   :  { %v964_v44 = vadd.f32 1e-05, %v962_v7 }
 0x5fa   :  { %v963_v10 = vadd.f32 1e-05, %v961_v9 }
 0x5fb   :  { %1873 = vrsqrt.f32 %v964_v44 }
 0x5fc   :  { %1875 = vrsqrt.f32 %v963_v10 }
 0x605   :  { %v1874_v11 = vpop.eup %1873 }
 0x606   :  { %v1876_v13 = vpop.eup %1875  ;;  %v968_v14 = vmul.f32 %v1874_v11, %v2280_v41  ;;  %v1838_v41 = vpack.c.bf16 %v1245_v40, %v1244_v39 }
 0x607   :  { %v967_v15 = vmul.f32 %v1876_v13, %v2282_v42  ;;  %v1246_v42 = vld [vmem:[%s2429_s19 + $0x30] sm:$0xff] }
 0x608   :  { %v976_v17 = vmul.f32 %v1412_v12, %v968_v14  ;;  %v1842_v46 = vpack.c.bf16 %v1247_v43, %v1246_v42 }
 0x609   :  { %v975_v18 = vmul.f32 %v1412_v12, %v967_v15 }
 0x60a   :  { %v984_v20 = vadd.f32 %v1413_v16, %v976_v17 }
 0x60b   :  { %v983_v19 = vadd.f32 %v1413_v16, %v975_v18 }
 0x60d   :  { %1675 = vmatprep.mubr.msk.f32.mxu1 %vm147_vm1, %v983_v19 }
 0x60e   :  { %1676 = vmatmul.mubr.msk.f32.vlgmr.msra.gmra.mrb[8].mxu1 %vm147_vm1, %v984_v20 }
 0x6e1   :  { %v1677_v4 = vpop.f32.mrb[8].mxu1 }
 0x6e2   :  { %v1148_v29 = vadd.f32 %v1677_v4, %v1418_v28  ;;  %v1132_v30 = vpop.f32.mrb[9].mxu1 }
 0x6e3   :  { %v1147_v31 = vadd.f32 %v1418_v28, %v1132_v30 }
 0x6e4   :  { %v1150_v34 = vmax.f32 %v1148_v29, 0.0 }
 0x6e5   :  { %v1149_v33 = vmax.f32 %v1147_v31, 0.0 }
 0x6e7   :  { %1694 = vmatprep.mubr.msk.f32.mxu0 %vm147_vm1, %v1149_v33 }
 0x6e8   :  { %1695 = vmatmul.mubr.msk.f32.vlgmr.msra.gmra.mrb[14].mxu0 %vm147_vm1, %v1150_v34 }
 0x6e9   :  { %1833 = vmatpush3.bf16.msra.mxu0 %v1830_v27 }
 0x6ea   :  { %1835 = vmatprep.subr.bf16.mxu0 %v1834_v36 }
 0x6ed   :  { %1837 = vmatpush3.bf16.msra.mxu0 %v1834_v36 }
 0x6ee   :  { %1839 = vmatprep.subr.bf16.mxu0 %v1838_v41 }
 0x6f1   :  { %1841 = vmatpush3.bf16.msra.mxu0 %v1838_v41 }
 0x6f2   :  { %1843 = vmatprep.subr.bf16.mxu0 %v1842_v46 }
 0x6f5   :  { %1845 = vmatpush3.bf16.msra.mxu0 %v1842_v46 }
 0x7bb   :  { %v1696_v48 = vpop.f32.mrb[14].mxu0 }
 0x7bc   :  { %v1235_v49 = vadd.f32 %v1696_v48, %v1419_v47  ;;  %v1229_v50 = vpop.f32.mrb[15].mxu0 }
 0x7bd   :  { %v1230_v51 = vadd.f32 %v1419_v47, %v1229_v50 }
 0x7be   :  { %1239 = vst.msk [vmem:[%s2432_s22 + $0x8] sm:$0xf] %vm945_vm7, %v1235_v49 }
 0x7bf   :  { %1238 = vst.msk [vmem:[%s2432_s22] sm:$0xff] %vm147_vm1, %v1230_v51  ;;  %1713 = vmatprep.mubr.msk.f32.mxu0 %vm147_vm1, %v1230_v51 }
 0x7c0   :  { %1714 = vmatmul.mubr.msk.f32.vlgmr.msra.gmra.mrb[16].mxu0 %vm147_vm1, %v1235_v49 }
 0x893   :  { %v1715_v54 = vpop.f32.mrb[16].mxu0 }
 0x894   :  { %v1333_v55 = vadd.f32 %v1715_v54, %v1422_v37  ;;  %v1327_v38 = vpop.f32.mrb[17].mxu0 }
 0x895   :  { %v1328_v56 = vadd.f32 %v1422_v37, %v1327_v38 }
 0x896   :  { %v1337_v58 = vmax.f32 %v1333_v55, 0.0 }
 0x897   :  { %v1336_v35 = vmax.f32 %v1328_v56, 0.0 }
 0x898   :  { %v1346_v60 = vmul.f32 %v1425_v57, %v1337_v58 }
 0x899   :  { %v1345_v45 = vmul.f32 %v1425_v57, %v1336_v35 }
 0x89a   :  { %v1350_v61 = vsel %vm945_vm7, %v1346_v60, 0.0 }
 0x89b   :  { %1351 = vadd.xlane.f32.xlu0 %v1350_v61  ;;  %v1347_v62 = vsel %vm147_vm1, %v1345_v45, 0.0 }
 0x89c   :  { %1348 = vadd.xlane.f32.xlu1 %v1347_v62 }
 0x928   :  { %v1352_v63 = vpop.xlane.xlu0 %1351 }
 0x929   :  { %v1427_v0 = vmul.f32 -1.6666666, %v1352_v63  ;;  %v1349_v1 = vpop.xlane.xlu1 %1348 }
 0x92a   :  { %v1426_v52 = vmul.f32 -1.6666666, %v1349_v1 }
 0x92b   :  { %v1360_v2 = vmul.f32 1.442695, %v1427_v0 }
 0x92c   :  { %v1358_v53 = vmul.f32 1.442695, %v1426_v52 }
 0x92d   :  { %1877 = vpow2.f32 %v1360_v2 }
 0x92e   :  { %1879 = vpow2.f32 %v1358_v53 }
 0x937   :  { %v1878_v3 = vpop.eup %1877 }
 0x938   :  { %v1880_v5 = vpop.eup %1879  ;;  %v1363_v59 = vadd.f32 1.0, %v1878_v3 }
 0x939   :  { %v1362_v6 = vadd.f32 1.0, %v1880_v5 }
 0x93a   :  { %1881 = vrcp.f32 %v1363_v59 }
 0x93b   :  { %1883 = vrcp.f32 %v1362_v6 }
 0x944   :  { %v1882_v7 = vpop.eup %1881 }
 0x945   :  { %v1884_v8 = vpop.eup %1883  ;;  %1371 = vst.msk [vmem:[%s2435_s23 + $0x8] sm:$0xf] %vm1370_vm8, %v1882_v7 }
 0x946   :  { %1369 = vst.msk [vmem:[%s2435_s23] sm:$0xff] %vm1368_vm9, %v1884_v8 }

// kernel: gnn_policy_constraint_forward.13
= control target key start
LH: loop header
LB: loop body
LE: loop exit
PB: predicated region body
PF: predicated region fallthrough
CT: control target
= control target key end

     0   :  { %s2644_s0 = inlined_call_operand.vmem [shape: f32[12,64], index: 0, kind: input, shape index: {}]   ;;  %s2645_s1 = inlined_call_operand.vmem [shape: f32[20,64], index: 1, kind: input, shape index: {}]   ;;  %s2646_s2 = inlined_call_operand.vmem [shape: s32[48,1], index: 2, kind: input, shape index: {}]   ;;  %s2647_s3 = inlined_call_operand.vmem [shape: s32[48,1], index: 3, kind: input, shape index: {}]   ;;  %s2648_s4 = inlined_call_operand.vmem [shape: s32[1,48], index: 4, kind: input, shape index: {}]   ;;  %s2649_s5 = inlined_call_operand.vmem [shape: f32[64,64], index: 5, kind: input, shape index: {}]   ;;  %s2650_s6 = inlined_call_operand.vmem [shape: f32[1,64], index: 6, kind: input, shape index: {}]   ;;  %s2651_s7 = inlined_call_operand.vmem [shape: f32[64,64], index: 7, kind: input, shape index: {}]   ;;  %s2652_s8 = inlined_call_operand.vmem [shape: f32[1,64], index: 8, kind: input, shape index: {}, may-alias: {8,12}]   ;;  %s2653_s9 = inlined_call_operand.vmem [shape: f32[1,64], index: 9, kind: input, shape index: {}, may-alias: {9,13}]   ;;  %s2654_s10 = inlined_call_operand.vmem [shape: f32[64,64], index: 10, kind: input, shape index: {}]   ;;  %s2655_s11 = inlined_call_operand.vmem [shape: f32[1,64], index: 11, kind: input, shape index: {}]   ;;  %s2656_s12 = inlined_call_operand.vmem [shape: f32[1,64], index: 12, kind: input, shape index: {}, may-alias: {8,12}]   ;;  %s2657_s13 = inlined_call_operand.vmem [shape: f32[1,64], index: 13, kind: input, shape index: {}, may-alias: {9,13}]   ;;  %s2658_s14 = inlined_call_operand.vmem [shape: f32[64,64], index: 14, kind: input, shape index: {}]   ;;  %s2659_s15 = inlined_call_operand.vmem [shape: f32[64,64], index: 15, kind: input, shape index: {}]   ;;  %s2660_s16 = inlined_call_operand.vmem [shape: f32[1,64], index: 16, kind: input, shape index: {}]   ;;  %s2661_s17 = inlined_call_operand.vmem [shape: f32[64,64], index: 17, kind: input, shape index: {}]   ;;  %s2662_s18 = inlined_call_operand.vmem [shape: f32[1,64], index: 18, kind: input, shape index: {}]   ;;  %s2663_s19 = inlined_call_operand.vmem [shape: f32[64,64], index: 19, kind: input, shape index: {}]   ;;  %s2664_s20 = inlined_call_operand.vmem [shape: f32[1,64], index: 20, kind: input, shape index: {}]   ;;  %s2665_s21 = inlined_call_operand.vmem [shape: f32[1,64], index: 21, kind: input, shape index: {}]   ;;  %s2666_s22 = inlined_call_operand.hbm [shape: f32[20,64], index: 22, kind: output, shape index: {0}]   ;;  %s2667_s23 = inlined_call_operand.vmem [shape: f32[20,1], index: 23, kind: output, shape index: {1}]  }
   0x1   :  { %2674 = sst [smem:[#allocation5_spill]] %s2644_s0 }
   0x2   :  { %2675 = sst [smem:[#allocation6_spill]] %s2645_s1 }
   0x3   :  { %2676 = sst [smem:[#allocation7_spill]] %s2646_s2 }
   0x4   :  { %2677 = sst [smem:[#allocation8_spill]] %s2647_s3 }
   0x5   :  { %2678 = sst [smem:[#allocation9_spill]] %s2648_s4 }
   0x6   :  { %2679 = sst [smem:[#allocation10_spill]] %s2649_s5 }
   0x7   :  { %2680 = sst [smem:[#allocation11_spill]] %s2650_s6 }
   0x8   :  { %2681 = sst [smem:[#allocation12_spill]] %s2651_s7 }
   0x9   :  { %s2682_s24 = sld [smem:[#allocation12_spill]]  ;;  %s2683_s2 = sld [smem:[#allocation10_spill]]  ;;  %v2030_v3 = vmov 0.0|0.0   ;;  %vm2031_vm0 = vmmov 0   ;;  %v2032_v8 = vmov 0.0   ;;  %v2033_v14 = vmov 0  }
   0xa   :  { %1857 = vmatprep.subr.bf16.mxu1 %v2030_v3  ;;  %1658 = vmatprep.mubr.msk.f32.mxu1 %vm2031_vm0, %v2032_v8  ;;  %vm148_vm1 = vcmask 523264   ;;  %s2684_s4 = sld [smem:[#allocation5_spill]]  ;;  %s2685_s27 = sld [smem:[#allocation7_spill]] }
   0xb   :  { %1974 = vset.pattern.permute.xlu0 %v2033_v14  ;;  %1975 = vset.pattern.permute.xlu1 %v2033_v14 }
   0xf   :  { %v101_v0 = vld [vmem:[%s2682_s24] sm:$0xff]  ;;  %v102_v1 = vld [vmem:[%s2682_s24 + $0x8] sm:$0xff]  ;;  %v103_v6 = vld [vmem:[%s2682_s24 + $0x10] sm:$0xff] }
  0x10   :  { %v92_v2 = vld [vmem:[%s2683_s2] sm:$0xff]  ;;  %v1841_v4 = vpack.c.bf16 %v102_v1, %v101_v0  ;;  %v93_v5 = vld [vmem:[%s2683_s2 + $0x8] sm:$0xff]  ;;  %v104_v7 = vld [vmem:[%s2682_s24 + $0x18] sm:$0xff] }
  0x11   :  { %v1858_v9 = vpack.c.bf16 %v93_v5, %v92_v2  ;;  %v1845_v10 = vpack.c.bf16 %v104_v7, %v103_v6  ;;  %v94_v11 = vld [vmem:[%s2683_s2 + $0x10] sm:$0xff]  ;;  %v95_v12 = vld [vmem:[%s2683_s2 + $0x18] sm:$0xff]  ;;  %v105_v13 = vld [vmem:[%s2682_s24 + $0x20] sm:$0xff] }
  0x12   :  { %1842 = vmatprep.subr.bf16.mxu0 %v1841_v4  ;;  %v106_v15 = vld [vmem:[%s2682_s24 + $0x28] sm:$0xff]  ;;  %v1861_v16 = vpack.c.bf16 %v95_v12, %v94_v11  ;;  %v96_v18 = vld [vmem:[%s2683_s2 + $0x20] sm:$0xff]  ;;  %v107_v21 = vld [vmem:[%s2682_s24 + $0x30] sm:$0xff] }
  0x13   :  { %1859 = vmatpush3.bf16.msra.mxu1 %v1858_v9  ;;  %1844 = vmatpush3.bf16.msra.mxu0 %v1841_v4  ;;  %v1849_v17 = vpack.c.bf16 %v106_v15, %v105_v13  ;;  %v97_v19 = vld [vmem:[%s2683_s2 + $0x28] sm:$0xff]  ;;  %v74_v20 = vld [vmem:[%s2684_s4] sm:$0xff]  ;;  %v108_v22 = vld [vmem:[%s2682_s24 + $0x38] sm:$0xff] }
  0x14   :  { %1860 = vmatprep.subr.bf16.mxu1 %v2030_v3  ;;  %1846 = vmatprep.subr.bf16.mxu0 %v1845_v10  ;;  %v79_v23 = vld [vmem:[%s2685_s27] sm:$0xff]  ;;  %v81_v24 = vld [vmem:[%s2685_s27 + $0x10] sm:$0xff]  ;;  %v1864_v25 = vpack.c.bf16 %v97_v19, %v96_v18  ;;  %v1853_v26 = vpack.c.bf16 %v108_v22, %v107_v21  ;;  %v99_v28 = vld [vmem:[%s2683_s2 + $0x38] sm:$0xff] }
  0x15   :  { %1639 = vmatprep.mubr.msk.f32.mxu0 %vm148_vm1, %v74_v20  ;;  %v98_v27 = vld [vmem:[%s2683_s2 + $0x30] sm:$0xff]  ;;  %328 = vperm.xlu0 %1974, %v79_v23   ;;  %v80_v29 = vld [vmem:[%s2685_s27 + $0x8] sm:$0xff]  ;;  %v82_v30 = vld [vmem:[%s2685_s27 + $0x18] sm:$0xff] }
  0x16   :  { %334 = vperm.xlu1 %1975, %v81_v24  }
  0x17   :  { %1862 = vmatpush3.bf16.msra.mxu1 %v1861_v16  ;;  %1848 = vmatpush3.bf16.msra.mxu0 %v1845_v10 }
  0x18   :  { %1863 = vmatprep.subr.bf16.mxu1 %v2030_v3  ;;  %1850 = vmatprep.subr.bf16.mxu0 %v1849_v17 }
  0x19   :  { %29 = vsyncpa [#allocation3], 0  ;;  %v1867_v31 = vpack.c.bf16 %v99_v28, %v98_v27  ;;  %331 = vperm.xlu0 %1974, %v80_v29   ;;  %v83_v32 = vld [vmem:[%s2685_s27 + $0x20] sm:$0xff]  ;;  %v84_v33 = vld [vmem:[%s2685_s27 + $0x28] sm:$0xff]  ;;  %s2686_s3 = sld [smem:[#allocation6_spill]]  ;;  %s2687_s25 = sld [smem:[#allocation8_spill]]  ;;  %v325_v44 = vlaneseq }
  0x1a   :  { %337 = vperm.xlu1 %1975, %v82_v30   ;;  %v75_v35 = vld [vmem:[%s2684_s4 + $0x8] sm:$0xf]  ;;  %vm387_vm2 = vcmask 97280   ;;  %vm406_vm4 = vcmask 1043456   ;;  %s2688_s1 = sld [smem:[#allocation11_spill]]  ;;  %vm2034_vm5 = vmmov 1  }
  0x1b   :  { %1865 = vmatpush3.bf16.msra.mxu1 %v1864_v25  ;;  %1852 = vmatpush3.bf16.msra.mxu0 %v1849_v17  ;;  %v2282_v45 = vand.u32 127, %v325_v44  ;;  %vm1870_vm6 = vmpackc.low %vm406_vm4, %vm2034_vm5  ;;  %vm505_vm13 = vcmask 162816   ;;  %s2689_s29 = sld [smem:[#allocation9_spill]] }
  0x1c   :  { %1866 = vmatprep.subr.bf16.mxu1 %v2030_v3  ;;  %1854 = vmatprep.subr.bf16.mxu0 %v1853_v26 }
  0x1d   :  { %340 = vperm.xlu0 %1974, %v83_v32  }
  0x1e   :  { %343 = vperm.xlu1 %1975, %v84_v33  }
  0x1f   :  { %1868 = vmatpush3.bf16.msra.mxu1 %v1867_v31  ;;  %1856 = vmatpush3.bf16.msra.mxu0 %v1853_v26  ;;  %v2237_v34 = vld [vmem:[%s2686_s3] sm:$0xff]  ;;  %v86_v37 = vld [vmem:[%s2687_s25 + $0x8] sm:$0xff]  ;;  %v87_v39 = vld [vmem:[%s2687_s25 + $0x10] sm:$0xff] }
  0x20   :  { %v85_v36 = vld [vmem:[%s2687_s25] sm:$0xff]  ;;  %v2256_v38 = vld [vmem:[%s2686_s3 + $0x8] sm:$0xff]  ;;  %v88_v40 = vld [vmem:[%s2687_s25 + $0x18] sm:$0xff] }
  0x21   :  { %358 = vperm.xlu0 %1974, %v85_v36   ;;  %v2271_v41 = vld [vmem:[%s2686_s3 + $0x10] sm:$0xf]  ;;  %v89_v42 = vld [vmem:[%s2687_s25 + $0x20] sm:$0xff]  ;;  %v90_v43 = vld [vmem:[%s2687_s25 + $0x28] sm:$0xff] }
  0x22   :  { %1659 = vmatmul.mubr.msk.f32.vlgmr.msra.gmra.mrb[0].mxu1 %vm148_vm1, %v2237_v34  ;;  %1640 = vmatmul.mubr.msk.f32.vlgmr.msra.gmra.mrb[0].mxu0 %vm148_vm1, %v75_v35  ;;  %v1466_v52 = vld [vmem:[%s2688_s1] ss:$0 sm:$0xff] }
  0x23   :  { %1661 = vmatprep.mubr.msk.f32.mxu1 %vm2031_vm0, %v2032_v8  ;;  %361 = vperm.xlu1 %1975, %v86_v37  }
  0x25   :  { %364 = vperm.xlu0 %1974, %v87_v39  }
  0x26   :  { %1662 = vmatmul.mubr.msk.f32.gmra.mrb[2].mxu1 %vm148_vm1, %v2256_v38 }
  0x27   :  { %1664 = vmatprep.mubr.msk.f32.mxu1 %vm2031_vm0, %v2032_v8  ;;  %367 = vperm.xlu1 %1975, %v88_v40  }
  0x29   :  { %370 = vperm.xlu0 %1974, %v89_v42  }
  0x2a   :  { %1665 = vmatmul.mubr.msk.f32.gmra.mrb[4].mxu1 %vm148_vm1, %v2271_v41 }
  0x2b   :  { %373 = vperm.xlu1 %1975, %v90_v43  }
  0x94   :  { %v329_v46 = vpop.permute.xlu0 %328 }
  0x95   :  { %vm345_vm3 = vcmp.eq.s32.totalorder %v329_v46, %v2282_v45  ;;  %v335_v48 = vpop.permute.xlu1 %334 }
  0x96   :  { %v351_v47 = vsel %vm345_vm3, 1.0, %v2032_v8  ;;  %vm347_vm7 = vcmp.eq.s32.totalorder %v335_v48, %v2282_v45 }
  0x97   :  { %1671 = vmatprep.mubr.msk.f32.mxu0 %vm387_vm2, %v351_v47  ;;  %v353_v63 = vsel %vm347_vm7, 1.0, %v2032_v8 }
  0x98   :  { %v332_v49 = vpop.permute.xlu0 %331 }
  0x99   :  { %v338_v50 = vpop.permute.xlu1 %337  ;;  %vm346_vm8 = vcmp.eq.s32.totalorder %v332_v49, %v2282_v45 }
  0x9a   :  { %v352_v1 = vsel %vm346_vm8, 1.0, %v2032_v8  ;;  %vm348_vm9 = vcmp.eq.s32.totalorder %v338_v50, %v2282_v45 }
  0x9b   :  { %v354_v9 = vsel %vm348_vm9, 1.0, %v2032_v8  ;;  %vm960_vm9 = vcmask 519168  }
  0x9c   :  { %v341_v51 = vpop.permute.xlu0 %340 }
  0x9d   :  { %v344_v58 = vpop.permute.xlu1 %343  ;;  %vm349_vm10 = vcmp.eq.s32.totalorder %v341_v51, %v2282_v45 }
  0x9e   :  { %v355_v10 = vsel %vm349_vm10, 1.0, %v2032_v8  ;;  %vm350_vm11 = vcmp.eq.s32.totalorder %v344_v58, %v2282_v45 }
  0x9f   :  { %v356_v12 = vsel %vm350_vm11, 1.0, %v2032_v8 }
  0xa0   :  { %v359_v0 = vpop.permute.xlu0 %358 }
  0xa1   :  { %vm375_vm12 = vcmp.eq.s32.totalorder %v359_v0, %v2282_v45 }
  0xa2   :  { %v362_v5 = vpop.permute.xlu1 %361  ;;  %v381_v14 = vsel %vm375_vm12, 1.0, %v2032_v8 }
  0xa3   :  { %vm376_vm14 = vcmp.eq.s32.totalorder %v362_v5, %v2282_v45  ;;  %v111_v5 = vld [vmem:[%s2654_s10] sm:$0xff] }
  0xa4   :  { %v365_v11 = vpop.permute.xlu0 %364  ;;  %v382_v16 = vsel %vm376_vm14, 1.0, %v2032_v8 }
  0xa5   :  { %vm377_vm15 = vcmp.eq.s32.totalorder %v365_v11, %v2282_v45 }
  0xa6   :  { %v368_v13 = vpop.permute.xlu1 %367  ;;  %v383_v17 = vsel %vm377_vm15, 1.0, %v2032_v8 }
  0xa7   :  { %vm378_vm3 = vcmp.eq.s32.totalorder %v368_v13, %v2282_v45  ;;  %v116_v13 = vld [vmem:[%s2654_s10 + $0x28] sm:$0xff] }
  0xa8   :  { %v371_v15 = vpop.permute.xlu0 %370  ;;  %v384_v19 = vsel %vm378_vm3, 1.0, %v2032_v8 }
  0xaa   :  { %v374_v18 = vpop.permute.xlu1 %373 }
  0xf5   :  { %v311_v53 = vpop.f32.mrb[0].mxu1  ;;  %v1641_v54 = vpop.f32.mrb[0].mxu0 }
  0xf6   :  { %v1660_v55 = vpop.f32.mrb[1].mxu1  ;;  %v221_v56 = vpop.f32.mrb[1].mxu0  ;;  %v312_v59 = vadd.f32 %v1466_v52, %v311_v53 }
  0xf7   :  { %v1869_v57 = vpack.c.bf16 %v1641_v54, %v221_v56 }
  0xf9   :  { %v316_v60 = vpop.f32.mrb[2].mxu1  ;;  %1871 = vmatprep.subr.msk.bf16.mxu0 %vm1870_vm6, %v1869_v57 }
  0xfa   :  { %v317_v61 = vadd.f32 %v1466_v52, %v316_v60  ;;  %v1663_v62 = vpop.f32.mrb[3].mxu1  ;;  %1874 = vmatpush3.bf16.msk.msra.mxu0 %vm1870_vm6, %v1869_v57  ;;  %vm864_vm6 = vcmask 392192  }
  0xfc   :  { %v1875_v2 = vpack.c.bf16 %v317_v61, %v312_v59 }
  0xfd   :  { %1672 = vmatmul.mubr.msk.f32.vlgmr.msra.gmra.mrb[2].mxu0 %vm387_vm2, %v352_v1  ;;  %v321_v4 = vpop.f32.mrb[4].mxu1 }
  0xfe   :  { %1876 = vmatprep.subr.bf16.mxu0 %v1875_v2  ;;  %1674 = vmatprep.mubr.msk.f32.mxu0 %vm387_vm2, %v353_v63  ;;  %v322_v6 = vadd.f32 %v1466_v52, %v321_v4  ;;  %v1666_v7 = vpop.f32.mrb[5].mxu1 }
  0xff   :  { %1878 = vmatpush3.bf16.msra.mxu0 %v1875_v2 }
 0x100   :  { %1684 = vmatprep.subr.msk.mxu0 %vm406_vm4, %v322_v6 }
 0x101   :  { %1675 = vmatmul.mubr.msk.f32.gmra.mrb[4].mxu0 %vm387_vm2, %v354_v9  ;;  %v113_v9 = vld [vmem:[%s2654_s10 + $0x10] sm:$0xff] }
 0x102   :  { %1677 = vmatprep.mubr.msk.f32.mxu0 %vm387_vm2, %v355_v10  ;;  %v114_v10 = vld [vmem:[%s2654_s10 + $0x18] sm:$0xff] }
 0x103   :  { %1685 = vmatpush3.msk.msra.mxu0 %vm406_vm4, %v322_v6  ;;  %vm379_vm4 = vcmp.eq.s32.totalorder %v371_v15, %v2282_v45  ;;  %v112_v6 = vld [vmem:[%s2654_s10 + $0x8] sm:$0xff]  ;;  %v1883_v11 = vpack.c.bf16 %v114_v10, %v113_v9  ;;  %v117_v15 = vld [vmem:[%s2654_s10 + $0x30] sm:$0xff] }
 0x104   :  { %1895 = vmatprep.subr.bf16.mxu0 %v2030_v3  ;;  %v385_v20 = vsel %vm379_vm4, 1.0, %v2032_v8  ;;  %v1879_v7 = vpack.c.bf16 %v112_v6, %v111_v5 }
 0x105   :  { %1678 = vmatmul.mubr.msk.f32.gmra.mrb[6].mxu0 %vm387_vm2, %v356_v12  ;;  %vm380_vm2 = vcmp.eq.s32.totalorder %v374_v18, %v2282_v45  ;;  %v115_v12 = vld [vmem:[%s2654_s10 + $0x20] sm:$0xff] }
 0x106   :  { %1686 = vmatprep.mubr.msk.f32.mxu0 %vm505_vm13, %v381_v14  ;;  %v386_v21 = vsel %vm380_vm2, 1.0, %v2032_v8  ;;  %1880 = vmatprep.subr.bf16.mxu1 %v1879_v7  ;;  %v1887_v14 = vpack.c.bf16 %v116_v13, %v115_v12 }
 0x107   :  { %1882 = vmatpush3.bf16.msra.mxu1 %v1879_v7 }
 0x108   :  { %1884 = vmatprep.subr.bf16.mxu1 %v1883_v11 }
 0x109   :  { %1687 = vmatmul.mubr.msk.f32.vlgmr.msra.gmra.mrb[2].mxu0 %vm505_vm13, %v382_v16  ;;  %v118_v16 = vld [vmem:[%s2654_s10 + $0x38] sm:$0xff] }
 0x10a   :  { %1689 = vmatprep.mubr.msk.f32.mxu0 %vm505_vm13, %v383_v17  ;;  %v1891_v17 = vpack.c.bf16 %v118_v16, %v117_v15 }
 0x10b   :  { %1886 = vmatpush3.bf16.msra.mxu1 %v1883_v11 }
 0x10c   :  { %1888 = vmatprep.subr.bf16.mxu1 %v1887_v14 }
 0x10d   :  { %1690 = vmatmul.mubr.msk.f32.gmra.mrb[4].mxu0 %vm505_vm13, %v384_v19 }
 0x10e   :  { %1692 = vmatprep.mubr.msk.f32.mxu0 %vm505_vm13, %v385_v20 }
 0x10f   :  { %1890 = vmatpush3.bf16.msra.mxu1 %v1887_v14 }
 0x110   :  { %1892 = vmatprep.subr.bf16.mxu1 %v1891_v17 }
 0x111   :  { %1693 = vmatmul.mubr.msk.f32.gmra.mrb[6].mxu0 %vm505_vm13, %v386_v21 }
 0x112   :  { %1732 = vmatprep.mubr.msk.f32.mxu0 %vm2031_vm0, %v2032_v8 }
 0x113   :  { %1894 = vmatpush3.bf16.msra.mxu1 %v1891_v17 }
 0x114   :  { %1904 = vmatprep.subr.bf16.mxu1 %v2030_v3 }
 0x1dc   :  { %v1688_v22 = vpop.f32.mrb[2].mxu0 }
 0x1dd   :  { %v593_v23 = vpop.f32.mrb[3].mxu0  ;;  %v625_v24 = vsel %vm148_vm1, %v1688_v22, 0.0 }
 0x1de   :  { %626 = vadd.xlane.f32.xlu1 %v625_v24  ;;  %v622_v25 = vsel %vm148_vm1, %v593_v23, 0.0 }
 0x1df   :  { %623 = vadd.xlane.f32.xlu0 %v622_v25 }
 0x1e0   :  { %v1691_v26 = vpop.f32.mrb[4].mxu0 }
 0x1e1   :  { %v603_v27 = vpop.f32.mrb[5].mxu0  ;;  %v631_v31 = vsel %vm148_vm1, %v1691_v26, 0.0 }
 0x1e2   :  { %v628_v28 = vsel %vm148_vm1, %v603_v27, 0.0 }
 0x1e3   :  { %629 = vadd.xlane.f32.xlu0 %v628_v28 }
 0x1e4   :  { %v1694_v29 = vpop.f32.mrb[6].mxu0 }
 0x1e5   :  { %v613_v30 = vpop.f32.mrb[7].mxu0  ;;  %v637_v33 = vsel %vm148_vm1, %v1694_v29, 0.0 }
 0x1e6   :  { %v634_v32 = vsel %vm148_vm1, %v613_v30, 0.0 }
 0x1e7   :  { %632 = vadd.xlane.f32.xlu0 %v631_v31  ;;  %635 = vadd.xlane.f32.xlu1 %v634_v32 }
 0x1eb   :  { %638 = vadd.xlane.f32.xlu0 %v637_v33 }
 0x26b   :  { %v627_v35 = vpop.xlane.xlu1 %626 }
 0x26c   :  { %v642_v36 = vmul.f32 0.015625, %v627_v35  ;;  %v624_v37 = vpop.xlane.xlu0 %623 }
 0x26d   :  { %v641_v39 = vmul.f32 0.015625, %v624_v37  ;;  %v1484_v37 = vld [vmem:[%s2652_s8] ss:$0 sm:$0xff] }
 0x26e   :  { %v2335_v40 = vsub.f32 %v1688_v22, %v642_v36 }
 0x26f   :  { %v2337_v42 = vsub.f32 %v593_v23, %v641_v39 }
 0x270   :  { %v630_v43 = vpop.xlane.xlu0 %629  ;;  %v654_v45 = vmul.f32 %v2335_v40, %v2335_v40 }
 0x271   :  { %v643_v46 = vmul.f32 0.015625, %v630_v43  ;;  %v653_v47 = vmul.f32 %v2337_v42, %v2337_v42 }
 0x272   :  { %v662_v48 = vsel %vm148_vm1, %v654_v45, 0.0 }
 0x273   :  { %v2344_v49 = vsub.f32 %v603_v27, %v643_v46  ;;  %663 = vadd.xlane.f32.xlu0 %v662_v48  ;;  %v659_v50 = vsel %vm148_vm1, %v653_v47, 0.0  ;;  %v1485_v46 = vld [vmem:[%s2653_s9] ss:$0 sm:$0xff] }
 0x274   :  { %v633_v51 = vpop.xlane.xlu0 %632  ;;  %660 = vadd.xlane.f32.xlu1 %v659_v50  ;;  %v636_v52 = vpop.xlane.xlu1 %635 }
 0x275   :  { %v644_v53 = vmul.f32 0.015625, %v633_v51  ;;  %v645_v54 = vmul.f32 0.015625, %v636_v52  ;;  %v655_v55 = vmul.f32 %v2344_v49, %v2344_v49 }
 0x277   :  { %v2349_v56 = vsub.f32 %v1691_v26, %v644_v53  ;;  %v2351_v57 = vsub.f32 %v613_v30, %v645_v54  ;;  %v665_v58 = vsel %vm148_vm1, %v655_v55, 0.0 }
 0x278   :  { %v639_v59 = vpop.xlane.xlu0 %638  ;;  %666 = vadd.xlane.f32.xlu1 %v665_v58 }
 0x279   :  { %v646_v60 = vmul.f32 0.015625, %v639_v59  ;;  %v656_v61 = vmul.f32 %v2349_v56, %v2349_v56  ;;  %v657_v62 = vmul.f32 %v2351_v57, %v2351_v57 }
 0x27b   :  { %v2358_v63 = vsub.f32 %v1694_v29, %v646_v60  ;;  %v668_v0 = vsel %vm148_vm1, %v656_v61, 0.0  ;;  %v671_v1 = vsel %vm148_vm1, %v657_v62, 0.0 }
 0x27c   :  { %669 = vadd.xlane.f32.xlu0 %v668_v0  ;;  %672 = vadd.xlane.f32.xlu1 %v671_v1 }
 0x27d   :  { %v658_v2 = vmul.f32 %v2358_v63, %v2358_v63 }
 0x27f   :  { %v674_v4 = vsel %vm148_vm1, %v658_v2, 0.0 }
 0x280   :  { %675 = vadd.xlane.f32.xlu0 %v674_v4 }
 0x300   :  { %v664_v18 = vpop.xlane.xlu0 %663 }
 0x301   :  { %v678_v19 = vmul.f32 0.015625, %v664_v18  ;;  %v661_v20 = vpop.xlane.xlu1 %660 }
 0x302   :  { %v677_v21 = vmul.f32 0.015625, %v661_v20  ;;  %v851_v20 = vshrl.u32 %v325_v44, 7 }
 0x303   :  { %v684_v22 = vadd.f32 1e-05, %v678_v19 }
 0x304   :  { %v683_v23 = vadd.f32 1e-05, %v677_v21  ;;  %v853_v44 = vadd.s32 16, %v851_v20 }
 0x305   :  { %1976 = vrsqrt.f32 %v684_v22  ;;  %v667_v24 = vpop.xlane.xlu1 %666 }
 0x306   :  { %1978 = vrsqrt.f32 %v683_v23  ;;  %v679_v25 = vmul.f32 0.015625, %v667_v24  ;;  %v1493_v23 = vld [vmem:[%s2689_s29] ss:$0 sm:$0xff] }
 0x307   :  { %vm858_vm5 = vcmp.eq.s32.totalorder %v1493_v23, %v851_v20  ;;  %vm860_vm8 = vcmp.eq.s32.totalorder %v1493_v23, %v853_v44 }
 0x308   :  { %v685_v26 = vadd.f32 1e-05, %v679_v25 }
 0x309   :  { %v670_v27 = vpop.xlane.xlu0 %669  ;;  %v673_v28 = vpop.xlane.xlu1 %672 }
 0x30a   :  { %1980 = vrsqrt.f32 %v685_v26  ;;  %v680_v29 = vmul.f32 0.015625, %v670_v27  ;;  %v681_v30 = vmul.f32 0.015625, %v673_v28  ;;  %v852_v27 = vadd.s32 8, %v851_v20  ;;  %v129_v20 = vld [vmem:[%s2658_s14 + $0x38] sm:$0xff] }
 0x30c   :  { %v686_v31 = vadd.f32 1e-05, %v680_v29  ;;  %v687_v32 = vadd.f32 1e-05, %v681_v30  ;;  %v861_v29 = vsel %vm858_vm5, 1.0, %v2032_v8  ;;  %vm859_vm7 = vcmp.eq.s32.totalorder %v1493_v23, %v852_v27  ;;  %v141_v23 = vld [vmem:[%s2661_s17 + $0x10] sm:$0xff] }
 0x30d   :  { %v676_v33 = vpop.xlane.xlu0 %675  ;;  %v862_v30 = vsel %vm859_vm7, 1.0, %v2032_v8 }
 0x30e   :  { %1982 = vrsqrt.f32 %v686_v31  ;;  %v682_v35 = vmul.f32 0.015625, %v676_v33  ;;  %v863_v31 = vsel %vm860_vm8, 1.0, %v2032_v8 }
 0x30f   :  { %v1977_v36 = vpop.eup %1976  ;;  %1984 = vrsqrt.f32 %v687_v32 }
 0x310   :  { %v1979_v39 = vpop.eup %1978  ;;  %v696_v43 = vmul.f32 %v1977_v36, %v2335_v40  ;;  %v688_v45 = vadd.f32 1e-05, %v682_v35 }
 0x311   :  { %v695_v47 = vmul.f32 %v1979_v39, %v2337_v42 }
 0x312   :  { %v708_v48 = vmul.f32 %v1484_v37, %v696_v43  ;;  %1986 = vrsqrt.f32 %v688_v45 }
 0x313   :  { %v707_v50 = vmul.f32 %v1484_v37, %v695_v47 }
 0x314   :  { %v1981_v51 = vpop.eup %1980  ;;  %v720_v52 = vadd.f32 %v1485_v46, %v708_v48 }
 0x315   :  { %v719_v53 = vadd.f32 %v1485_v46, %v707_v50  ;;  %v697_v54 = vmul.f32 %v1981_v51, %v2344_v49 }
 0x316   :  { %v726_v60 = vmax.f32 %v720_v52, 0.0 }
 0x317   :  { %v725_v55 = vmax.f32 %v719_v53, 0.0  ;;  %v709_v58 = vmul.f32 %v1484_v37, %v697_v54 }
 0x318   :  { %v1983_v59 = vpop.eup %1982 }
 0x319   :  { %v1985_v40 = vpop.eup %1984  ;;  %1711 = vmatprep.mubr.msk.f32.mxu1 %vm148_vm1, %v725_v55  ;;  %v721_v61 = vadd.f32 %v1485_v46, %v709_v58  ;;  %v698_v62 = vmul.f32 %v1983_v59, %v2349_v56 }
 0x31a   :  { %1712 = vmatmul.mubr.msk.f32.vlgmr.msra.gmra.mrb[6].mxu1 %vm148_vm1, %v726_v60  ;;  %v699_v42 = vmul.f32 %v1985_v40, %v2351_v57  ;;  %v1486_v57 = vld [vmem:[%s2655_s11] ss:$0 sm:$0xff] }
 0x31b   :  { %v727_v0 = vmax.f32 %v721_v61, 0.0  ;;  %v710_v1 = vmul.f32 %v1484_v37, %v698_v62 }
 0x31c   :  { %v1987_v2 = vpop.eup %1986  ;;  %v711_v4 = vmul.f32 %v1484_v37, %v699_v42 }
 0x31d   :  { %1714 = vmatprep.mubr.msk.f32.mxu1 %vm148_vm1, %v727_v0  ;;  %v722_v49 = vadd.f32 %v1485_v46, %v710_v1  ;;  %v700_v5 = vmul.f32 %v1987_v2, %v2358_v63  ;;  %v130_v0 = vld [vmem:[%s2659_s15] sm:$0xff]  ;;  %v131_v1 = vld [vmem:[%s2659_s15 + $0x8] sm:$0xff] }
 0x31e   :  { %v723_v6 = vadd.f32 %v1485_v46, %v711_v4  ;;  %v1905_v2 = vpack.c.bf16 %v131_v1, %v130_v0  ;;  %v122_v4 = vld [vmem:[%s2658_s14] sm:$0xff] }
 0x31f   :  { %v728_v7 = vmax.f32 %v722_v49, 0.0  ;;  %v712_v9 = vmul.f32 %v1484_v37, %v700_v5  ;;  %v123_v49 = vld [vmem:[%s2658_s14 + $0x8] sm:$0xff] }
 0x320   :  { %v729_v10 = vmax.f32 %v723_v6, 0.0  ;;  %v1917_v5 = vpack.c.bf16 %v123_v49, %v122_v4  ;;  %1906 = vmatpush3.bf16.msra.mxu1 %v1905_v2  ;;  %v132_v6 = vld [vmem:[%s2659_s15 + $0x10] sm:$0xff]  ;;  %v1291_v4 = vld [vmem:[%s2663_s19] sm:$0xff]  ;;  %v1292_v49 = vld [vmem:[%s2663_s19 + $0x8] sm:$0xff] }
 0x321   :  { %1715 = vmatmul.mubr.msk.f32.gmra.mrb[8].mxu1 %vm148_vm1, %v728_v7  ;;  %v724_v56 = vadd.f32 %v1485_v46, %v712_v9  ;;  %1907 = vmatprep.subr.bf16.mxu1 %v2030_v3  ;;  %v133_v7 = vld [vmem:[%s2659_s15 + $0x18] sm:$0xff] }
 0x322   :  { %1717 = vmatprep.mubr.msk.f32.mxu1 %vm148_vm1, %v729_v10  ;;  %v1908_v9 = vpack.c.bf16 %v133_v7, %v132_v6  ;;  %v124_v10 = vld [vmem:[%s2658_s14 + $0x10] sm:$0xff]  ;;  %v1941_v6 = vpack.c.bf16 %v1292_v49, %v1291_v4  ;;  %v1294_v7 = vld [vmem:[%s2663_s19 + $0x18] sm:$0xff] }
 0x323   :  { %v730_v11 = vmax.f32 %v724_v56, 0.0  ;;  %v125_v56 = vld [vmem:[%s2658_s14 + $0x18] sm:$0xff] }
 0x324   :  { %1909 = vmatpush3.bf16.msra.mxu1 %v1908_v9 }
 0x325   :  { %1718 = vmatmul.mubr.msk.f32.gmra.mrb[10].mxu1 %vm148_vm1, %v730_v11  ;;  %v1920_v11 = vpack.c.bf16 %v125_v56, %v124_v10  ;;  %1910 = vmatprep.subr.bf16.mxu1 %v2030_v3  ;;  %v1295_v10 = vld [vmem:[%s2663_s19 + $0x20] sm:$0xff]  ;;  %v1296_v56 = vld [vmem:[%s2663_s19 + $0x28] sm:$0xff] }
 0x326   :  { %1757 = vmatprep.mubr.msk.f32.mxu1 %vm2031_vm0, %v2032_v8 }
 0x3ed   :  { %v1713_v63 = vpop.f32.mrb[6].mxu1 }
 0x3ee   :  { %v827_v12 = vadd.f32 %v1713_v63, %v1486_v57  ;;  %v821_v13 = vpop.f32.mrb[7].mxu1  ;;  %v135_v63 = vld [vmem:[%s2659_s15 + $0x28] sm:$0xff] }
 0x3ef   :  { %v822_v14 = vadd.f32 %v1486_v57, %v821_v13  ;;  %v126_v13 = vld [vmem:[%s2658_s14 + $0x20] sm:$0xff] }
 0x3f1   :  { %v1896_v15 = vpack.c.bf16 %v827_v12, %v822_v14  ;;  %v127_v14 = vld [vmem:[%s2658_s14 + $0x28] sm:$0xff] }
 0x3f3   :  { %1897 = vmatpush3.bf16.msra.mxu0 %v1896_v15  ;;  %v1923_v15 = vpack.c.bf16 %v127_v14, %v126_v13 }
 0x3f4   :  { %v1716_v16 = vpop.f32.mrb[8].mxu1  ;;  %1898 = vmatprep.subr.bf16.mxu0 %v2030_v3 }
 0x3f5   :  { %v837_v17 = vadd.f32 %v1716_v16, %v1486_v57  ;;  %v831_v18 = vpop.f32.mrb[9].mxu1  ;;  %v136_v16 = vld [vmem:[%s2659_s15 + $0x30] sm:$0xff] }
 0x3f6   :  { %v832_v19 = vadd.f32 %v1486_v57, %v831_v18 }
 0x3f8   :  { %v1899_v21 = vpack.c.bf16 %v837_v17, %v832_v19  ;;  %v1719_v22 = vpop.f32.mrb[10].mxu1  ;;  %v137_v17 = vld [vmem:[%s2659_s15 + $0x38] sm:$0xff]  ;;  %v128_v19 = vld [vmem:[%s2658_s14 + $0x30] sm:$0xff] }
 0x3f9   :  { %v847_v24 = vadd.f32 %v1719_v22, %v1486_v57  ;;  %v841_v25 = vpop.f32.mrb[11].mxu1  ;;  %v1914_v18 = vpack.c.bf16 %v137_v17, %v136_v16  ;;  %v139_v22 = vld [vmem:[%s2661_s17] sm:$0xff] }
 0x3fa   :  { %v842_v26 = vadd.f32 %v1486_v57, %v841_v25  ;;  %1900 = vmatpush3.bf16.msra.mxu0 %v1899_v21  ;;  %v134_v57 = vld [vmem:[%s2659_s15 + $0x20] sm:$0xff]  ;;  %v1926_v21 = vpack.c.bf16 %v129_v20, %v128_v19 }
 0x3fb   :  { %1901 = vmatprep.subr.bf16.mxu0 %v2030_v3  ;;  %v1911_v12 = vpack.c.bf16 %v135_v63, %v134_v57  ;;  %v1505_v57 = vld [vmem:[%s2660_s16] ss:$0 sm:$0xff] }
 0x3fc   :  { %v1902_v28 = vpack.c.bf16 %v847_v24, %v842_v26 }
 0x3fd   :  { %1912 = vmatpush3.bf16.msra.mxu1 %v1911_v12 }
 0x3fe   :  { %1903 = vmatpush3.bf16.msra.mxu0 %v1902_v28  ;;  %1913 = vmatprep.subr.bf16.mxu1 %v2030_v3 }
 0x3ff   :  { %1916 = vmatprep.subr.bf16.mxu0 %v2030_v3 }
 0x401   :  { %1733 = vmatmul.mubr.msk.f32.vlgmr.msra.gmra.mrb[8].mxu0 %vm864_vm6, %v861_v29  ;;  %1915 = vmatpush3.bf16.msra.mxu1 %v1914_v18 }
 0x402   :  { %1735 = vmatprep.mubr.msk.f32.mxu0 %vm2031_vm0, %v2032_v8  ;;  %1918 = vmatpush3.bf16.msra.mxu0 %v1917_v5  ;;  %v1293_v5 = vld [vmem:[%s2663_s19 + $0x10] sm:$0xff] }
 0x403   :  { %1919 = vmatprep.subr.bf16.mxu0 %v2030_v3  ;;  %1928 = vmatprep.subr.bf16.mxu1 %v2030_v3  ;;  %v1944_v9 = vpack.c.bf16 %v1294_v7, %v1293_v5 }
 0x404   :  { %1758 = vmatmul.mubr.msk.f32.vlgmr.msra.gmra.mrb[12].mxu1 %vm148_vm1, %v2237_v34  ;;  %v140_v34 = vld [vmem:[%s2661_s17 + $0x8] sm:$0xff] }
 0x405   :  { %1736 = vmatmul.mubr.msk.f32.gmra.mrb[10].mxu0 %vm864_vm6, %v862_v30  ;;  %1760 = vmatprep.mubr.msk.f32.mxu1 %vm2031_vm0, %v2032_v8  ;;  %v1929_v24 = vpack.c.bf16 %v140_v34, %v139_v22 }
 0x406   :  { %1738 = vmatprep.mubr.msk.f32.mxu0 %vm2031_vm0, %v2032_v8  ;;  %1921 = vmatpush3.bf16.msra.mxu0 %v1920_v11  ;;  %v1947_v11 = vpack.c.bf16 %v1296_v56, %v1295_v10 }
 0x407   :  { %1922 = vmatprep.subr.bf16.mxu0 %v2030_v3  ;;  %1930 = vmatpush3.bf16.msra.mxu1 %v1929_v24 }
 0x408   :  { %1761 = vmatmul.mubr.msk.f32.gmra.mrb[14].mxu1 %vm148_vm1, %v2256_v38  ;;  %v142_v38 = vld [vmem:[%s2661_s17 + $0x18] sm:$0xff]  ;;  %1931 = vmatprep.subr.bf16.mxu1 %v2030_v3 }
 0x409   :  { %1739 = vmatmul.mubr.msk.f32.gmra.mrb[12].mxu0 %vm864_vm6, %v863_v31  ;;  %1763 = vmatprep.mubr.msk.f32.mxu1 %vm2031_vm0, %v2032_v8 }
 0x40a   :  { %1782 = vmatprep.mubr.msk.f32.mxu0 %vm2031_vm0, %v2032_v8  ;;  %1924 = vmatpush3.bf16.msra.mxu0 %v1923_v15 }
 0x40b   :  { %1925 = vmatprep.subr.bf16.mxu0 %v2030_v3 }
 0x40c   :  { %1764 = vmatmul.mubr.msk.f32.gmra.mrb[16].mxu1 %vm148_vm1, %v2271_v41  ;;  %v1932_v41 = vpack.c.bf16 %v142_v38, %v141_v23  ;;  %v1297_v38 = vld [vmem:[%s2663_s19 + $0x30] sm:$0xff] }
 0x40d   :  { %1807 = vmatprep.mubr.msk.f32.mxu1 %vm2031_vm0, %v2032_v8 }
 0x40e   :  { %1927 = vmatpush3.bf16.msra.mxu0 %v1926_v21  ;;  %1933 = vmatpush3.bf16.msra.mxu1 %v1932_v41  ;;  %v1298_v41 = vld [vmem:[%s2663_s19 + $0x38] sm:$0xff] }
 0x40f   :  { %1940 = vmatprep.subr.bf16.mxu0 %v2030_v3  ;;  %1934 = vmatprep.subr.bf16.mxu1 %v2030_v3 }
 0x4d4   :  { %v940_v32 = vpop.f32.mrb[8].mxu0 }
 0x4d5   :  { %v1734_v33 = vpop.f32.mrb[9].mxu0  ;;  %v954_v35 = vsel %vm148_vm1, %v940_v32, 0.0 }
 0x4d6   :  { %955 = vadd.xlane.f32.xlu1 %v954_v35  ;;  %v1497_v35 = vld [vmem:[%s2656_s12] ss:$0 sm:$0xff] }
 0x4d8   :  { %v945_v36 = vpop.f32.mrb[10].mxu0 }
 0x4d9   :  { %v1737_v37 = vpop.f32.mrb[11].mxu0  ;;  %v957_v39 = vsel %vm148_vm1, %v945_v36, 0.0 }
 0x4da   :  { %958 = vadd.xlane.f32.xlu0 %v957_v39  ;;  %v1498_v37 = vld [vmem:[%s2657_s13] ss:$0 sm:$0xff] }
 0x4dc   :  { %v950_v43 = vpop.f32.mrb[12].mxu0 }
 0x4dd   :  { %v1740_v45 = vpop.f32.mrb[13].mxu0  ;;  %v961_v46 = vsel %vm960_vm9, %v950_v43, 0.0 }
 0x4de   :  { %962 = vadd.xlane.f32.xlu1 %v961_v46 }
 0x563   :  { %v956_v47 = vpop.xlane.xlu1 %955 }
 0x564   :  { %v964_v48 = vmul.f32 0.015625, %v956_v47 }
 0x566   :  { %v2432_v50 = vsub.f32 %v940_v32, %v964_v48 }
 0x567   :  { %v959_v51 = vpop.xlane.xlu0 %958 }
 0x568   :  { %v965_v52 = vmul.f32 0.015625, %v959_v51  ;;  %v970_v53 = vmul.f32 %v2432_v50, %v2432_v50 }
 0x56a   :  { %v2436_v54 = vsub.f32 %v945_v36, %v965_v52  ;;  %v973_v55 = vsel %vm148_vm1, %v970_v53, 0.0 }
 0x56b   :  { %974 = vadd.xlane.f32.xlu0 %v973_v55  ;;  %v963_v58 = vpop.xlane.xlu1 %962  ;;  %v144_v55 = vld [vmem:[%s2661_s17 + $0x28] sm:$0xff] }
 0x56c   :  { %v966_v59 = vmul.f32 0.015625, %v963_v58  ;;  %v971_v60 = vmul.f32 %v2436_v54, %v2436_v54 }
 0x56e   :  { %v2441_v40 = vsub.f32 %v950_v43, %v966_v59  ;;  %v976_v61 = vsel %vm148_vm1, %v971_v60, 0.0  ;;  %v1078_v59 = vpop.f32.mrb[12].mxu1 }
 0x56f   :  { %977 = vadd.xlane.f32.xlu1 %v976_v61  ;;  %v1759_v60 = vpop.f32.mrb[13].mxu1  ;;  %v146_v61 = vld [vmem:[%s2661_s17 + $0x38] sm:$0xff] }
 0x570   :  { %v972_v62 = vmul.f32 %v2441_v40, %v2441_v40 }
 0x572   :  { %v979_v42 = vsel %vm960_vm9, %v972_v62, 0.0 }
 0x573   :  { %980 = vadd.xlane.f32.xlu0 %v979_v42  ;;  %v1083_v42 = vpop.f32.mrb[14].mxu1 }
 0x574   :  { %v1762_v0 = vpop.f32.mrb[15].mxu1 }
 0x575   :  { %v1088_v1 = vpop.f32.mrb[16].mxu1 }
 0x576   :  { %v1765_v2 = vpop.f32.mrb[17].mxu1 }
 0x5f8   :  { %v975_v25 = vpop.xlane.xlu0 %974 }
 0x5f9   :  { %v982_v26 = vmul.f32 0.015625, %v975_v25  ;;  %v1950_v25 = vpack.c.bf16 %v1298_v41, %v1297_v38 }
 0x5fb   :  { %v985_v27 = vadd.f32 1e-05, %v982_v26  ;;  %v1506_v26 = vld [vmem:[%s2662_s18] ss:$0 sm:$0xff] }
 0x5fc   :  { %v978_v28 = vpop.xlane.xlu1 %977 }
 0x5fd   :  { %1988 = vrsqrt.f32 %v985_v27  ;;  %v983_v29 = vmul.f32 0.015625, %v978_v28 }
 0x5ff   :  { %v986_v44 = vadd.f32 1e-05, %v983_v29 }
 0x600   :  { %v981_v30 = vpop.xlane.xlu0 %980 }
 0x601   :  { %1990 = vrsqrt.f32 %v986_v44  ;;  %v984_v31 = vmul.f32 0.015625, %v981_v30 }
 0x603   :  { %v987_v32 = vadd.f32 1e-05, %v984_v31 }
 0x605   :  { %1992 = vrsqrt.f32 %v987_v32 }
 0x607   :  { %v1989_v33 = vpop.eup %1988 }
 0x608   :  { %v991_v36 = vmul.f32 %v1989_v33, %v2432_v50 }
 0x60a   :  { %v1000_v39 = vmul.f32 %v1497_v35, %v991_v36 }
 0x60b   :  { %v1991_v43 = vpop.eup %1990 }
 0x60c   :  { %v1009_v45 = vadd.f32 %v1498_v37, %v1000_v39  ;;  %v992_v46 = vmul.f32 %v1991_v43, %v2436_v54  ;;  %v143_v54 = vld [vmem:[%s2661_s17 + $0x20] sm:$0xff] }
 0x60d   :  { %v1935_v58 = vpack.c.bf16 %v144_v55, %v143_v54  ;;  %v1514_v39 = vld [vmem:[%s2665_s21] ss:$0 sm:$0xff] }
 0x60e   :  { %1783 = vmatmul.mubr.msk.f32.vlgmr.msra.gmra.mrb[14].mxu0 %vm148_vm1, %v1009_v45  ;;  %v1001_v47 = vmul.f32 %v1497_v35, %v992_v46 }
 0x60f   :  { %v1993_v48 = vpop.eup %1992  ;;  %1785 = vmatprep.mubr.msk.f32.mxu0 %vm2031_vm0, %v2032_v8  ;;  %1936 = vmatpush3.bf16.msra.mxu1 %v1935_v58 }
 0x610   :  { %v1010_v51 = vadd.f32 %v1498_v37, %v1001_v47  ;;  %v993_v52 = vmul.f32 %v1993_v48, %v2441_v40  ;;  %1937 = vmatprep.subr.bf16.mxu1 %v2030_v3  ;;  %v145_v40 = vld [vmem:[%s2661_s17 + $0x30] sm:$0xff]  ;;  %1942 = vmatpush3.bf16.msra.mxu0 %v1941_v6 }
 0x611   :  { %v1938_v62 = vpack.c.bf16 %v146_v61, %v145_v40  ;;  %1943 = vmatprep.subr.bf16.mxu0 %v2030_v3 }
 0x612   :  { %1786 = vmatmul.mubr.msk.f32.gmra.mrb[16].mxu0 %vm148_vm1, %v1010_v51  ;;  %v1002_v50 = vmul.f32 %v1497_v35, %v993_v52  ;;  %v1510_v35 = vld [vmem:[%s2664_s20] ss:$0 sm:$0xff]  ;;  %s2035_s20 = smov [#allocation2]  }
 0x613   :  { %1788 = vmatprep.mubr.msk.f32.mxu0 %vm2031_vm0, %v2032_v8  ;;  %1939 = vmatpush3.bf16.msra.mxu1 %v1938_v62  ;;  %s1449_s21 = sshll.u32 %s2035_s20, 4  ;;  %s1450_s21 = int_to_ptr.vmem [resolvable:$true] %s1449_s21 }
 0x614   :  { %v1011_v53 = vadd.f32 %v1498_v37, %v1002_v50  ;;  %1952 = vmatprep.subr.bf16.mxu1 %v2030_v3  ;;  %1945 = vmatpush3.bf16.msra.mxu0 %v1944_v9  ;;  %s2006_s25 = scalar_lea.vmem %s1450_s21, 384  ;;  %p2011_p1 = scmp.lt.s32.totalorder %s1450_s21, %s1450_s21 }
 0x615   :  { %1946 = vmatprep.subr.bf16.mxu0 %v2030_v3  ;;  %p2007_p0 = scmp.ne.s32.totalorder %s1450_s21, %s2006_s25  ;;  %p2012_p2 = scmp.lt.s32.totalorder %s2006_s25, %s2006_s25 }
 0x616   :  { %1789 = vmatmul.mubr.msk.f32.gmra.mrb[18].mxu0 %vm148_vm1, %v1011_v53 }
 0x617   :  { %1832 = vmatprep.mubr.msk.f32.mxu0 %vm2031_vm0, %v2032_v8  ;;  %p2013_p3 = por %p2012_p2, %p2011_p1 }
 0x618   :  { %1948 = vmatpush3.bf16.msra.mxu0 %v1947_v11 }
 0x619   :  { %1949 = vmatprep.subr.bf16.mxu0 %v2030_v3  ;;  %p2014_p4 = pnand %p2013_p3, %p2007_p0 }
 0x61c   :  { %1951 = vmatpush3.bf16.msra.mxu0 %v1950_v25 }
 0x6e1   :  { %v1167_v63 = vpop.f32.mrb[14].mxu0 }
 0x6e2   :  { %v1168_v12 = vadd.f32 %v1167_v63, %v1078_v59  ;;  %v1784_v13 = vpop.f32.mrb[15].mxu0 }
 0x6e4   :  { %v1187_v14 = vadd.f32 %v1505_v57, %v1168_v12 }
 0x6e5   :  { %v1172_v15 = vpop.f32.mrb[16].mxu0 }
 0x6e6   :  { %v1190_v16 = vmax.f32 %v1187_v14, 0.0  ;;  %v1173_v17 = vadd.f32 %v1172_v15, %v1083_v42  ;;  %v1787_v18 = vpop.f32.mrb[17].mxu0 }
 0x6e8   :  { %v1188_v19 = vadd.f32 %v1505_v57, %v1173_v17  ;;  %1808 = vmatmul.mubr.msk.f32.vlgmr.msra.gmra.mrb[18].mxu1 %vm148_vm1, %v1190_v16 }
 0x6e9   :  { %v1177_v20 = vpop.f32.mrb[18].mxu0  ;;  %1810 = vmatprep.mubr.msk.f32.mxu1 %vm2031_vm0, %v2032_v8  ;;  %1956 = vmatpush3.bf16.msra.mxu1 %v1941_v6 }
 0x6ea   :  { %v1191_v21 = vmax.f32 %v1188_v19, 0.0  ;;  %v1178_v22 = vadd.f32 %v1177_v20, %v1088_v1  ;;  %v1790_v34 = vpop.f32.mrb[19].mxu0  ;;  %1953 = vmatprep.subr.bf16.mxu1 %v2030_v3 }
 0x6ec   :  { %v1189_v23 = vadd.f32 %v1505_v57, %v1178_v22  ;;  %1811 = vmatmul.mubr.msk.f32.gmra.mrb[20].mxu1 %vm148_vm1, %v1191_v21 }
 0x6ed   :  { %1813 = vmatprep.mubr.msk.f32.mxu1 %vm2031_vm0, %v2032_v8  ;;  %1957 = vmatpush3.bf16.msra.mxu1 %v1944_v9 }
 0x6ee   :  { %v1192_v24 = vmax.f32 %v1189_v23, 0.0  ;;  %1954 = vmatprep.subr.bf16.mxu1 %v2030_v3 }
 0x6f0   :  { %1814 = vmatmul.mubr.msk.f32.gmra.mrb[22].mxu1 %vm148_vm1, %v1192_v24 }
 0x6f1   :  { %1958 = vmatpush3.bf16.msra.mxu1 %v1947_v11  ;;  %1838 = vmatprep.mubr.msk.f32.mxu1 %vm2031_vm0, %v2032_v8 }
 0x6f2   :  { %1955 = vmatprep.subr.bf16.mxu1 %v2030_v3 }
 0x6f5   :  { %1959 = vmatpush3.bf16.msra.mxu1 %v1950_v25 }
 0x7bb   :  { %v1274_v27 = vpop.f32.mrb[18].mxu1 }
 0x7bc   :  { %v1275_v28 = vadd.f32 %v1506_v26, %v1274_v27  ;;  %v1809_v29 = vpop.f32.mrb[19].mxu1 }
 0x7be   :  { %1288 = vst.msk [vmem:[#allocation2] sm:$0xff] %vm148_vm1, %v1275_v28  ;;  %1833 = vmatmul.mubr.msk.f32.vlgmr.msra.gmra.mrb[20].mxu0 %vm148_vm1, %v1275_v28 }
 0x7bf   :  { %v1279_v3 = vpop.f32.mrb[20].mxu1  ;;  %1835 = vmatprep.mubr.msk.f32.mxu0 %vm2031_vm0, %v2032_v8 }
 0x7c0   :  { %v1280_v44 = vadd.f32 %v1506_v26, %v1279_v3  ;;  %v1812_v30 = vpop.f32.mrb[21].mxu1 }
 0x7c2   :  { %1289 = vst.msk [vmem:[#allocation2 + $0x8] sm:$0xff] %vm148_vm1, %v1280_v44  ;;  %1836 = vmatmul.mubr.msk.f32.gmra.mrb[22].mxu0 %vm148_vm1, %v1280_v44 }
 0x7c3   :  { %v1284_v31 = vpop.f32.mrb[22].mxu1 }
 0x7c4   :  { %v1285_v32 = vadd.f32 %v1506_v26, %v1284_v31  ;;  %v1815_v33 = vpop.f32.mrb[23].mxu1 }
 0x7c6   :  { %1290 = vst.msk [vmem:[#allocation2 + $0x10] sm:$0xf] %vm960_vm9, %v1285_v32  ;;  %1839 = vmatmul.mubr.msk.f32.vlgmr.msra.gmra.mrb[24].mxu1 %vm148_vm1, %v1285_v32 }
 0x891   :  { %v1381_v36 = vpop.f32.mrb[20].mxu0 }
 0x892   :  { %v1382_v37 = vadd.f32 %v1510_v35, %v1381_v36  ;;  %v1834_v8 = vpop.f32.mrb[21].mxu0 }
 0x894   :  { %v1395_v43 = vmax.f32 %v1382_v37, 0.0 }
 0x895   :  { %v1386_v45 = vpop.f32.mrb[22].mxu0 }
 0x896   :  { %v1387_v46 = vadd.f32 %v1510_v35, %v1386_v45  ;;  %v1837_v47 = vpop.f32.mrb[23].mxu0  ;;  %v1405_v48 = vmul.f32 %v1514_v39, %v1395_v43 }
 0x898   :  { %v1396_v51 = vmax.f32 %v1387_v46, 0.0  ;;  %v1408_v52 = vsel %vm148_vm1, %v1405_v48, 0.0 }
 0x899   :  { %v1391_v50 = vpop.f32.mrb[24].mxu1  ;;  %1409 = vadd.xlane.f32.xlu1 %v1408_v52 }
 0x89a   :  { %v1392_v53 = vadd.f32 %v1510_v35, %v1391_v50  ;;  %v1840_v54 = vpop.f32.mrb[25].mxu1  ;;  %v1406_v55 = vmul.f32 %v1514_v39, %v1396_v51 }
 0x89c   :  { %v1397_v58 = vmax.f32 %v1392_v53, 0.0  ;;  %v1411_v59 = vsel %vm148_vm1, %v1406_v55, 0.0 }
 0x89d   :  { %1412 = vadd.xlane.f32.xlu0 %v1411_v59 }
 0x89e   :  { %v1407_v60 = vmul.f32 %v1514_v39, %v1397_v58 }
 0x8a0   :  { %v1414_v40 = vsel %vm960_vm9, %v1407_v60, 0.0 }
 0x8a1   :  { %1415 = vadd.xlane.f32.xlu1 %v1414_v40 }
 0x8a2   :  { %2017 = shalt.err (!%p2014_p4)
}
 0x8a3   :  { %s2018_s10 = scalar_lea.hbm %s2666_s22, 384 }
 0x8a4   :  { %p2019_p5 = scmp.ne.s32.totalorder %s2666_s22, %s2018_s10  ;;  %p2022_p6 = scmp.lt.u32.totalorder %s2018_s10, %s2666_s22 }
 0x8a6   :  { %p2024_p7 = pnand %p2022_p6, %p2019_p5 }
 0x8a8   :  { %2027 = shalt.err (!%p2024_p7)
}
 0x8a9   :  { %s2036_s6 = smov 128   ;;  %s2037_s17 = smov 8   ;;  %vm1439_vm0 = vcmask 7168   ;;  %vm1442_vm1 = vcmask 3072  }
 0x8aa   :  { %1455 = dma.vmem_to_hbm [thread:$0]  %s1450_s21, 384, %s2666_s22, [#allocation3], %s2036_s6, %s2036_s6, %s2037_s17  }
 0x926   :  { %v1410_v61 = vpop.xlane.xlu1 %1409 }
 0x927   :  { %v1515_v62 = vmul.f32 -1.6666666, %v1410_v61 }
 0x929   :  { %v1424_v42 = vmul.f32 1.442695, %v1515_v62 }
 0x92a   :  { %v1413_v0 = vpop.xlane.xlu0 %1412 }
 0x92b   :  { %1994 = vpow2.f32 %v1424_v42  ;;  %v1516_v1 = vmul.f32 -1.6666666, %v1413_v0 }
 0x92d   :  { %v1426_v2 = vmul.f32 1.442695, %v1516_v1 }
 0x92e   :  { %v1416_v4 = vpop.xlane.xlu1 %1415 }
 0x92f   :  { %1996 = vpow2.f32 %v1426_v2  ;;  %v1517_v49 = vmul.f32 -1.6666666, %v1416_v4 }
 0x931   :  { %v1428_v5 = vmul.f32 1.442695, %v1517_v49 }
 0x933   :  { %1998 = vpow2.f32 %v1428_v5 }
 0x935   :  { %v1995_v6 = vpop.eup %1994 }
 0x936   :  { %v1430_v7 = vadd.f32 1.0, %v1995_v6 }
 0x938   :  { %2000 = vrcp.f32 %v1430_v7 }
 0x939   :  { %v1997_v9 = vpop.eup %1996 }
 0x93a   :  { %v1431_v10 = vadd.f32 1.0, %v1997_v9 }
 0x93c   :  { %2002 = vrcp.f32 %v1431_v10 }
 0x93d   :  { %v1999_v56 = vpop.eup %1998 }
 0x93e   :  { %v1432_v11 = vadd.f32 1.0, %v1999_v56 }
 0x940   :  { %2004 = vrcp.f32 %v1432_v11 }
 0x942   :  { %v2001_v57 = vpop.eup %2000 }
 0x943   :  { %1440 = vst.msk [vmem:[%s2667_s23] sm:$0xff] %vm1439_vm0, %v2001_v57 }
 0x946   :  { %v2003_v63 = vpop.eup %2002 }
 0x947   :  { %1441 = vst.msk [vmem:[%s2667_s23 + $0x8] sm:$0xff] %vm1439_vm0, %v2003_v63 }
 0x94a   :  { %v2005_v12 = vpop.eup %2004 }
 0x94b   :  { %1443 = vst.msk [vmem:[%s2667_s23 + $0x10] sm:$0xf] %vm1442_vm1, %v2005_v12 }
 0x94c   :  { %2028 = dma.done.wait [#allocation3], 384  }
 0x94d   :  { %2029 = vsyncadd [#allocation3], 4294966912 }
 0x94e   :  { %1463 = vsyncpa [#allocation3], 1 }

</bundles_post_ra>
